<compile_context>
chip_gen: v7x
topology: tpu7x:2x2x1
jax: 0.10.0
libtpu: 0.0.40
codegen_flags: <defaults>
</compile_context>

<pallas_src>
import jax
import jax.numpy as jnp
import numpy as np
from jax.experimental import pallas as pl
from jax.experimental.pallas import tpu as pltpu

F_IN = 739       # BatchNorm1d(739) / Lin1 in-features
F_PAD = 768      # Lin1 contraction dim zero-padded (exact; pads are zeros)
H1 = 128         # Lin1 out-features == MHA "batch" size
E = 4            # embed dim == num_heads -> head_dim = 1
F_FLAT = 512     # 128 * 4 after Flatten
H2 = 32          # Lin2 out
F_OUT = 2        # Lin3 out
OUT_PAD = 128    # lane-padded kernel output width (sliced to 2 in the wrapper)
EPS = 1e-5

# Flat SMEM scalar-coefficient layout (f32[44]):
#   [6e+0 .. 6e+5]  per head e:  a, b, c, d, wv, bv
#                   with score  s_e[i,j,b] = (a*h[i,b] + c)*h[j,b] + (b*h[i,b] + d)
#   [24 + ep*4 + e] out_proj weight W_o[ep, e]
#   [40 + ep]       out_proj bias   b_o[ep]
OW_OFF = 6 * E
OB_OFF = OW_OFF + E * E
N_COEF = OB_OFF + E


def _attention_model_kernel(coef_ref, x_ref, bn0g_ref, bn0b_ref, w1t_ref, b1_ref,
                            bn1g_ref, bn1b_ref, w2t_ref, b2_ref, w3t_ref, b3_ref,
                            out_ref):
    # ---- BatchNorm1d(739), training-mode batch statistics (padded cols stay 0) ----
    x = x_ref[...]
    mu0 = jnp.mean(x, axis=0, keepdims=True)
    var0 = jnp.mean((x - mu0) ** 2, axis=0, keepdims=True)
    xn = (x - mu0) * jax.lax.rsqrt(var0 + EPS) * bn0g_ref[...] + bn0b_ref[...]

    # ---- Lin1 + ReLU: one (n, 768) x (768, 128) MXU matmul ----
    h = jnp.maximum(
        jnp.dot(xn, w1t_ref[...], preferred_element_type=jnp.float32) + b1_ref[...],
        0.0)                                                      # (n, 128)

    # ---- MultiheadAttention(4, 4): head_dim = 1, query = key = value ----
    # q_e = wq_e*h + bq_e, k_e = wk_e*h + bk_e, v_e = wv_e*h + bv_e (scalars from SMEM).
    # Vectorized softmax over keys j (axis 1), shared h_j structure across heads.
    h_j = h[None, :, :]                                           # (1, n, 128)
    o_heads = []
    for e in range(E):
        a = coef_ref[6 * e + 0]
        b = coef_ref[6 * e + 1]
        c = coef_ref[6 * e + 2]
        d = coef_ref[6 * e + 3]
        wv = coef_ref[6 * e + 4]
        bv = coef_ref[6 * e + 5]
        qa = a * h + c                                            # (n, 128) coeff of h_j
        qb = b * h + d                                            # (n, 128) const over j
        s = qa[:, None, :] * h_j + qb[:, None, :]                 # (n, n, 128) scores
        m = jnp.max(s, axis=1, keepdims=True)                     # max over keys j
        p = jnp.exp(s - m)                                        # unnormalized softmax
        denom = jnp.sum(p, axis=1)                                # (n, 128)
        wh = jnp.sum(p * h_j, axis=1)                             # (n, 128) sum_j p*h_j
        # o_e = sum_j softmax(s)_j * (wv*h_j + bv) = wv*wh/denom + bv
        o_heads.append(wv * (wh / denom) + bv)                    # (n, 128)

    # ---- out_proj (4x4 scalar mix) + Flatten (ep-major layout) + ReLU ----
    projs = []
    for ep in range(E):
        acc = o_heads[0] * coef_ref[OW_OFF + ep * E + 0]
        for e in range(1, E):
            acc = acc + o_heads[e] * coef_ref[OW_OFF + ep * E + e]
        projs.append(acc + coef_ref[OB_OFF + ep])
    y = jnp.maximum(jnp.concatenate(projs, axis=-1), 0.0)         # (n, 512) lane-dense

    # ---- BatchNorm1d(512) fused (one stats pass) + Lin2 (single K=512 matmul) + ReLU ----
    mu1 = jnp.mean(y, axis=0, keepdims=True)
    var1 = jnp.mean((y - mu1) ** 2, axis=0, keepdims=True)
    yn = (y - mu1) * jax.lax.rsqrt(var1 + EPS) * bn1g_ref[...] + bn1b_ref[...]
    z = jnp.maximum(
        jnp.dot(yn, w2t_ref[...], preferred_element_type=jnp.float32) + b2_ref[...],
        0.0)                                                      # (n, 32)

    # ---- Lin3 (output lane-padded to 128; padded cols are exact zeros) ----
    out_ref[...] = (jnp.dot(z, w3t_ref[...], preferred_element_type=jnp.float32)
                    + b3_ref[...])


def attention_model_forward(x, params):
    n = x.shape[0]
    (bn0_g, bn0_b, w1, b1, in_w, in_b, out_w, out_b,
     bn1_g, bn1_b, w2, b2, w3, b3) = params

    # --- plain-JAX parameter preprocessing (shape/layout only, all exact) ---
    # Pad the Lin1 contraction dim 739 -> 768 (gamma/beta/W pads are zeros -> exact).
    x_p = jnp.pad(x.astype(jnp.float32), ((0, 0), (0, F_PAD - F_IN)))
    bn0g_p = jnp.pad(bn0_g, (0, F_PAD - F_IN)).reshape(1, F_PAD)
    bn0b_p = jnp.pad(bn0_b, (0, F_PAD - F_IN)).reshape(1, F_PAD)
    w1t_p = jnp.pad(w1.T, ((0, F_PAD - F_IN), (0, 0)))            # (768, 128)

    # MHA scalar coefficients: the 4 identical embed channels make each projection
    # a scalar (row-sum of the in_proj block) times h plus a bias.
    wq_s = jnp.sum(in_w[:E], axis=1)
    wk_s = jnp.sum(in_w[E:2 * E], axis=1)
    wv_s = jnp.sum(in_w[2 * E:], axis=1)
    bq, bk, bv = in_b[:E], in_b[E:2 * E], in_b[2 * E:]
    head_coef = jnp.stack([wq_s * wk_s,      # a: coeff of h_i*h_j   (scale = 1/sqrt(1))
                           wq_s * bk,        # b: coeff of h_i
                           bq * wk_s,        # c: coeff of h_j
                           bq * bk,          # d: constant
                           wv_s, bv], axis=1).reshape(-1)          # (24,)
    coef = jnp.concatenate([head_coef, out_w.reshape(-1), out_b]).astype(jnp.float32)

    # Flatten index f = b*4 + ep is permuted to the kernel's ep-major order ep*128 + b;
    # the permutation is folded into the BN1 params and the W2 columns.
    bn1g_p = bn1_g.reshape(H1, E).T.reshape(1, F_FLAT)
    bn1b_p = bn1_b.reshape(H1, E).T.reshape(1, F_FLAT)
    w2t_p = w2.reshape(H2, H1, E).transpose(2, 1, 0).reshape(F_FLAT, H2)   # (512, 32)

    # Lane-pad Lin3 output 2 -> 128 (zero weights / bias -> exact), sliced after the call.
    w3t_p = jnp.pad(w3.T, ((0, 0), (0, OUT_PAD - F_OUT)))         # (32, 128)
    b3_p = jnp.pad(b3, (0, OUT_PAD - F_OUT)).reshape(1, OUT_PAD)

    args = (coef, x_p, bn0g_p, bn0b_p, w1t_p, b1.reshape(1, H1),
            bn1g_p, bn1b_p, w2t_p, b2.reshape(1, H2), w3t_p, b3_p)

    vmem = pl.BlockSpec(memory_space=pltpu.MemorySpace.VMEM)
    smem = pl.BlockSpec(memory_space=pltpu.MemorySpace.SMEM)
    in_specs = [smem] + [vmem] * 11

    out = pl.pallas_call(
        _attention_model_kernel,
        out_shape=jax.ShapeDtypeStruct((n, OUT_PAD), jnp.float32),
        in_specs=in_specs,
        out_specs=vmem,
    )(*args)
    return out[:, :F_OUT]


def init_params(key):
    ks = jax.random.split(key, 14)

    def rn(k, shape, scale=0.1):
        return scale * jax.random.normal(k, shape, jnp.float32)

    bn0_g = 1.0 + rn(ks[0], (F_IN,))
    bn0_b = rn(ks[1], (F_IN,))
    w1 = rn(ks[2], (H1, F_IN))            # PyTorch Linear weight layout (out, in)
    b1 = rn(ks[3], (H1,))
    in_w = rn(ks[4], (3 * E, E), 0.5)     # MHA in_proj_weight
    in_b = rn(ks[5], (3 * E,), 0.5)       # MHA in_proj_bias
    out_w = rn(ks[6], (E, E), 0.5)        # MHA out_proj.weight
    out_b = rn(ks[7], (E,), 0.5)          # MHA out_proj.bias
    bn1_g = 1.0 + rn(ks[8], (F_FLAT,))
    bn1_b = rn(ks[9], (F_FLAT,))
    w2 = rn(ks[10], (H2, F_FLAT))
    b2 = rn(ks[11], (H2,))
    w3 = rn(ks[12], (F_OUT, H2))
    b3 = rn(ks[13], (F_OUT,))
    return (bn0_g, bn0_b, w1, b1, in_w, in_b, out_w, out_b,
            bn1_g, bn1_b, w2, b2, w3, b3)


def reference_forward(x, params):
    """Pure-JAX literal translation of the PyTorch forward (for verification)."""
    (bn0_g, bn0_b, w1, b1, in_w, in_b, out_w, out_b,
     bn1_g, bn1_b, w2, b2, w3, b3) = params
    n = x.shape[0]
    mu = jnp.mean(x, axis=0)
    var = jnp.mean((x - mu) ** 2, axis=0)
    xn = (x - mu) / jnp.sqrt(var + EPS) * bn0_g + bn0_b
    h = jnp.maximum(xn @ w1.T + b1, 0.0)                          # (n, 128)
    x4 = jnp.broadcast_to(h[:, :, None], (n, H1, E))              # unsqueeze + concat x4
    wq, wk, wv = in_w[:E], in_w[E:2 * E], in_w[2 * E:]
    bq, bk, bv = in_b[:E], in_b[E:2 * E], in_b[2 * E:]
    q = x4 @ wq.T + bq                                            # (seq=n, batch=128, 4)
    k = x4 @ wk.T + bk
    v = x4 @ wv.T + bv
    scores = jnp.einsum('ibe,jbe->bije', q, k)                    # head_dim=1 -> scale 1
    attn = jax.nn.softmax(scores, axis=2)
    o = jnp.einsum('bije,jbe->ibe', attn, v)
    o = o @ out_w.T + out_b                                       # (n, 128, 4)
    y = jnp.maximum(o.reshape(n, F_FLAT), 0.0)
    mu1 = jnp.mean(y, axis=0)
    var1 = jnp.mean((y - mu1) ** 2, axis=0)
    yn = (y - mu1) / jnp.sqrt(var1 + EPS) * bn1_g + bn1_b
    z = jnp.maximum(yn @ w2.T + b2, 0.0)
    return z @ w3.T + b3


if __name__ == "__main__":
    key = jax.random.PRNGKey(0)
    kx, kp = jax.random.split(key)
    N = 8
    x = jax.random.normal(kx, (N, F_IN), jnp.float32)
    params = init_params(kp)

    out = attention_model_forward(x, params)
    out = jax.block_until_ready(out)

    ref = reference_forward(x, params)
    assert out.shape == (N, F_OUT)
    np.testing.assert_allclose(np.asarray(out), np.asarray(ref), rtol=2e-3, atol=2e-3)
    print("KERNEL_OK")
</pallas_src>

<mosaic_0001>
module attributes {stable_mosaic.version = 11 : i64} {
  func.func @_attention_model_kernel(%arg0: memref<44xf32, #tpu.memory_space<smem>>, %arg1: memref<8x768xf32, #tpu.memory_space<vmem>>, %arg2: memref<1x768xf32, #tpu.memory_space<vmem>>, %arg3: memref<1x768xf32, #tpu.memory_space<vmem>>, %arg4: memref<768x128xf32, #tpu.memory_space<vmem>>, %arg5: memref<1x128xf32, #tpu.memory_space<vmem>>, %arg6: memref<1x512xf32, #tpu.memory_space<vmem>>, %arg7: memref<1x512xf32, #tpu.memory_space<vmem>>, %arg8: memref<512x32xf32, #tpu.memory_space<vmem>>, %arg9: memref<1x32xf32, #tpu.memory_space<vmem>>, %arg10: memref<32x128xf32, #tpu.memory_space<vmem>>, %arg11: memref<1x128xf32, #tpu.memory_space<vmem>>, %arg12: memref<8x128xf32, #tpu.memory_space<vmem>>) attributes {dimension_semantics = [], scalar_prefetch = 0 : i64, scratch_operands = 0 : i64, tpu.core_type = #tpu.core_type<tc>} {
    %c0 = arith.constant 0 : index
    %c0_0 = arith.constant 0 : index
    %0 = vector.load %arg1[%c0, %c0_0] : memref<8x768xf32, #tpu.memory_space<vmem>>, vector<8x768xf32>
    %cst = arith.constant dense<0.000000e+00> : vector<768xf32>
    %1 = vector.multi_reduction <add>, %0, %cst [0] : vector<8x768xf32> to vector<768xf32>
    %2 = vector.shape_cast %1 : vector<768xf32> to vector<1x768xf32>
    %cst_1 = arith.constant 8.000000e+00 : f32
    %3 = vector.broadcast %cst_1 : f32 to vector<1x768xf32>
    %4 = arith.divf %2, %3 : vector<1x768xf32>
    %5 = vector.broadcast %4 : vector<1x768xf32> to vector<8x768xf32>
    %6 = arith.subf %0, %5 : vector<8x768xf32>
    %7 = arith.mulf %6, %6 : vector<8x768xf32>
    %cst_2 = arith.constant dense<0.000000e+00> : vector<768xf32>
    %8 = vector.multi_reduction <add>, %7, %cst_2 [0] : vector<8x768xf32> to vector<768xf32>
    %9 = vector.shape_cast %8 : vector<768xf32> to vector<1x768xf32>
    %cst_3 = arith.constant 8.000000e+00 : f32
    %10 = vector.broadcast %cst_3 : f32 to vector<1x768xf32>
    %11 = arith.divf %9, %10 : vector<1x768xf32>
    %12 = vector.broadcast %4 : vector<1x768xf32> to vector<8x768xf32>
    %13 = arith.subf %0, %12 : vector<8x768xf32>
    %cst_4 = arith.constant 9.99999974E-6 : f32
    %14 = vector.broadcast %cst_4 : f32 to vector<1x768xf32>
    %15 = arith.addf %11, %14 : vector<1x768xf32>
    %16 = math.rsqrt %15 : vector<1x768xf32>
    %17 = vector.broadcast %16 : vector<1x768xf32> to vector<8x768xf32>
    %18 = arith.mulf %13, %17 : vector<8x768xf32>
    %c0_5 = arith.constant 0 : index
    %c0_6 = arith.constant 0 : index
    %19 = vector.load %arg2[%c0_5, %c0_6] : memref<1x768xf32, #tpu.memory_space<vmem>>, vector<1x768xf32>
    %20 = vector.broadcast %19 : vector<1x768xf32> to vector<8x768xf32>
    %21 = arith.mulf %18, %20 : vector<8x768xf32>
    %c0_7 = arith.constant 0 : index
    %c0_8 = arith.constant 0 : index
    %22 = vector.load %arg3[%c0_7, %c0_8] : memref<1x768xf32, #tpu.memory_space<vmem>>, vector<1x768xf32>
    %23 = vector.broadcast %22 : vector<1x768xf32> to vector<8x768xf32>
    %24 = arith.addf %21, %23 : vector<8x768xf32>
    %c0_9 = arith.constant 0 : index
    %c0_10 = arith.constant 0 : index
    %25 = vector.load %arg4[%c0_9, %c0_10] : memref<768x128xf32, #tpu.memory_space<vmem>>, vector<768x128xf32>
    %cst_11 = arith.constant dense<0.000000e+00> : vector<8x128xf32>
    %26 = tpu.matmul %24, %25, %cst_11 {dimension_numbers = #tpu.dot_dimension_numbers<[1], [0], [0], [1], [0, 0, 1, 1], [], []>} : vector<8x768xf32>, vector<768x128xf32>, vector<8x128xf32> -> vector<8x128xf32>
    %c0_12 = arith.constant 0 : index
    %c0_13 = arith.constant 0 : index
    %27 = vector.load %arg5[%c0_12, %c0_13] : memref<1x128xf32, #tpu.memory_space<vmem>>, vector<1x128xf32>
    %28 = vector.broadcast %27 : vector<1x128xf32> to vector<8x128xf32>
    %29 = arith.addf %26, %28 : vector<8x128xf32>
    %cst_14 = arith.constant 0.000000e+00 : f32
    %30 = vector.broadcast %cst_14 : f32 to vector<8x128xf32>
    %31 = arith.maximumf %29, %30 : vector<8x128xf32>
    %32 = vector.shape_cast %31 : vector<8x128xf32> to vector<1x8x128xf32>
    %c0_15 = arith.constant 0 : index
    %33 = memref.load %arg0[%c0_15] : memref<44xf32, #tpu.memory_space<smem>>
    %c1 = arith.constant 1 : index
    %34 = memref.load %arg0[%c1] : memref<44xf32, #tpu.memory_space<smem>>
    %c2 = arith.constant 2 : index
    %35 = memref.load %arg0[%c2] : memref<44xf32, #tpu.memory_space<smem>>
    %c3 = arith.constant 3 : index
    %36 = memref.load %arg0[%c3] : memref<44xf32, #tpu.memory_space<smem>>
    %c4 = arith.constant 4 : index
    %37 = memref.load %arg0[%c4] : memref<44xf32, #tpu.memory_space<smem>>
    %c5 = arith.constant 5 : index
    %38 = memref.load %arg0[%c5] : memref<44xf32, #tpu.memory_space<smem>>
    %39 = vector.broadcast %33 : f32 to vector<8x128xf32>
    %40 = arith.mulf %39, %31 : vector<8x128xf32>
    %41 = vector.broadcast %35 : f32 to vector<8x128xf32>
    %42 = arith.addf %40, %41 : vector<8x128xf32>
    %43 = vector.broadcast %34 : f32 to vector<8x128xf32>
    %44 = arith.mulf %43, %31 : vector<8x128xf32>
    %45 = vector.broadcast %36 : f32 to vector<8x128xf32>
    %46 = arith.addf %44, %45 : vector<8x128xf32>
    %47 = vector.shape_cast %42 : vector<8x128xf32> to vector<8x1x128xf32>
    %48 = vector.broadcast %47 : vector<8x1x128xf32> to vector<8x8x128xf32>
    %49 = vector.broadcast %32 : vector<1x8x128xf32> to vector<8x8x128xf32>
    %50 = arith.mulf %48, %49 : vector<8x8x128xf32>
    %51 = vector.shape_cast %46 : vector<8x128xf32> to vector<8x1x128xf32>
    %52 = vector.broadcast %51 : vector<8x1x128xf32> to vector<8x8x128xf32>
    %53 = arith.addf %50, %52 : vector<8x8x128xf32>
    %cst_16 = arith.constant dense<0xFF800000> : vector<8x128xf32>
    %54 = vector.multi_reduction <maximumf>, %53, %cst_16 [1] : vector<8x8x128xf32> to vector<8x128xf32>
    %55 = vector.shape_cast %54 : vector<8x128xf32> to vector<8x1x128xf32>
    %56 = vector.broadcast %55 : vector<8x1x128xf32> to vector<8x8x128xf32>
    %57 = arith.subf %53, %56 : vector<8x8x128xf32>
    %58 = math.exp %57 : vector<8x8x128xf32>
    %cst_17 = arith.constant dense<0.000000e+00> : vector<8x128xf32>
    %59 = vector.multi_reduction <add>, %58, %cst_17 [1] : vector<8x8x128xf32> to vector<8x128xf32>
    %60 = vector.broadcast %32 : vector<1x8x128xf32> to vector<8x8x128xf32>
    %61 = arith.mulf %58, %60 : vector<8x8x128xf32>
    %cst_18 = arith.constant dense<0.000000e+00> : vector<8x128xf32>
    %62 = vector.multi_reduction <add>, %61, %cst_18 [1] : vector<8x8x128xf32> to vector<8x128xf32>
    %63 = arith.divf %62, %59 : vector<8x128xf32>
    %64 = vector.broadcast %37 : f32 to vector<8x128xf32>
    %65 = arith.mulf %64, %63 : vector<8x128xf32>
    %66 = vector.broadcast %38 : f32 to vector<8x128xf32>
    %67 = arith.addf %65, %66 : vector<8x128xf32>
    %c6 = arith.constant 6 : index
    %68 = memref.load %arg0[%c6] : memref<44xf32, #tpu.memory_space<smem>>
    %c7 = arith.constant 7 : index
    %69 = memref.load %arg0[%c7] : memref<44xf32, #tpu.memory_space<smem>>
    %c8 = arith.constant 8 : index
    %70 = memref.load %arg0[%c8] : memref<44xf32, #tpu.memory_space<smem>>
    %c9 = arith.constant 9 : index
    %71 = memref.load %arg0[%c9] : memref<44xf32, #tpu.memory_space<smem>>
    %c10 = arith.constant 10 : index
    %72 = memref.load %arg0[%c10] : memref<44xf32, #tpu.memory_space<smem>>
    %c11 = arith.constant 11 : index
    %73 = memref.load %arg0[%c11] : memref<44xf32, #tpu.memory_space<smem>>
    %74 = vector.broadcast %68 : f32 to vector<8x128xf32>
    %75 = arith.mulf %74, %31 : vector<8x128xf32>
    %76 = vector.broadcast %70 : f32 to vector<8x128xf32>
    %77 = arith.addf %75, %76 : vector<8x128xf32>
    %78 = vector.broadcast %69 : f32 to vector<8x128xf32>
    %79 = arith.mulf %78, %31 : vector<8x128xf32>
    %80 = vector.broadcast %71 : f32 to vector<8x128xf32>
    %81 = arith.addf %79, %80 : vector<8x128xf32>
    %82 = vector.shape_cast %77 : vector<8x128xf32> to vector<8x1x128xf32>
    %83 = vector.broadcast %82 : vector<8x1x128xf32> to vector<8x8x128xf32>
    %84 = vector.broadcast %32 : vector<1x8x128xf32> to vector<8x8x128xf32>
    %85 = arith.mulf %83, %84 : vector<8x8x128xf32>
    %86 = vector.shape_cast %81 : vector<8x128xf32> to vector<8x1x128xf32>
    %87 = vector.broadcast %86 : vector<8x1x128xf32> to vector<8x8x128xf32>
    %88 = arith.addf %85, %87 : vector<8x8x128xf32>
    %cst_19 = arith.constant dense<0xFF800000> : vector<8x128xf32>
    %89 = vector.multi_reduction <maximumf>, %88, %cst_19 [1] : vector<8x8x128xf32> to vector<8x128xf32>
    %90 = vector.shape_cast %89 : vector<8x128xf32> to vector<8x1x128xf32>
    %91 = vector.broadcast %90 : vector<8x1x128xf32> to vector<8x8x128xf32>
    %92 = arith.subf %88, %91 : vector<8x8x128xf32>
    %93 = math.exp %92 : vector<8x8x128xf32>
    %cst_20 = arith.constant dense<0.000000e+00> : vector<8x128xf32>
    %94 = vector.multi_reduction <add>, %93, %cst_20 [1] : vector<8x8x128xf32> to vector<8x128xf32>
    %95 = vector.broadcast %32 : vector<1x8x128xf32> to vector<8x8x128xf32>
    %96 = arith.mulf %93, %95 : vector<8x8x128xf32>
    %cst_21 = arith.constant dense<0.000000e+00> : vector<8x128xf32>
    %97 = vector.multi_reduction <add>, %96, %cst_21 [1] : vector<8x8x128xf32> to vector<8x128xf32>
    %98 = arith.divf %97, %94 : vector<8x128xf32>
    %99 = vector.broadcast %72 : f32 to vector<8x128xf32>
    %100 = arith.mulf %99, %98 : vector<8x128xf32>
    %101 = vector.broadcast %73 : f32 to vector<8x128xf32>
    %102 = arith.addf %100, %101 : vector<8x128xf32>
    %c12 = arith.constant 12 : index
    %103 = memref.load %arg0[%c12] : memref<44xf32, #tpu.memory_space<smem>>
    %c13 = arith.constant 13 : index
    %104 = memref.load %arg0[%c13] : memref<44xf32, #tpu.memory_space<smem>>
    %c14 = arith.constant 14 : index
    %105 = memref.load %arg0[%c14] : memref<44xf32, #tpu.memory_space<smem>>
    %c15 = arith.constant 15 : index
    %106 = memref.load %arg0[%c15] : memref<44xf32, #tpu.memory_space<smem>>
    %c16 = arith.constant 16 : index
    %107 = memref.load %arg0[%c16] : memref<44xf32, #tpu.memory_space<smem>>
    %c17 = arith.constant 17 : index
    %108 = memref.load %arg0[%c17] : memref<44xf32, #tpu.memory_space<smem>>
    %109 = vector.broadcast %103 : f32 to vector<8x128xf32>
    %110 = arith.mulf %109, %31 : vector<8x128xf32>
    %111 = vector.broadcast %105 : f32 to vector<8x128xf32>
    %112 = arith.addf %110, %111 : vector<8x128xf32>
    %113 = vector.broadcast %104 : f32 to vector<8x128xf32>
    %114 = arith.mulf %113, %31 : vector<8x128xf32>
    %115 = vector.broadcast %106 : f32 to vector<8x128xf32>
    %116 = arith.addf %114, %115 : vector<8x128xf32>
    %117 = vector.shape_cast %112 : vector<8x128xf32> to vector<8x1x128xf32>
    %118 = vector.broadcast %117 : vector<8x1x128xf32> to vector<8x8x128xf32>
    %119 = vector.broadcast %32 : vector<1x8x128xf32> to vector<8x8x128xf32>
    %120 = arith.mulf %118, %119 : vector<8x8x128xf32>
    %121 = vector.shape_cast %116 : vector<8x128xf32> to vector<8x1x128xf32>
    %122 = vector.broadcast %121 : vector<8x1x128xf32> to vector<8x8x128xf32>
    %123 = arith.addf %120, %122 : vector<8x8x128xf32>
    %cst_22 = arith.constant dense<0xFF800000> : vector<8x128xf32>
    %124 = vector.multi_reduction <maximumf>, %123, %cst_22 [1] : vector<8x8x128xf32> to vector<8x128xf32>
    %125 = vector.shape_cast %124 : vector<8x128xf32> to vector<8x1x128xf32>
    %126 = vector.broadcast %125 : vector<8x1x128xf32> to vector<8x8x128xf32>
    %127 = arith.subf %123, %126 : vector<8x8x128xf32>
    %128 = math.exp %127 : vector<8x8x128xf32>
    %cst_23 = arith.constant dense<0.000000e+00> : vector<8x128xf32>
    %129 = vector.multi_reduction <add>, %128, %cst_23 [1] : vector<8x8x128xf32> to vector<8x128xf32>
    %130 = vector.broadcast %32 : vector<1x8x128xf32> to vector<8x8x128xf32>
    %131 = arith.mulf %128, %130 : vector<8x8x128xf32>
    %cst_24 = arith.constant dense<0.000000e+00> : vector<8x128xf32>
    %132 = vector.multi_reduction <add>, %131, %cst_24 [1] : vector<8x8x128xf32> to vector<8x128xf32>
    %133 = arith.divf %132, %129 : vector<8x128xf32>
    %134 = vector.broadcast %107 : f32 to vector<8x128xf32>
    %135 = arith.mulf %134, %133 : vector<8x128xf32>
    %136 = vector.broadcast %108 : f32 to vector<8x128xf32>
    %137 = arith.addf %135, %136 : vector<8x128xf32>
    %c18 = arith.constant 18 : index
    %138 = memref.load %arg0[%c18] : memref<44xf32, #tpu.memory_space<smem>>
    %c19 = arith.constant 19 : index
    %139 = memref.load %arg0[%c19] : memref<44xf32, #tpu.memory_space<smem>>
    %c20 = arith.constant 20 : index
    %140 = memref.load %arg0[%c20] : memref<44xf32, #tpu.memory_space<smem>>
    %c21 = arith.constant 21 : index
    %141 = memref.load %arg0[%c21] : memref<44xf32, #tpu.memory_space<smem>>
    %c22 = arith.constant 22 : index
    %142 = memref.load %arg0[%c22] : memref<44xf32, #tpu.memory_space<smem>>
    %c23 = arith.constant 23 : index
    %143 = memref.load %arg0[%c23] : memref<44xf32, #tpu.memory_space<smem>>
    %144 = vector.broadcast %138 : f32 to vector<8x128xf32>
    %145 = arith.mulf %144, %31 : vector<8x128xf32>
    %146 = vector.broadcast %140 : f32 to vector<8x128xf32>
    %147 = arith.addf %145, %146 : vector<8x128xf32>
    %148 = vector.broadcast %139 : f32 to vector<8x128xf32>
    %149 = arith.mulf %148, %31 : vector<8x128xf32>
    %150 = vector.broadcast %141 : f32 to vector<8x128xf32>
    %151 = arith.addf %149, %150 : vector<8x128xf32>
    %152 = vector.shape_cast %147 : vector<8x128xf32> to vector<8x1x128xf32>
    %153 = vector.broadcast %152 : vector<8x1x128xf32> to vector<8x8x128xf32>
    %154 = vector.broadcast %32 : vector<1x8x128xf32> to vector<8x8x128xf32>
    %155 = arith.mulf %153, %154 : vector<8x8x128xf32>
    %156 = vector.shape_cast %151 : vector<8x128xf32> to vector<8x1x128xf32>
    %157 = vector.broadcast %156 : vector<8x1x128xf32> to vector<8x8x128xf32>
    %158 = arith.addf %155, %157 : vector<8x8x128xf32>
    %cst_25 = arith.constant dense<0xFF800000> : vector<8x128xf32>
    %159 = vector.multi_reduction <maximumf>, %158, %cst_25 [1] : vector<8x8x128xf32> to vector<8x128xf32>
    %160 = vector.shape_cast %159 : vector<8x128xf32> to vector<8x1x128xf32>
    %161 = vector.broadcast %160 : vector<8x1x128xf32> to vector<8x8x128xf32>
    %162 = arith.subf %158, %161 : vector<8x8x128xf32>
    %163 = math.exp %162 : vector<8x8x128xf32>
    %cst_26 = arith.constant dense<0.000000e+00> : vector<8x128xf32>
    %164 = vector.multi_reduction <add>, %163, %cst_26 [1] : vector<8x8x128xf32> to vector<8x128xf32>
    %165 = vector.broadcast %32 : vector<1x8x128xf32> to vector<8x8x128xf32>
    %166 = arith.mulf %163, %165 : vector<8x8x128xf32>
    %cst_27 = arith.constant dense<0.000000e+00> : vector<8x128xf32>
    %167 = vector.multi_reduction <add>, %166, %cst_27 [1] : vector<8x8x128xf32> to vector<8x128xf32>
    %168 = arith.divf %167, %164 : vector<8x128xf32>
    %169 = vector.broadcast %142 : f32 to vector<8x128xf32>
    %170 = arith.mulf %169, %168 : vector<8x128xf32>
    %171 = vector.broadcast %143 : f32 to vector<8x128xf32>
    %172 = arith.addf %170, %171 : vector<8x128xf32>
    %c24 = arith.constant 24 : index
    %173 = memref.load %arg0[%c24] : memref<44xf32, #tpu.memory_space<smem>>
    %174 = vector.broadcast %173 : f32 to vector<8x128xf32>
    %175 = arith.mulf %67, %174 : vector<8x128xf32>
    %c25 = arith.constant 25 : index
    %176 = memref.load %arg0[%c25] : memref<44xf32, #tpu.memory_space<smem>>
    %177 = vector.broadcast %176 : f32 to vector<8x128xf32>
    %178 = arith.mulf %102, %177 : vector<8x128xf32>
    %179 = arith.addf %175, %178 : vector<8x128xf32>
    %c26 = arith.constant 26 : index
    %180 = memref.load %arg0[%c26] : memref<44xf32, #tpu.memory_space<smem>>
    %181 = vector.broadcast %180 : f32 to vector<8x128xf32>
    %182 = arith.mulf %137, %181 : vector<8x128xf32>
    %183 = arith.addf %179, %182 : vector<8x128xf32>
    %c27 = arith.constant 27 : index
    %184 = memref.load %arg0[%c27] : memref<44xf32, #tpu.memory_space<smem>>
    %185 = vector.broadcast %184 : f32 to vector<8x128xf32>
    %186 = arith.mulf %172, %185 : vector<8x128xf32>
    %187 = arith.addf %183, %186 : vector<8x128xf32>
    %c40 = arith.constant 40 : index
    %188 = memref.load %arg0[%c40] : memref<44xf32, #tpu.memory_space<smem>>
    %189 = vector.broadcast %188 : f32 to vector<8x128xf32>
    %190 = arith.addf %187, %189 : vector<8x128xf32>
    %c28 = arith.constant 28 : index
    %191 = memref.load %arg0[%c28] : memref<44xf32, #tpu.memory_space<smem>>
    %192 = vector.broadcast %191 : f32 to vector<8x128xf32>
    %193 = arith.mulf %67, %192 : vector<8x128xf32>
    %c29 = arith.constant 29 : index
    %194 = memref.load %arg0[%c29] : memref<44xf32, #tpu.memory_space<smem>>
    %195 = vector.broadcast %194 : f32 to vector<8x128xf32>
    %196 = arith.mulf %102, %195 : vector<8x128xf32>
    %197 = arith.addf %193, %196 : vector<8x128xf32>
    %c30 = arith.constant 30 : index
    %198 = memref.load %arg0[%c30] : memref<44xf32, #tpu.memory_space<smem>>
    %199 = vector.broadcast %198 : f32 to vector<8x128xf32>
    %200 = arith.mulf %137, %199 : vector<8x128xf32>
    %201 = arith.addf %197, %200 : vector<8x128xf32>
    %c31 = arith.constant 31 : index
    %202 = memref.load %arg0[%c31] : memref<44xf32, #tpu.memory_space<smem>>
    %203 = vector.broadcast %202 : f32 to vector<8x128xf32>
    %204 = arith.mulf %172, %203 : vector<8x128xf32>
    %205 = arith.addf %201, %204 : vector<8x128xf32>
    %c41 = arith.constant 41 : index
    %206 = memref.load %arg0[%c41] : memref<44xf32, #tpu.memory_space<smem>>
    %207 = vector.broadcast %206 : f32 to vector<8x128xf32>
    %208 = arith.addf %205, %207 : vector<8x128xf32>
    %c32 = arith.constant 32 : index
    %209 = memref.load %arg0[%c32] : memref<44xf32, #tpu.memory_space<smem>>
    %210 = vector.broadcast %209 : f32 to vector<8x128xf32>
    %211 = arith.mulf %67, %210 : vector<8x128xf32>
    %c33 = arith.constant 33 : index
    %212 = memref.load %arg0[%c33] : memref<44xf32, #tpu.memory_space<smem>>
    %213 = vector.broadcast %212 : f32 to vector<8x128xf32>
    %214 = arith.mulf %102, %213 : vector<8x128xf32>
    %215 = arith.addf %211, %214 : vector<8x128xf32>
    %c34 = arith.constant 34 : index
    %216 = memref.load %arg0[%c34] : memref<44xf32, #tpu.memory_space<smem>>
    %217 = vector.broadcast %216 : f32 to vector<8x128xf32>
    %218 = arith.mulf %137, %217 : vector<8x128xf32>
    %219 = arith.addf %215, %218 : vector<8x128xf32>
    %c35 = arith.constant 35 : index
    %220 = memref.load %arg0[%c35] : memref<44xf32, #tpu.memory_space<smem>>
    %221 = vector.broadcast %220 : f32 to vector<8x128xf32>
    %222 = arith.mulf %172, %221 : vector<8x128xf32>
    %223 = arith.addf %219, %222 : vector<8x128xf32>
    %c42 = arith.constant 42 : index
    %224 = memref.load %arg0[%c42] : memref<44xf32, #tpu.memory_space<smem>>
    %225 = vector.broadcast %224 : f32 to vector<8x128xf32>
    %226 = arith.addf %223, %225 : vector<8x128xf32>
    %c36 = arith.constant 36 : index
    %227 = memref.load %arg0[%c36] : memref<44xf32, #tpu.memory_space<smem>>
    %228 = vector.broadcast %227 : f32 to vector<8x128xf32>
    %229 = arith.mulf %67, %228 : vector<8x128xf32>
    %c37 = arith.constant 37 : index
    %230 = memref.load %arg0[%c37] : memref<44xf32, #tpu.memory_space<smem>>
    %231 = vector.broadcast %230 : f32 to vector<8x128xf32>
    %232 = arith.mulf %102, %231 : vector<8x128xf32>
    %233 = arith.addf %229, %232 : vector<8x128xf32>
    %c38 = arith.constant 38 : index
    %234 = memref.load %arg0[%c38] : memref<44xf32, #tpu.memory_space<smem>>
    %235 = vector.broadcast %234 : f32 to vector<8x128xf32>
    %236 = arith.mulf %137, %235 : vector<8x128xf32>
    %237 = arith.addf %233, %236 : vector<8x128xf32>
    %c39 = arith.constant 39 : index
    %238 = memref.load %arg0[%c39] : memref<44xf32, #tpu.memory_space<smem>>
    %239 = vector.broadcast %238 : f32 to vector<8x128xf32>
    %240 = arith.mulf %172, %239 : vector<8x128xf32>
    %241 = arith.addf %237, %240 : vector<8x128xf32>
    %c43 = arith.constant 43 : index
    %242 = memref.load %arg0[%c43] : memref<44xf32, #tpu.memory_space<smem>>
    %243 = vector.broadcast %242 : f32 to vector<8x128xf32>
    %244 = arith.addf %241, %243 : vector<8x128xf32>
    %245 = tpu.concatenate %190, %208, %226, %244 in 1 : vector<8x128xf32>, vector<8x128xf32>, vector<8x128xf32>, vector<8x128xf32> -> vector<8x512xf32>
    %cst_28 = arith.constant 0.000000e+00 : f32
    %246 = vector.broadcast %cst_28 : f32 to vector<8x512xf32>
    %247 = arith.maximumf %245, %246 : vector<8x512xf32>
    %cst_29 = arith.constant dense<0.000000e+00> : vector<512xf32>
    %248 = vector.multi_reduction <add>, %247, %cst_29 [0] : vector<8x512xf32> to vector<512xf32>
    %249 = vector.shape_cast %248 : vector<512xf32> to vector<1x512xf32>
    %cst_30 = arith.constant 8.000000e+00 : f32
    %250 = vector.broadcast %cst_30 : f32 to vector<1x512xf32>
    %251 = arith.divf %249, %250 : vector<1x512xf32>
    %252 = vector.broadcast %251 : vector<1x512xf32> to vector<8x512xf32>
    %253 = arith.subf %247, %252 : vector<8x512xf32>
    %254 = arith.mulf %253, %253 : vector<8x512xf32>
    %cst_31 = arith.constant dense<0.000000e+00> : vector<512xf32>
    %255 = vector.multi_reduction <add>, %254, %cst_31 [0] : vector<8x512xf32> to vector<512xf32>
    %256 = vector.shape_cast %255 : vector<512xf32> to vector<1x512xf32>
    %cst_32 = arith.constant 8.000000e+00 : f32
    %257 = vector.broadcast %cst_32 : f32 to vector<1x512xf32>
    %258 = arith.divf %256, %257 : vector<1x512xf32>
    %259 = vector.broadcast %251 : vector<1x512xf32> to vector<8x512xf32>
    %260 = arith.subf %247, %259 : vector<8x512xf32>
    %cst_33 = arith.constant 9.99999974E-6 : f32
    %261 = vector.broadcast %cst_33 : f32 to vector<1x512xf32>
    %262 = arith.addf %258, %261 : vector<1x512xf32>
    %263 = math.rsqrt %262 : vector<1x512xf32>
    %264 = vector.broadcast %263 : vector<1x512xf32> to vector<8x512xf32>
    %265 = arith.mulf %260, %264 : vector<8x512xf32>
    %c0_34 = arith.constant 0 : index
    %c0_35 = arith.constant 0 : index
    %266 = vector.load %arg6[%c0_34, %c0_35] : memref<1x512xf32, #tpu.memory_space<vmem>>, vector<1x512xf32>
    %267 = vector.broadcast %266 : vector<1x512xf32> to vector<8x512xf32>
    %268 = arith.mulf %265, %267 : vector<8x512xf32>
    %c0_36 = arith.constant 0 : index
    %c0_37 = arith.constant 0 : index
    %269 = vector.load %arg7[%c0_36, %c0_37] : memref<1x512xf32, #tpu.memory_space<vmem>>, vector<1x512xf32>
    %270 = vector.broadcast %269 : vector<1x512xf32> to vector<8x512xf32>
    %271 = arith.addf %268, %270 : vector<8x512xf32>
    %c0_38 = arith.constant 0 : index
    %c0_39 = arith.constant 0 : index
    %272 = vector.load %arg8[%c0_38, %c0_39] : memref<512x32xf32, #tpu.memory_space<vmem>>, vector<512x32xf32>
    %cst_40 = arith.constant dense<0.000000e+00> : vector<8x32xf32>
    %273 = tpu.matmul %271, %272, %cst_40 {dimension_numbers = #tpu.dot_dimension_numbers<[1], [0], [0], [1], [0, 0, 1, 1], [], []>} : vector<8x512xf32>, vector<512x32xf32>, vector<8x32xf32> -> vector<8x32xf32>
    %c0_41 = arith.constant 0 : index
    %c0_42 = arith.constant 0 : index
    %274 = vector.load %arg9[%c0_41, %c0_42] : memref<1x32xf32, #tpu.memory_space<vmem>>, vector<1x32xf32>
    %275 = vector.broadcast %274 : vector<1x32xf32> to vector<8x32xf32>
    %276 = arith.addf %273, %275 : vector<8x32xf32>
    %cst_43 = arith.constant 0.000000e+00 : f32
    %277 = vector.broadcast %cst_43 : f32 to vector<8x32xf32>
    %278 = arith.maximumf %276, %277 : vector<8x32xf32>
    %c0_44 = arith.constant 0 : index
    %c0_45 = arith.constant 0 : index
    %279 = vector.load %arg10[%c0_44, %c0_45] : memref<32x128xf32, #tpu.memory_space<vmem>>, vector<32x128xf32>
    %cst_46 = arith.constant dense<0.000000e+00> : vector<8x128xf32>
    %280 = tpu.matmul %278, %279, %cst_46 {dimension_numbers = #tpu.dot_dimension_numbers<[1], [0], [0], [1], [0, 0, 1, 1], [], []>} : vector<8x32xf32>, vector<32x128xf32>, vector<8x128xf32> -> vector<8x128xf32>
    %c0_47 = arith.constant 0 : index
    %c0_48 = arith.constant 0 : index
    %281 = vector.load %arg11[%c0_47, %c0_48] : memref<1x128xf32, #tpu.memory_space<vmem>>, vector<1x128xf32>
    %282 = vector.broadcast %281 : vector<1x128xf32> to vector<8x128xf32>
    %283 = arith.addf %280, %282 : vector<8x128xf32>
    %c0_49 = arith.constant 0 : index
    %c0_50 = arith.constant 0 : index
    %284 = vector.load %arg12[%c0_49, %c0_50] : memref<8x128xf32, #tpu.memory_space<vmem>>, vector<8x128xf32>
    tpu.vector_store %arg12[%c0_49, %c0_50], %283 {strides = array<i32>} : memref<8x128xf32, #tpu.memory_space<vmem>>, vector<8x128xf32>,
    return
  }
}

</mosaic_0001>

<bundles_post_ra>
// kernel: tpu_custom_call.1
= control target key start
LH: loop header
LB: loop body
LE: loop exit
PB: predicated region body
PF: predicated region fallthrough
CT: control target
= control target key end

     0   :  { %17 = vsyncpa [#allocation5], 0  ;;  %s5309_s0 = inlined_call_operand.vmem [shape: f32[44], index: 0, kind: input, shape index: {}]   ;;  %s5310_s1 = inlined_call_operand.vmem [shape: f32[8,768], index: 1, kind: input, shape index: {}]   ;;  %s5311_s2 = inlined_call_operand.vmem [shape: f32[1,768], index: 2, kind: input, shape index: {}]   ;;  %s5312_s3 = inlined_call_operand.vmem [shape: f32[1,768], index: 3, kind: input, shape index: {}]   ;;  %s5313_s4 = inlined_call_operand.hbm [shape: f32[768,128], index: 4, kind: input, shape index: {}]   ;;  %s5314_s5 = inlined_call_operand.vmem [shape: f32[1,128], index: 5, kind: input, shape index: {}]   ;;  %s5315_s6 = inlined_call_operand.vmem [shape: f32[1,512], index: 6, kind: input, shape index: {}]   ;;  %s5316_s7 = inlined_call_operand.vmem [shape: f32[1,512], index: 7, kind: input, shape index: {}]   ;;  %s5317_s8 = inlined_call_operand.vmem [shape: f32[512,32], index: 8, kind: input, shape index: {}]   ;;  %s5318_s9 = inlined_call_operand.vmem [shape: f32[1,32], index: 9, kind: input, shape index: {}]   ;;  %s5319_s10 = inlined_call_operand.vmem [shape: f32[32,128], index: 10, kind: input, shape index: {}]   ;;  %s5320_s11 = inlined_call_operand.vmem [shape: f32[1,128], index: 11, kind: input, shape index: {}]   ;;  %s5321_s12 = inlined_call_operand.hbm [shape: f32[8,128], index: 12, kind: output, shape index: {}]  }
   0x1   :  { %18 = vsyncpa [#allocation3], 0 }
   0x2   :  { %19 = vsyncpa [#allocation4], 0  ;;  %s26_s23 = sshll.u32 %s5309_s0, 4  ;;  %s27_s23 = int_to_ptr.vmem [resolvable:$true] %s26_s23 }
   0x3   :  { %s3634_s24 = scalar_lea.vmem %s27_s23, 16  ;;  %p3639_p1 = scmp.lt.s32.totalorder %s27_s23, %s27_s23 }
   0x4   :  { %p3635_p0 = scmp.ne.s32.totalorder %s27_s23, %s3634_s24  ;;  %p3640_p2 = scmp.lt.s32.totalorder %s3634_s24, %s3634_s24 }
   0x6   :  { %p3641_p3 = por %p3640_p2, %p3639_p1 }
   0x8   :  { %p3642_p4 = pnand %p3641_p3, %p3635_p0 }
   0xa   :  { %3645 = shalt.err (!%p3642_p4)
}
   0xb   :  { %s3696_s25 = smov [#allocation2]   ;;  %s3697_s26 = smov [#allocation6]  }
   0xc   :  { %29 = dma.vmem_to_smem %s27_s23, 16, %s3696_s25, [#allocation5]  }
   0xd   :  { %s41_s27 = sshll.u32 %s3697_s26, 4  ;;  %s3646_s30 = scalar_lea.hbm %s5313_s4, 12288  ;;  %s42_s27 = int_to_ptr.vmem [resolvable:$true] %s41_s27 }
   0xe   :  { %p3647_p5 = scmp.ne.s32.totalorder %s5313_s4, %s3646_s30  ;;  %p3650_p6 = scmp.lt.u32.totalorder %s3646_s30, %s5313_s4 }
  0x10   :  { %p3652_p7 = pnand %p3650_p6, %p3647_p5 }
  0x12   :  { %3655 = shalt.err (!%p3652_p7)
}
  0x13   :  { %s3656_s16 = scalar_lea.vmem %s42_s27, 12288  ;;  %p3661_p9 = scmp.lt.s32.totalorder %s42_s27, %s42_s27 }
  0x14   :  { %p3657_p8 = scmp.ne.s32.totalorder %s42_s27, %s3656_s16  ;;  %p3662_p10 = scmp.lt.s32.totalorder %s3656_s16, %s3656_s16 }
  0x16   :  { %p3663_p11 = por %p3662_p10, %p3661_p9 }
  0x18   :  { %p3664_p12 = pnand %p3663_p11, %p3657_p8 }
  0x1a   :  { %3667 = shalt.err (!%p3664_p12)
}
  0x1b   :  { %s3698_s17 = smov 128   ;;  %s3699_s18 = smov 8  }
  0x1c   :  { %47 = dma.hbm_to_vmem [thread:$0]  %s5313_s4, 12288, %s42_s27, [#allocation3], %s3698_s17, %s3698_s17, %s3699_s18  }
  0x1d   :  { %3690 = dma.done.wait [#allocation5], 16  }
  0x1e   :  { %3691 = vsyncadd [#allocation5], 4294967280 }
  0x1f   :  { %3692 = dma.done.wait [#allocation3], 12288  }
  0x20   :  { %3693 = vsyncadd [#allocation3], 4294955008 }
  0x21   :  { %68 = sfence }
  0x22   :  { %v282_v0 = vld [vmem:[#allocation6 + $0x80] sm:$0xff]  ;;  %v283_v1 = vld [vmem:[#allocation6 + $0x88] sm:$0xff]  ;;  %v284_v9 = vld [vmem:[#allocation6 + $0x90] sm:$0xff]  ;;  %s3074_s28 = sld [smem:[#allocation2 + $0x1]]  ;;  %s4079_s29 = sld [smem:[#allocation2 + $0x2]]  ;;  %vm2564_vm0 = vcmask 1041409  }
  0x23   :  { %v266_v2 = vld [vmem:[#allocation6] sm:$0xff]  ;;  %v3311_v3 = vpack.c.bf16 %v283_v1, %v282_v0  ;;  %v267_v4 = vld [vmem:[#allocation6 + $0x8] sm:$0xff]  ;;  %v285_v10 = vld [vmem:[#allocation6 + $0x98] sm:$0xff]  ;;  %s4081_s30 = sld [smem:[#allocation2 + $0x3]]  ;;  %s3079_s13 = sld [smem:[#allocation2 + $0x6]]  ;;  %vm2566_vm1 = vcmask 1042434  }
  0x24   :  { %v314_v5 = vld [vmem:[#allocation6 + $0x180] sm:$0xff]  ;;  %v315_v6 = vld [vmem:[#allocation6 + $0x188] sm:$0xff]  ;;  %v3313_v7 = vpack.c.bf16 %v267_v4, %v266_v2  ;;  %v3315_v12 = vpack.c.bf16 %v285_v10, %v284_v9  ;;  %v268_v14 = vld [vmem:[#allocation6 + $0x10] sm:$0xff]  ;;  %s3081_s14 = sld [smem:[#allocation2 + $0x8]]  ;;  %s3082_s0 = sld [smem:[#allocation2 + $0x9]]  ;;  %vm2568_vm2 = vcmask 1043459  }
  0x25   :  { %v3343_v8 = vpack.c.bf16 %v315_v6, %v314_v5  ;;  %v298_v11 = vld [vmem:[#allocation6 + $0x100] sm:$0xff]  ;;  %3312 = vmatprep.subr.bf16.mxu0 %v3311_v3  ;;  %v299_v13 = vld [vmem:[#allocation6 + $0x108] sm:$0xff]  ;;  %v269_v15 = vld [vmem:[#allocation6 + $0x18] sm:$0xff]  ;;  %s3087_s15 = sld [smem:[#allocation2 + $0xe]]  ;;  %s4210_s16 = sld [smem:[#allocation2 + $0x4]]  ;;  %vm2570_vm3 = vcmask 1044484  }
  0x26   :  { %3314 = vmatpush3.bf16.msra.mxu0 %v3313_v7  ;;  %v3345_v16 = vpack.c.bf16 %v299_v13, %v298_v11  ;;  %v3317_v17 = vpack.c.bf16 %v269_v15, %v268_v14  ;;  %v316_v18 = vld [vmem:[#allocation6 + $0x190] sm:$0xff]  ;;  %v317_v19 = vld [vmem:[#allocation6 + $0x198] sm:$0xff]  ;;  %v286_v20 = vld [vmem:[#allocation6 + $0xa0] sm:$0xff]  ;;  %s4217_s17 = sld [smem:[#allocation2 + $0x5]]  ;;  %s4354_s18 = sld [smem:[#allocation2 + $0xa]]  ;;  %vm2572_vm4 = vcmask 1045509  }
  0x27   :  { %3344 = vmatprep.subr.bf16.mxu1 %v3343_v8  ;;  %3316 = vmatprep.subr.bf16.mxu0 %v3315_v12  ;;  %v3347_v21 = vpack.c.bf16 %v317_v19, %v316_v18  ;;  %v287_v22 = vld [vmem:[#allocation6 + $0xa8] sm:$0xff]  ;;  %v300_v23 = vld [vmem:[#allocation6 + $0x110] sm:$0xff]  ;;  %v301_v24 = vld [vmem:[#allocation6 + $0x118] sm:$0xff]  ;;  %s4356_s19 = sld [smem:[#allocation2 + $0xb]]  ;;  %s4494_s20 = sld [smem:[#allocation2 + $0x10]]  ;;  %vm2574_vm5 = vcmask 1046534  }
  0x28   :  { %3346 = vmatpush3.bf16.msra.mxu1 %v3345_v16  ;;  %v3319_v25 = vpack.c.bf16 %v287_v22, %v286_v20  ;;  %v3349_v26 = vpack.c.bf16 %v301_v24, %v300_v23  ;;  %v270_v27 = vld [vmem:[#allocation6 + $0x20] sm:$0xff]  ;;  %v271_v28 = vld [vmem:[#allocation6 + $0x28] sm:$0xff]  ;;  %v288_v31 = vld [vmem:[#allocation6 + $0xb0] sm:$0xff]  ;;  %s4497_s4 = sld [smem:[#allocation2 + $0x11]]  ;;  %s4583_s21 = sld [smem:[#allocation2 + $0x12]]  ;;  %vm2576_vm6 = vcmask 1047559  }
  0x29   :  { %v318_v29 = vld [vmem:[#allocation6 + $0x1a0] sm:$0xff]  ;;  %3348 = vmatprep.subr.bf16.mxu1 %v3347_v21  ;;  %v319_v30 = vld [vmem:[#allocation6 + $0x1a8] sm:$0xff]  ;;  %v289_v32 = vld [vmem:[#allocation6 + $0xb8] sm:$0xff]  ;;  %v3321_v33 = vpack.c.bf16 %v271_v28, %v270_v27  ;;  %s4585_s22 = sld [smem:[#allocation2 + $0x13]]  ;;  %s4587_s23 = sld [smem:[#allocation2 + $0x14]]  ;;  %vm3702_vm7 = vmmov 0  }
  0x2a   :  { %3318 = vmatpush3.bf16.msra.mxu0 %v3317_v17  ;;  %v3351_v34 = vpack.c.bf16 %v319_v30, %v318_v29  ;;  %v302_v35 = vld [vmem:[#allocation6 + $0x120] sm:$0xff]  ;;  %v303_v36 = vld [vmem:[#allocation6 + $0x128] sm:$0xff]  ;;  %v272_v37 = vld [vmem:[#allocation6 + $0x30] sm:$0xff]  ;;  %v3323_v38 = vpack.c.bf16 %v289_v32, %v288_v31  ;;  %s4591_s24 = sld [smem:[#allocation2 + $0x15]]  ;;  %s4601_s25 = sld [smem:[#allocation2 + $0x16]]  ;;  %vm2982_vm8 = vcmask 261120  }
  0x2b   :  { %3320 = vmatprep.subr.bf16.mxu0 %v3319_v25  ;;  %v273_v39 = vld [vmem:[#allocation6 + $0x38] sm:$0xff]  ;;  %v320_v40 = vld [vmem:[#allocation6 + $0x1b0] sm:$0xff]  ;;  %v3353_v42 = vpack.c.bf16 %v303_v36, %v302_v35  ;;  %v290_v43 = vld [vmem:[#allocation6 + $0xc0] sm:$0xff]  ;;  %s4606_s26 = sld [smem:[#allocation2 + $0x1c]]  ;;  %s4612_s27 = sld [smem:[#allocation2 + $0x17]] }
  0x2c   :  { %v321_v41 = vld [vmem:[#allocation6 + $0x1b8] sm:$0xff]  ;;  %3350 = vmatpush3.bf16.msra.mxu1 %v3349_v26  ;;  %v291_v44 = vld [vmem:[#allocation6 + $0xc8] sm:$0xff]  ;;  %v304_v46 = vld [vmem:[#allocation6 + $0x130] sm:$0xff]  ;;  %v3325_v48 = vpack.c.bf16 %v273_v39, %v272_v37 }
  0x2d   :  { %3352 = vmatprep.subr.bf16.mxu1 %v3351_v34  ;;  %v3355_v45 = vpack.c.bf16 %v321_v41, %v320_v40  ;;  %v305_v47 = vld [vmem:[#allocation6 + $0x138] sm:$0xff]  ;;  %v322_v49 = vld [vmem:[#allocation6 + $0x1c0] sm:$0xff]  ;;  %v323_v50 = vld [vmem:[#allocation6 + $0x1c8] sm:$0xff]  ;;  %v3327_v51 = vpack.c.bf16 %v291_v44, %v290_v43 }
  0x2e   :  { %3322 = vmatpush3.bf16.msra.mxu0 %v3321_v33  ;;  %v274_v52 = vld [vmem:[#allocation6 + $0x40] sm:$0xff]  ;;  %v275_v53 = vld [vmem:[#allocation6 + $0x48] sm:$0xff]  ;;  %v3357_v54 = vpack.c.bf16 %v305_v47, %v304_v46  ;;  %v292_v55 = vld [vmem:[#allocation6 + $0xd0] sm:$0xff]  ;;  %v3359_v57 = vpack.c.bf16 %v323_v50, %v322_v49 }
  0x2f   :  { %3324 = vmatprep.subr.bf16.mxu0 %v3323_v38  ;;  %v293_v56 = vld [vmem:[#allocation6 + $0xd8] sm:$0xff]  ;;  %v306_v58 = vld [vmem:[#allocation6 + $0x140] sm:$0xff]  ;;  %v307_v59 = vld [vmem:[#allocation6 + $0x148] sm:$0xff]  ;;  %v3329_v60 = vpack.c.bf16 %v275_v53, %v274_v52 }
  0x30   :  { %3354 = vmatpush3.bf16.msra.mxu1 %v3353_v42  ;;  %v324_v61 = vld [vmem:[#allocation6 + $0x1d0] sm:$0xff]  ;;  %v325_v62 = vld [vmem:[#allocation6 + $0x1d8] sm:$0xff]  ;;  %v3331_v63 = vpack.c.bf16 %v293_v56, %v292_v55  ;;  %v3361_v2 = vpack.c.bf16 %v307_v59, %v306_v58  ;;  %v294_v3 = vld [vmem:[#allocation6 + $0xe0] sm:$0xff] }
  0x31   :  { %3356 = vmatprep.subr.bf16.mxu1 %v3355_v45  ;;  %v276_v0 = vld [vmem:[#allocation6 + $0x50] sm:$0xff]  ;;  %v277_v1 = vld [vmem:[#allocation6 + $0x58] sm:$0xff]  ;;  %v295_v4 = vld [vmem:[#allocation6 + $0xe8] sm:$0xff]  ;;  %v3363_v5 = vpack.c.bf16 %v325_v62, %v324_v61 }
  0x32   :  { %3326 = vmatpush3.bf16.msra.mxu0 %v3325_v48  ;;  %v308_v6 = vld [vmem:[#allocation6 + $0x150] sm:$0xff]  ;;  %v309_v7 = vld [vmem:[#allocation6 + $0x158] sm:$0xff]  ;;  %v3333_v8 = vpack.c.bf16 %v277_v1, %v276_v0  ;;  %v326_v9 = vld [vmem:[#allocation6 + $0x1e0] sm:$0xff]  ;;  %v3335_v12 = vpack.c.bf16 %v295_v4, %v294_v3 }
  0x33   :  { %3328 = vmatprep.subr.bf16.mxu0 %v3327_v51  ;;  %v327_v10 = vld [vmem:[#allocation6 + $0x1e8] sm:$0xff]  ;;  %v278_v13 = vld [vmem:[#allocation6 + $0x60] sm:$0xff]  ;;  %v3365_v16 = vpack.c.bf16 %v309_v7, %v308_v6  ;;  %v296_v17 = vld [vmem:[#allocation6 + $0xf0] sm:$0xff] }
  0x34   :  { %3358 = vmatpush3.bf16.msra.mxu1 %v3357_v54  ;;  %v3788_v11 = vld [vmem:[%s5310_s1 + $0x8] sm:$0xff]  ;;  %v297_v18 = vld [vmem:[#allocation6 + $0xf8] sm:$0xff]  ;;  %v310_v19 = vld [vmem:[#allocation6 + $0x160] sm:$0xff]  ;;  %v3367_v20 = vpack.c.bf16 %v327_v10, %v326_v9 }
  0x35   :  { %3360 = vmatprep.subr.bf16.mxu1 %v3359_v57  ;;  %v279_v14 = vld [vmem:[#allocation6 + $0x68] sm:$0xff]  ;;  %v81_v15 = vrot.slane %v3788_v11, 4  ;;  %v328_v22 = vld [vmem:[#allocation6 + $0x1f0] sm:$0xff]  ;;  %v69_v24 = vld [vmem:[%s5310_s1] sm:$0xff]  ;;  %v3339_v30 = vpack.c.bf16 %v297_v18, %v296_v17 }
  0x36   :  { %3330 = vmatpush3.bf16.msra.mxu0 %v3329_v60  ;;  %v311_v21 = vld [vmem:[#allocation6 + $0x168] sm:$0xff]  ;;  %v3337_v25 = vpack.c.bf16 %v279_v14, %v278_v13  ;;  %v329_v26 = vld [vmem:[#allocation6 + $0x1f8] sm:$0xff]  ;;  %v75_v27 = vrot.slane %v69_v24, 4  ;;  %v71_v29 = vld [vmem:[%s5310_s1 + $0x10] sm:$0xff] }
  0x37   :  { %3332 = vmatprep.subr.bf16.mxu0 %v3331_v63  ;;  %v82_v23 = vadd.f32 %v81_v15, %v3788_v11  ;;  %v72_v28 = vld [vmem:[%s5310_s1 + $0x18] sm:$0xff]  ;;  %v280_v31 = vld [vmem:[#allocation6 + $0x70] sm:$0xff]  ;;  %v87_v35 = vrot.slane %v71_v29, 4  ;;  %v3369_v36 = vpack.c.bf16 %v311_v21, %v310_v19  ;;  %v346_v37 = vld [vmem:[#allocation6 + $0x280] sm:$0xff]  ;;  %v3371_v40 = vpack.c.bf16 %v329_v26, %v328_v22 }
  0x38   :  { %3362 = vmatpush3.bf16.msra.mxu1 %v3361_v2  ;;  %v281_v32 = vld [vmem:[#allocation6 + $0x78] sm:$0xff]  ;;  %v93_v34 = vrot.slane %v72_v28, 4  ;;  %v347_v38 = vld [vmem:[#allocation6 + $0x288] sm:$0xff]  ;;  %v76_v39 = vadd.f32 %v75_v27, %v69_v24  ;;  %v312_v42 = vld [vmem:[#allocation6 + $0x170] sm:$0xff] }
  0x39   :  { %3364 = vmatprep.subr.bf16.mxu1 %v3363_v5  ;;  %v83_v33 = vrot.slane %v82_v23, 2  ;;  %v313_v43 = vld [vmem:[#allocation6 + $0x178] sm:$0xff]  ;;  %v88_v45 = vadd.f32 %v87_v35, %v71_v29  ;;  %v3341_v46 = vpack.c.bf16 %v281_v32, %v280_v31  ;;  %v3375_v49 = vpack.c.bf16 %v347_v38, %v346_v37  ;;  %v74_v62 = vld [vmem:[%s5310_s1 + $0x28] sm:$0xff]  ;;  %v73_v63 = vld [vmem:[%s5310_s1 + $0x20] sm:$0xff]  ;;  %s3080_s1 = sld [smem:[#allocation2 + $0x7]] }
  0x3a   :  { %3334 = vmatpush3.bf16.msra.mxu0 %v3333_v8  ;;  %v94_v44 = vadd.f32 %v93_v34, %v72_v28  ;;  %v77_v47 = vrot.slane %v76_v39, 2  ;;  %v3373_v52 = vpack.c.bf16 %v313_v43, %v312_v42  ;;  %v105_v3 = vrot.slane %v74_v62, 4 }
  0x3b   :  { %3336 = vmatprep.subr.bf16.mxu0 %v3335_v12  ;;  %v84_v41 = vadd.f32 %v83_v33, %v82_v23  ;;  %v89_v51 = vrot.slane %v88_v45, 2  ;;  %v99_v5 = vrot.slane %v73_v63, 4 }
  0x3c   :  { %3366 = vmatpush3.bf16.msra.mxu1 %v3365_v16  ;;  %v95_v50 = vrot.slane %v94_v44, 2  ;;  %v78_v53 = vadd.f32 %v77_v47, %v76_v39  ;;  %v106_v9 = vadd.f32 %v105_v3, %v74_v62 }
  0x3d   :  { %3368 = vmatprep.subr.bf16.mxu1 %v3367_v20  ;;  %v85_v48 = vrot.slane %v84_v41, 1  ;;  %v90_v56 = vadd.f32 %v89_v51, %v88_v45  ;;  %v100_v12 = vadd.f32 %v99_v5, %v73_v63 }
  0x3e   :  { %3338 = vmatpush3.bf16.msra.mxu0 %v3337_v25  ;;  %v96_v55 = vadd.f32 %v95_v50, %v94_v44  ;;  %v79_v57 = vrot.slane %v78_v53, 1 }
  0x3f   :  { %3340 = vmatprep.subr.bf16.mxu0 %v3339_v30  ;;  %v86_v54 = vadd.f32 %v85_v48, %v84_v41  ;;  %v91_v60 = vrot.slane %v90_v56, 1  ;;  %v101_v17 = vrot.slane %v100_v12, 2 }
  0x40   :  { %3370 = vmatpush3.bf16.msra.mxu1 %v3369_v36  ;;  %v97_v59 = vrot.slane %v96_v55, 1  ;;  %v80_v61 = vadd.f32 %v79_v57, %v78_v53 }
  0x41   :  { %3372 = vmatprep.subr.bf16.mxu1 %v3371_v40  ;;  %v113_v58 = vmul.f32 0.125, %v86_v54  ;;  %v92_v2 = vadd.f32 %v91_v60, %v90_v56  ;;  %v102_v23 = vadd.f32 %v101_v17, %v100_v12  ;;  %v3840_v12 = vld [vmem:[%s5311_s2] sm:$0x3f]  ;;  %s4203_s2 = sld [smem:[#allocation2 + $0xd]] }
  0x42   :  { %3342 = vmatpush3.bf16.msra.mxu0 %v3341_v46  ;;  %v98_v1 = vadd.f32 %v97_v59, %v96_v55  ;;  %v112_v4 = vmul.f32 0.125, %v80_v61  ;;  %v3848_v17 = vld [vmem:[%s5312_s3] sm:$0x3f]  ;;  %s4208_s3 = sld [smem:[#allocation2 + $0xf]] }
  0x43   :  { %3376 = vmatprep.subr.bf16.mxu0 %v3375_v49  ;;  %v3808_v0 = vsub.f32 %v3788_v11, %v113_v58  ;;  %v114_v8 = vmul.f32 0.125, %v92_v2  ;;  %v107_v11 = vrot.slane %v106_v9, 2 }
  0x44   :  { %3374 = vmatpush3.bf16.msra.mxu1 %v3373_v52  ;;  %v115_v7 = vmul.f32 0.125, %v98_v1  ;;  %v3812_v10 = vsub.f32 %v69_v24, %v112_v4  ;;  %v192_v52 = vlaneseq }
  0x45   :  { %v125_v6 = vmul.f32 %v3808_v0, %v3808_v0  ;;  %v3816_v15 = vsub.f32 %v71_v29, %v114_v8  ;;  %v108_v21 = vadd.f32 %v107_v11, %v106_v9  ;;  %v103_v29 = vrot.slane %v102_v23, 1 }
  0x46   :  { %v3814_v14 = vsub.f32 %v72_v28, %v115_v7  ;;  %v124_v16 = vmul.f32 %v3812_v10, %v3812_v10  ;;  %v3832_v1 = vshrl.u32 %v192_v52, 7 }
  0x47   :  { %v136_v13 = vrot.slane %v125_v6, 4  ;;  %v126_v20 = vmul.f32 %v3816_v15, %v3816_v15  ;;  %v109_v27 = vrot.slane %v108_v21, 1  ;;  %v104_v35 = vadd.f32 %v103_v29, %v102_v23 }
  0x48   :  { %v127_v19 = vmul.f32 %v3814_v14, %v3814_v14  ;;  %v130_v22 = vrot.slane %v124_v16, 4  ;;  %v3835_v9 = vsub.s32 1, %v3832_v1 }
  0x49   :  { %v137_v18 = vadd.f32 %v136_v13, %v125_v6  ;;  %v142_v26 = vrot.slane %v126_v20, 4  ;;  %v110_v33 = vadd.f32 %v109_v27, %v108_v21  ;;  %v116_v41 = vmul.f32 0.125, %v104_v35  ;;  %v331_v35 = vld [vmem:[#allocation6 + $0x208] sm:$0xff] }
  0x4a   :  { %v148_v25 = vrot.slane %v127_v19, 4  ;;  %v131_v28 = vadd.f32 %v130_v22, %v124_v16  ;;  %5374 = vst [vmem:[#allocation11_spill] sm:$0xff] %v3835_v9  ;;  %v3843_v16 = vsub.s32 0, %v3832_v1  ;;  %v3856_v22 = vsub.s32 2, %v3832_v1 }
  0x4b   :  { %v138_v24 = vrot.slane %v137_v18, 2  ;;  %v143_v32 = vadd.f32 %v142_v26, %v126_v20  ;;  %v117_v39 = vmul.f32 0.125, %v110_v33  ;;  %v3826_v47 = vsub.f32 %v73_v63, %v116_v41  ;;  %v348_v41 = vld [vmem:[#allocation6 + $0x290] sm:$0xff] }
  0x4c   :  { %v149_v31 = vadd.f32 %v148_v25, %v127_v19  ;;  %v132_v34 = vrot.slane %v131_v28, 2  ;;  %5375 = vst [vmem:[#allocation12_spill] sm:$0xff] %v3843_v16  ;;  %v199_v19 = vrot.slane %v3840_v12, %v3835_v9  ;;  %v3853_v20 = vsub.s32 3, %v3832_v1  ;;  %5377 = vst [vmem:[#allocation14_spill] sm:$0xff] %v3856_v22 }
  0x4d   :  { %v139_v30 = vadd.f32 %v138_v24, %v137_v18  ;;  %v144_v38 = vrot.slane %v143_v32, 2  ;;  %v3824_v45 = vsub.f32 %v74_v62, %v117_v39  ;;  %v128_v54 = vmul.f32 %v3826_v47, %v3826_v47 }
  0x4e   :  { %v150_v37 = vrot.slane %v149_v31, 2  ;;  %v133_v40 = vadd.f32 %v132_v34, %v131_v28  ;;  %5376 = vst [vmem:[#allocation13_spill] sm:$0xff] %v3853_v20  ;;  %v237_v25 = vrot.slane %v3848_v17, %v3835_v9  ;;  %v195_v27 = vrot.slane %v3840_v12, %v3843_v16 }
  0x4f   :  { %v140_v36 = vrot.slane %v139_v30, 1  ;;  %v145_v44 = vadd.f32 %v144_v38, %v143_v32  ;;  %v129_v51 = vmul.f32 %v3824_v45, %v3824_v45  ;;  %v154_v60 = vrot.slane %v128_v54, 4 }
  0x50   :  { %v151_v43 = vadd.f32 %v150_v37, %v149_v31  ;;  %v134_v46 = vrot.slane %v133_v40, 1  ;;  %v207_v31 = vrot.slane %v3840_v12, %v3853_v20  ;;  %v233_v34 = vrot.slane %v3848_v17, %v3843_v16 }
  0x51   :  { %v141_v42 = vadd.f32 %v140_v36, %v139_v30  ;;  %v146_v50 = vrot.slane %v145_v44, 1  ;;  %v160_v58 = vrot.slane %v129_v51, 4  ;;  %v155_v3 = vadd.f32 %v154_v60, %v128_v54 }
  0x52   :  { %v152_v49 = vrot.slane %v151_v43, 1  ;;  %v135_v53 = vadd.f32 %v134_v46, %v133_v40  ;;  %v203_v36 = vrot.slane %v3840_v12, %v3856_v22  ;;  %v245_v40 = vrot.slane %v3848_v17, %v3853_v20 }
  0x53   :  { %v167_v48 = vmul.f32 0.125, %v141_v42  ;;  %v147_v57 = vadd.f32 %v146_v50, %v145_v44  ;;  %v161_v63 = vadd.f32 %v160_v58, %v129_v51  ;;  %v156_v7 = vrot.slane %v155_v3, 2  ;;  %v349_v42 = vld [vmem:[#allocation6 + $0x298] sm:$0xff] }
  0x54   :  { %v153_v56 = vadd.f32 %v152_v49, %v151_v43  ;;  %v166_v59 = vmul.f32 0.125, %v135_v53  ;;  %v241_v46 = vrot.slane %v3848_v17, %v3856_v22  ;;  %v3379_v52 = vpack.c.bf16 %v349_v42, %v348_v41  ;;  %v332_v53 = vld [vmem:[#allocation6 + $0x210] sm:$0xff]  ;;  %v361_v42 = vld [vmem:[#allocation6 + $0x2f8] sm:$0xff] }
  0x55   :  { %v173_v55 = vadd.f32 1e-05, %v167_v48  ;;  %v168_v62 = vmul.f32 0.125, %v147_v57  ;;  %v162_v6 = vrot.slane %v161_v63, 2  ;;  %v157_v11 = vadd.f32 %v156_v7, %v155_v3  ;;  %v360_v41 = vld [vmem:[#allocation6 + $0x2f0] sm:$0xff] }
  0x56   :  { %v169_v61 = vmul.f32 0.125, %v153_v56  ;;  %v172_v2 = vadd.f32 1e-05, %v166_v59  ;;  %v351_v56 = vld [vmem:[#allocation6 + $0x2a8] sm:$0xff]  ;;  %v214_v57 = vsub.s32 5, %v3832_v1 }
  0x57   :  { %3486 = vrsqrt.f32 %v173_v55  ;;  %v174_v5 = vadd.f32 1e-05, %v168_v62  ;;  %v163_v8 = vadd.f32 %v162_v6, %v161_v63  ;;  %v158_v26 = vrot.slane %v157_v11, 1  ;;  %v350_v55 = vld [vmem:[#allocation6 + $0x2a0] sm:$0xff]  ;;  %v335_v62 = vld [vmem:[#allocation6 + $0x228] sm:$0xff]  ;;  %v352_v63 = vld [vmem:[#allocation6 + $0x2b0] sm:$0xff] }
  0x58   :  { %v175_v4 = vadd.f32 1e-05, %v169_v61  ;;  %3488 = vrsqrt.f32 %v172_v2  ;;  %v3383_v60 = vpack.c.bf16 %v351_v56, %v350_v55  ;;  %v334_v61 = vld [vmem:[#allocation6 + $0x220] sm:$0xff]  ;;  %v353_v2 = vld [vmem:[#allocation6 + $0x2b8] sm:$0xff]  ;;  %v215_v3 = vrot.slane %v3840_v12, %v214_v57  ;;  %v2760_v56 = vld [vmem:[%s5317_s8 + $0x8] sm:$0xff] }
  0x59   :  { %v164_v13 = vrot.slane %v163_v8, 1  ;;  %v159_v43 = vadd.f32 %v158_v26, %v157_v11  ;;  %v3385_v6 = vpack.c.bf16 %v335_v62, %v334_v61  ;;  %v336_v11 = vld [vmem:[#allocation6 + $0x230] sm:$0xff]  ;;  %v2759_v55 = vld [vmem:[%s5317_s8] sm:$0xff]  ;;  %v2778_v62 = vld [vmem:[%s5317_s8 + $0x98] sm:$0xff] }
  0x5a   :  { %3490 = vrsqrt.f32 %v175_v4 }
  0x5b   :  { %3492 = vrsqrt.f32 %v174_v5  ;;  %v165_v18 = vadd.f32 %v164_v13, %v163_v8  ;;  %v170_v58 = vmul.f32 0.125, %v159_v43  ;;  %v253_v8 = vrot.slane %v3848_v17, %v214_v57 }
  0x5c   :  { %v3387_v13 = vpack.c.bf16 %v353_v2, %v352_v63  ;;  %v2809_v63 = vld [vmem:[%s5317_s8 + $0x190] sm:$0xff]  ;;  %v2810_v2 = vld [vmem:[%s5317_s8 + $0x198] sm:$0xff] }
  0x5d   :  { %v171_v23 = vmul.f32 0.125, %v165_v18  ;;  %v176_v4 = vadd.f32 1e-05, %v170_v58  ;;  %v337_v18 = vld [vmem:[#allocation6 + $0x238] sm:$0xff]  ;;  %v3409_v58 = vpack.c.bf16 %v2760_v56, %v2759_v55  ;;  %v2769_v56 = vld [vmem:[%s5317_s8 + $0x50] sm:$0xff] }
  0x5f   :  { %v177_v28 = vadd.f32 1e-05, %v171_v23 }
  0x61   :  { %v3487_v21 = vpop.eup %3486  ;;  %3494 = vrsqrt.f32 %v177_v28  ;;  %v339_v28 = vld [vmem:[#allocation6 + $0x248] sm:$0xff] }
  0x62   :  { %v185_v24 = vmul.f32 %v3487_v21, %v3808_v0  ;;  %v3489_v29 = vpop.eup %3488  ;;  %v330_v0 = vld [vmem:[#allocation6 + $0x200] sm:$0xff]  ;;  %v355_v21 = vld [vmem:[#allocation6 + $0x2c8] sm:$0xff]  ;;  %3496 = vrsqrt.f32 %v176_v4  ;;  %v3443_v4 = vpack.c.bf16 %v2810_v2, %v2809_v63 }
  0x63   :  { %v184_v33 = vmul.f32 %v3489_v29, %v3812_v10  ;;  %v3377_v48 = vpack.c.bf16 %v331_v35, %v330_v0  ;;  %v356_v29 = vld [vmem:[#allocation6 + $0x2d0] sm:$0xff]  ;;  %v359_v0 = vld [vmem:[#allocation6 + $0x2e8] sm:$0xff]  ;;  %v210_v35 = vsub.s32 4, %v3832_v1 }
  0x64   :  { %v223_v30 = vmul.f32 %v199_v19, %v185_v24  ;;  %v3491_v32 = vpop.eup %3490  ;;  %v354_v19 = vld [vmem:[#allocation6 + $0x2c0] sm:$0xff]  ;;  %v3389_v24 = vpack.c.bf16 %v337_v18, %v336_v11  ;;  %v2780_v18 = vld [vmem:[%s5317_s8 + $0xa8] sm:$0xff] }
  0x65   :  { %v3493_v37 = vpop.eup %3492  ;;  %v187_v39 = vmul.f32 %v3491_v32, %v3814_v14  ;;  %v222_v10 = vmul.f32 %v195_v27, %v184_v33  ;;  %v333_v14 = vld [vmem:[#allocation6 + $0x218] sm:$0xff]  ;;  %v3391_v26 = vpack.c.bf16 %v355_v21, %v354_v19  ;;  %v338_v27 = vld [vmem:[#allocation6 + $0x240] sm:$0xff]  ;;  %v340_v32 = vld [vmem:[#allocation6 + $0x250] sm:$0xff] }
  0x66   :  { %v261_v38 = vadd.f32 %v237_v25, %v223_v30  ;;  %v186_v44 = vmul.f32 %v3493_v37, %v3816_v15  ;;  %v3381_v15 = vpack.c.bf16 %v333_v14, %v332_v53  ;;  %v357_v30 = vld [vmem:[#allocation6 + $0x2d8] sm:$0xff]  ;;  %v2807_v14 = vld [vmem:[%s5317_s8 + $0x180] sm:$0xff]  ;;  %v2820_v63 = vld [vmem:[%s5317_s8 + $0x1e8] sm:$0xff] }
  0x67   :  { %v225_v49 = vmul.f32 %v207_v31, %v187_v39  ;;  %v260_v50 = vadd.f32 %v233_v34, %v222_v10  ;;  %v3395_v31 = vpack.c.bf16 %v357_v30, %v356_v29  ;;  %v341_v33 = vld [vmem:[#allocation6 + $0x258] sm:$0xff]  ;;  %v358_v34 = vld [vmem:[#allocation6 + $0x2e0] sm:$0xff]  ;;  %v211_v10 = vrot.slane %v3840_v12, %v210_v35  ;;  %v2776_v12 = vld [vmem:[%s5317_s8 + $0x88] sm:$0xff] }
  0x68   :  { %433 = vmatprep.mubr.f32.mxu0 %v261_v38  ;;  %v224_v51 = vmul.f32 %v203_v36, %v186_v44  ;;  %v3397_v37 = vpack.c.bf16 %v341_v33, %v340_v32  ;;  %v3399_v38 = vpack.c.bf16 %v359_v0, %v358_v34  ;;  %v342_v39 = vld [vmem:[#allocation6 + $0x260] sm:$0xff]  ;;  %v2796_v29 = vld [vmem:[%s5317_s8 + $0x128] sm:$0xff]  ;;  %v2813_v32 = vld [vmem:[%s5317_s8 + $0x1b0] sm:$0xff] }
  0x69   :  { %v263_v54 = vadd.f32 %v245_v40, %v225_v49  ;;  %434 = vmatmul.mubr.f32.vlgmr.msra.gmra.mrb[0].mxu0 %v260_v50  ;;  %v343_v40 = vld [vmem:[#allocation6 + $0x268] sm:$0xff]  ;;  %v345_v49 = vld [vmem:[#allocation6 + $0x278] sm:$0xff]  ;;  %v2779_v11 = vld [vmem:[%s5317_s8 + $0xa0] sm:$0xff] }
  0x6a   :  { %v262_v59 = vadd.f32 %v241_v46, %v224_v51  ;;  %3378 = vmatpush3.bf16.msra.mxu0 %v3377_v48  ;;  %v3401_v44 = vpack.c.bf16 %v343_v40, %v342_v39  ;;  %v3403_v46 = vpack.c.bf16 %v361_v42, %v360_v41  ;;  %v344_v48 = vld [vmem:[#allocation6 + $0x270] sm:$0xff]  ;;  %v249_v51 = vrot.slane %v3848_v17, %v210_v35  ;;  %v2808_v17 = vld [vmem:[%s5317_s8 + $0x188] sm:$0xff]  ;;  %v2814_v0 = vld [vmem:[%s5317_s8 + $0x1b8] sm:$0xff] }
  0x6b   :  { %503 = vmatprep.mubr.f32.mxu1 %v263_v54  ;;  %3380 = vmatprep.subr.bf16.mxu0 %v3379_v52  ;;  %v3495_v5 = vpop.eup %3494  ;;  %v3405_v52 = vpack.c.bf16 %v345_v49, %v344_v48  ;;  %v3439_v57 = vpack.c.bf16 %v2808_v17, %v2807_v14  ;;  %v3415_v21 = vpack.c.bf16 %v2780_v18, %v2779_v11  ;;  %v2765_v35 = vld [vmem:[%s5317_s8 + $0x30] sm:$0xff]  ;;  %v2798_v39 = vld [vmem:[%s5317_s8 + $0x138] sm:$0xff]  ;;  %v2783_v40 = vld [vmem:[%s5317_s8 + $0xc0] sm:$0xff] }
  0x6c   :  { %504 = vmatmul.mubr.f32.vlgmr.msra.gmra.mrb[0].mxu1 %v262_v59  ;;  %v189_v7 = vmul.f32 %v3495_v5, %v3824_v45  ;;  %v3393_v45 = vpack.c.bf16 %v339_v28, %v338_v27  ;;  %v3497_v36 = vpop.eup %3496  ;;  %v2791_v59 = vld [vmem:[%s5317_s8 + $0x100] sm:$0xff]  ;;  %v2761_v5 = vld [vmem:[%s5317_s8 + $0x10] sm:$0xff]  ;;  %v2764_v27 = vld [vmem:[%s5317_s8 + $0x28] sm:$0xff] }
  0x6d   :  { %v188_v43 = vmul.f32 %v3497_v36, %v3826_v47  ;;  %v2775_v47 = vld [vmem:[%s5317_s8 + $0x80] sm:$0xff]  ;;  %v2766_v36 = vld [vmem:[%s5317_s8 + $0x38] sm:$0xff]  ;;  %v2784_v41 = vld [vmem:[%s5317_s8 + $0xc8] sm:$0xff] }
  0x6e   :  { %3382 = vmatpush3.bf16.msra.mxu0 %v3381_v15  ;;  %v227_v23 = vmul.f32 %v215_v3, %v189_v7  ;;  %v3407_v54 = vpack.c.bf16 %v2776_v12, %v2775_v47  ;;  %v2792_v15 = vld [vmem:[%s5317_s8 + $0x108] sm:$0xff]  ;;  %v2793_v7 = vld [vmem:[%s5317_s8 + $0x110] sm:$0xff]  ;;  %v2795_v28 = vld [vmem:[%s5317_s8 + $0x120] sm:$0xff] }
  0x6f   :  { %3384 = vmatprep.subr.bf16.mxu0 %v3383_v60  ;;  %v226_v50 = vmul.f32 %v211_v10, %v188_v43  ;;  %v2777_v60 = vld [vmem:[%s5317_s8 + $0x90] sm:$0xff]  ;;  %v3441_v61 = vpack.c.bf16 %v2792_v15, %v2791_v59  ;;  %v3449_v33 = vpack.c.bf16 %v2796_v29, %v2795_v28  ;;  %v2815_v42 = vld [vmem:[%s5317_s8 + $0x1c0] sm:$0xff]  ;;  %v2816_v43 = vld [vmem:[%s5317_s8 + $0x1c8] sm:$0xff]  ;;  %v3421_v10 = vpack.c.bf16 %v2766_v36, %v2765_v35 }
  0x70   :  { %v265_v25 = vadd.f32 %v253_v8, %v227_v23  ;;  %3408 = vmatprep.subr.bf16.mxu1 %v3407_v54  ;;  %v3411_v3 = vpack.c.bf16 %v2778_v62, %v2777_v60  ;;  %v2811_v23 = vld [vmem:[%s5317_s8 + $0x1a0] sm:$0xff]  ;;  %v2768_v49 = vld [vmem:[%s5317_s8 + $0x48] sm:$0xff]  ;;  %v2786_v47 = vld [vmem:[%s5317_s8 + $0xd8] sm:$0xff] }
  0x71   :  { %v264_v53 = vadd.f32 %v249_v51, %v226_v50  ;;  %3410 = vmatpush3.bf16.msra.mxu1 %v3409_v58  ;;  %v2767_v48 = vld [vmem:[%s5317_s8 + $0x40] sm:$0xff]  ;;  %v3455_v51 = vpack.c.bf16 %v2816_v43, %v2815_v42  ;;  %v2817_v12 = vld [vmem:[%s5317_s8 + $0x1d0] sm:$0xff]  ;;  %v2818_v14 = vld [vmem:[%s5317_s8 + $0x1d8] sm:$0xff] }
  0x72   :  { %3386 = vmatpush3.bf16.msra.mxu0 %v3385_v6  ;;  %573 = vmatprep.mubr.f32.mxu0 %v265_v25  ;;  %v2762_v6 = vld [vmem:[%s5317_s8 + $0x18] sm:$0xff]  ;;  %v2763_v25 = vld [vmem:[%s5317_s8 + $0x20] sm:$0xff]  ;;  %v3425_v54 = vpack.c.bf16 %v2768_v49, %v2767_v48  ;;  %v2801_v58 = vld [vmem:[%s5317_s8 + $0x150] sm:$0xff]  ;;  %v3459_v59 = vpack.c.bf16 %v2818_v14, %v2817_v12  ;;  %v590_v49 = vstv %s3074_s28  ;;  %s4618_s28 = sld [smem:[#allocation2 + $0x1e]] }
  0x73   :  { %3388 = vmatprep.subr.bf16.mxu0 %v3387_v13  ;;  %v3413_v8 = vpack.c.bf16 %v2762_v6, %v2761_v5  ;;  %v2794_v13 = vld [vmem:[%s5317_s8 + $0x118] sm:$0xff]  ;;  %3412 = vmatprep.subr.bf16.mxu1 %v3411_v3  ;;  %v3417_v30 = vpack.c.bf16 %v2764_v27, %v2763_v25  ;;  %v2799_v50 = vld [vmem:[%s5317_s8 + $0x140] sm:$0xff]  ;;  %v2772_v6 = vld [vmem:[%s5317_s8 + $0x68] sm:$0xff]  ;;  %v592_v14 = vstv %s4081_s30  ;;  %s4948_s30 = sld [smem:[#allocation2 + $0x29]] }
  0x74   :  { %v3445_v19 = vpack.c.bf16 %v2794_v13, %v2793_v7  ;;  %v2802_v15 = vld [vmem:[%s5317_s8 + $0x158] sm:$0xff]  ;;  %v2787_v60 = vld [vmem:[%s5317_s8 + $0xe0] sm:$0xff]  ;;  %v2804_v13 = vld [vmem:[%s5317_s8 + $0x168] sm:$0xff] }
  0x75   :  { %3414 = vmatpush3.bf16.msra.mxu1 %v3413_v8  ;;  %v2819_v62 = vld [vmem:[%s5317_s8 + $0x1e0] sm:$0xff]  ;;  %v3461_v3 = vpack.c.bf16 %v2802_v15, %v2801_v58  ;;  %v2789_v11 = vld [vmem:[%s5317_s8 + $0xf0] sm:$0xff]  ;;  %v2790_v18 = vld [vmem:[%s5317_s8 + $0xf8] sm:$0xff] }
  0x76   :  { %3390 = vmatpush3.bf16.msra.mxu0 %v3389_v24  ;;  %v2812_v24 = vld [vmem:[%s5317_s8 + $0x1a8] sm:$0xff]  ;;  %3416 = vmatprep.subr.bf16.mxu1 %v3415_v21  ;;  %v2771_v5 = vld [vmem:[%s5317_s8 + $0x60] sm:$0xff]  ;;  %v3463_v8 = vpack.c.bf16 %v2820_v63, %v2819_v62  ;;  %v2822_v21 = vld [vmem:[%s5317_s8 + $0x1f8] sm:$0xff]  ;;  %v3435_v25 = vpack.c.bf16 %v2790_v18, %v2789_v11 }
  0x77   :  { %3392 = vmatprep.subr.bf16.mxu0 %v3391_v26  ;;  %v3447_v26 = vpack.c.bf16 %v2812_v24, %v2811_v23  ;;  %v2803_v7 = vld [vmem:[%s5317_s8 + $0x160] sm:$0xff]  ;;  %v3433_v23 = vpack.c.bf16 %v2772_v6, %v2771_v5  ;;  %v2774_v27 = vld [vmem:[%s5317_s8 + $0x78] sm:$0xff]  ;;  %v2805_v29 = vld [vmem:[%s5317_s8 + $0x170] sm:$0xff] }
  0x78   :  { %v3465_v24 = vpack.c.bf16 %v2804_v13, %v2803_v7 }
  0x79   :  { %3418 = vmatpush3.bf16.msra.mxu1 %v3417_v30  ;;  %v2806_v30 = vld [vmem:[%s5317_s8 + $0x178] sm:$0xff] }
  0x7a   :  { %3394 = vmatpush3.bf16.msra.mxu0 %v3393_v45  ;;  %v2781_v45 = vld [vmem:[%s5317_s8 + $0xb0] sm:$0xff] }
  0x7b   :  { %3396 = vmatprep.subr.bf16.mxu0 %v3395_v31  ;;  %v2782_v31 = vld [vmem:[%s5317_s8 + $0xb8] sm:$0xff] }
  0x7c   :  { %v3419_v34 = vpack.c.bf16 %v2782_v31, %v2781_v45  ;;  %v3469_v31 = vpack.c.bf16 %v2806_v30, %v2805_v29 }
  0x7e   :  { %3398 = vmatpush3.bf16.msra.mxu0 %v3397_v37  ;;  %v3451_v37 = vpack.c.bf16 %v2814_v0, %v2813_v32  ;;  %3420 = vmatprep.subr.bf16.mxu1 %v3419_v34 }
  0x7f   :  { %3400 = vmatprep.subr.bf16.mxu0 %v3399_v38  ;;  %v2797_v38 = vld [vmem:[%s5317_s8 + $0x130] sm:$0xff]  ;;  %3422 = vmatpush3.bf16.msra.mxu1 %v3421_v10 }
  0x82   :  { %3402 = vmatpush3.bf16.msra.mxu0 %v3401_v44  ;;  %v3453_v44 = vpack.c.bf16 %v2798_v39, %v2797_v38 }
  0x83   :  { %3404 = vmatprep.subr.bf16.mxu0 %v3403_v46  ;;  %v3423_v46 = vpack.c.bf16 %v2784_v41, %v2783_v40  ;;  %v3700_v40 = vmov 1966171168  }
  0x84   :  { %v597_v41 = vunpack.c.l.s4 %v3700_v40 }
  0x85   :  { %3424 = vmatprep.subr.bf16.mxu1 %v3423_v46 }
  0x86   :  { %3406 = vmatpush3.bf16.msra.mxu0 %v3405_v52  ;;  %v2800_v52 = vld [vmem:[%s5317_s8 + $0x148] sm:$0xff]  ;;  %3426 = vmatpush3.bf16.msra.mxu1 %v3425_v54  ;;  %v598_v10 = vunpack.c.0.s8 %v597_v41  ;;  %v1008_v54 = vstv %s3081_s14  ;;  %s4954_s14 = sld [smem:[#allocation2 + $0x26]] }
  0x87   :  { %3440 = vmatprep.subr.bf16.mxu0 %v3439_v57  ;;  %v3457_v17 = vpack.c.bf16 %v2800_v52, %v2799_v50  ;;  %v2770_v57 = vld [vmem:[%s5317_s8 + $0x58] sm:$0xff]  ;;  %v1006_v50 = vstv %s3079_s13  ;;  %s4950_s13 = sld [smem:[#allocation2 + $0x24]] }
  0x88   :  { %v3429_v2 = vpack.c.bf16 %v2770_v57, %v2769_v56  ;;  %v4084_v52 = vsub.s32 %v598_v10, %v3832_v1 }
  0x89   :  { %574 = vmatmul.mubr.f32.vlgmr.msra.gmra.mrb[2].mxu0 %v264_v53  ;;  %v2785_v53 = vld [vmem:[%s5317_s8 + $0xd0] sm:$0xff] }
  0x8a   :  { %3442 = vmatpush3.bf16.msra.mxu0 %v3441_v61  ;;  %v3427_v55 = vpack.c.bf16 %v2786_v47, %v2785_v53  ;;  %v2788_v61 = vld [vmem:[%s5317_s8 + $0xe8] sm:$0xff]  ;;  %5378 = vst [vmem:[#allocation15_spill] sm:$0xff] %v4084_v52  ;;  %v588_v47 = vstv %s4079_s29  ;;  %s4946_s29 = sld [smem:[#allocation2 + $0x1f]] }
  0x8b   :  { %3444 = vmatprep.subr.bf16.mxu0 %v3443_v4  ;;  %v3431_v4 = vpack.c.bf16 %v2788_v61, %v2787_v60 }
  0x8c   :  { %3428 = vmatprep.subr.bf16.mxu1 %v3427_v55  ;;  %v1428_v55 = vstv %s3087_s15  ;;  %s5104_s15 = sld [smem:[#allocation2 + $0x18]] }
  0x8d   :  { %3430 = vmatpush3.bf16.msra.mxu1 %v3429_v2 }
  0x8e   :  { %3446 = vmatpush3.bf16.msra.mxu0 %v3445_v19  ;;  %v2821_v19 = vld [vmem:[%s5317_s8 + $0x1f0] sm:$0xff]  ;;  %3432 = vmatprep.subr.bf16.mxu1 %v3431_v4 }
  0x8f   :  { %3448 = vmatprep.subr.bf16.mxu0 %v3447_v26  ;;  %v2773_v26 = vld [vmem:[%s5317_s8 + $0x70] sm:$0xff]  ;;  %v3467_v28 = vpack.c.bf16 %v2822_v21, %v2821_v19  ;;  %s580_s8 = sld [smem:[#allocation2]] }
  0x90   :  { %v3437_v45 = vpack.c.bf16 %v2774_v27, %v2773_v26 }
  0x91   :  { %3434 = vmatpush3.bf16.msra.mxu1 %v3433_v23 }
  0x92   :  { %3450 = vmatpush3.bf16.msra.mxu0 %v3449_v33  ;;  %3436 = vmatprep.subr.bf16.mxu1 %v3435_v25  ;;  %v3073_v33 = vld [vmem:[%s5314_s5] ss:$0 sm:$0xff]  ;;  %s3085_s5 = sld [smem:[#allocation2 + $0xc]] }
  0x93   :  { %3452 = vmatprep.subr.bf16.mxu0 %v3451_v37 }
  0x95   :  { %3438 = vmatpush3.bf16.msra.mxu1 %v3437_v45  ;;  %v586_v48 = vstv %s580_s8  ;;  %s4615_s8 = sld [smem:[#allocation2 + $0x1d]] }
  0x96   :  { %3454 = vmatpush3.bf16.msra.mxu0 %v3453_v44 }
  0x97   :  { %3456 = vmatprep.subr.bf16.mxu0 %v3455_v51  ;;  %v1010_v51 = vstv %s3080_s1  ;;  %s4952_s1 = sld [smem:[#allocation2 + $0x25]] }
  0x98   :  { %v1426_v12 = vstv %s3085_s5  ;;  %s4956_s5 = sld [smem:[#allocation2 + $0x27]] }
  0x9a   :  { %3458 = vmatpush3.bf16.msra.mxu0 %v3457_v17  ;;  %v1012_v17 = vstv %s3082_s0  ;;  %s5089_s0 = sld [smem:[#allocation2 + $0x2b]] }
  0x9b   :  { %3460 = vmatprep.subr.bf16.mxu0 %v3459_v59 }
  0x9e   :  { %3462 = vmatpush3.bf16.msra.mxu0 %v3461_v3 }
  0x9f   :  { %3464 = vmatprep.subr.bf16.mxu0 %v3463_v8 }
  0xa2   :  { %3466 = vmatpush3.bf16.msra.mxu0 %v3465_v24 }
  0xa3   :  { %3468 = vmatprep.subr.bf16.mxu0 %v3467_v28 }
  0xa6   :  { %3470 = vmatpush3.bf16.msra.mxu0 %v3469_v31 }
 0x13c   :  { %v3152_v32 = vpop.f32.mrb[0].mxu0 }
 0x13d   :  { %v3153_v34 = vpop.f32.mrb[1].mxu0 }
 0x13e   :  { %v3154_v0 = vadd.f32 %v3153_v34, %v3152_v32 }
 0x13f   :  { %v3187_v35 = vpop.f32.mrb[0].mxu1 }
 0x140   :  { %v3188_v36 = vpop.f32.mrb[1].mxu1  ;;  %v436_v37 = vadd.f32 %v3154_v0, %v3073_v33 }
 0x141   :  { %v3189_v38 = vadd.f32 %v3188_v36, %v3187_v35 }
 0x143   :  { %v506_v39 = vadd.f32 %v3189_v38, %v436_v37 }
 0x15c   :  { %v3222_v42 = vpop.f32.mrb[2].mxu0 }
 0x15d   :  { %v3223_v43 = vpop.f32.mrb[3].mxu0 }
 0x15e   :  { %v3224_v44 = vadd.f32 %v3223_v43, %v3222_v42 }
 0x160   :  { %v576_v46 = vadd.f32 %v3224_v44, %v506_v39 }
 0x162   :  { %v4086_v53 = vmax.f32 %v576_v46, 0.0 }
 0x164   :  { %5379 = vst [vmem:[#allocation16_spill] sm:$0xff] %v4086_v53  ;;  %v587_v56 = vmul.f32 %v586_v48, %v4086_v53  ;;  %v591_v57 = vmul.f32 %v590_v49, %v4086_v53  ;;  %v1007_v58 = vmul.f32 %v1006_v50, %v4086_v53  ;;  %v1011_v59 = vmul.f32 %v1010_v51, %v4086_v53 }
 0x165   :  { %v1427_v15 = vmul.f32 %v1426_v12, %v4086_v53 }
 0x166   :  { %v589_v1 = vadd.f32 %v588_v47, %v587_v56  ;;  %v593_v60 = vadd.f32 %v592_v14, %v591_v57  ;;  %v1009_v61 = vadd.f32 %v1008_v54, %v1007_v58  ;;  %v4095_v62 = vadd.f32 %v1012_v17, %v1011_v59 }
 0x167   :  { %v4097_v63 = vadd.f32 %v1428_v55, %v1427_v15 }
 0x168   :  { %v595_v2 = vcombine.high %v589_v1, %v589_v1  ;;  %v602_v3 = vrot.slane %v589_v1, %v4084_v52  ;;  %v693_v4 = vcombine.high %v593_v60, %v593_v60  ;;  %v700_v5 = vrot.slane %v593_v60, %v4084_v52 }
 0x169   :  { %v1015_v6 = vcombine.high %v1009_v61, %v1009_v61  ;;  %v4102_v7 = vrot.slane %v1009_v61, %v4084_v52  ;;  %v1113_v8 = vcombine.high %v4095_v62, %v4095_v62  ;;  %v4108_v13 = vrot.slane %v4095_v62, %v4084_v52 }
 0x16a   :  { %v609_v11 = vrot.slane %v595_v2, %v4084_v52  ;;  %v610_v18 = vcombine.high %v602_v3, %v602_v3  ;;  %v618_v19 = vrot.slane %v602_v3, %v4084_v52  ;;  %v707_v21 = vrot.slane %v693_v4, %v4084_v52 }
 0x16b   :  { %v708_v23 = vcombine.high %v700_v5, %v700_v5  ;;  %v716_v24 = vrot.slane %v700_v5, %v4084_v52  ;;  %v4115_v25 = vrot.slane %v1015_v6, %v4084_v52  ;;  %v1030_v26 = vcombine.high %v4102_v7, %v4102_v7 }
 0x16c   :  { %v611_v27 = vcombine.high %v609_v11, %v609_v11  ;;  %v625_v28 = vrot.slane %v609_v11, %v4084_v52  ;;  %v632_v29 = vrot.slane %v610_v18, %v4084_v52  ;;  %v640_v30 = vcombine.high %v618_v19, %v618_v19 }
 0x16d   :  { %v647_v45 = vrot.slane %v618_v19, %v3843_v16  ;;  %v709_v31 = vcombine.high %v707_v21, %v707_v21  ;;  %v723_v32 = vrot.slane %v707_v21, %v4084_v52  ;;  %v730_v33 = vrot.slane %v708_v23, %v4084_v52 }
 0x16e   :  { %v639_v34 = vrot.slane %v611_v27, %v4084_v52  ;;  %v641_v0 = vcombine.high %v625_v28, %v625_v28  ;;  %v642_v35 = vcombine.high %v632_v29, %v632_v29  ;;  %v651_v36 = vrot.slane %v632_v29, %v3843_v16 }
 0x16f   :  { %v655_v37 = vrot.slane %v640_v30, %v3843_v16  ;;  %v663_v38 = vrot.slane %v625_v28, %v3843_v16  ;;  %v684_v39 = vmul.f32 %v647_v45, %v4086_v53  ;;  %v737_v40 = vrot.slane %v709_v31, %v4084_v52 }
 0x170   :  { %v643_v41 = vcombine.high %v639_v34, %v639_v34  ;;  %v659_v42 = vrot.slane %v642_v35, %v3843_v16  ;;  %v667_v43 = vrot.slane %v639_v34, %v3843_v16  ;;  %v671_v10 = vrot.slane %v641_v0, %v3843_v16 }
 0x171   :  { %v685_v44 = vmul.f32 %v651_v36, %v4086_v53  ;;  %v686_v46 = vmul.f32 %v655_v37, %v4086_v53  ;;  %v688_v48 = vmul.f32 %v663_v38, %v4086_v53  ;;  %v738_v49 = vcombine.high %v716_v24, %v716_v24 }
 0x172   :  { %v675_v50 = vrot.slane %v643_v41, %v3843_v16  ;;  %v687_v51 = vmul.f32 %v659_v42, %v4086_v53  ;;  %v689_v47 = vmul.f32 %v667_v43, %v4086_v53  ;;  %v690_v12 = vmul.f32 %v671_v10, %v4086_v53 }
 0x173   :  { %v739_v14 = vcombine.high %v723_v32, %v723_v32  ;;  %v740_v54 = vcombine.high %v730_v33, %v730_v33  ;;  %v741_v17 = vcombine.high %v737_v40, %v737_v40  ;;  %v745_v55 = vrot.slane %v716_v24, %v3843_v16 }
 0x174   :  { %v691_v56 = vmul.f32 %v675_v50, %v4086_v53  ;;  %v749_v57 = vrot.slane %v730_v33, %v3843_v16  ;;  %v753_v58 = vrot.slane %v738_v49, %v3843_v16  ;;  %v761_v59 = vrot.slane %v723_v32, %v3843_v16 }
 0x175   :  { %v757_v15 = vrot.slane %v740_v54, %v3843_v16  ;;  %v765_v1 = vrot.slane %v737_v40, %v3843_v16  ;;  %v769_v60 = vrot.slane %v739_v14, %v3843_v16  ;;  %v773_v61 = vrot.slane %v741_v17, %v3843_v16 }
 0x176   :  { %v4149_v2 = vadd.f32 %v745_v55, %v684_v39  ;;  %v4151_v3 = vadd.f32 %v749_v57, %v685_v44  ;;  %v4153_v4 = vadd.f32 %v753_v58, %v686_v46  ;;  %v4155_v5 = vadd.f32 %v761_v59, %v688_v48 }
 0x177   :  { %v4157_v6 = vadd.f32 %v757_v15, %v687_v51  ;;  %v4159_v11 = vadd.f32 %v765_v1, %v689_v47  ;;  %v4161_v18 = vadd.f32 %v769_v60, %v690_v12  ;;  %v4163_v19 = vadd.f32 %v773_v61, %v691_v56 }
 0x178   :  { %v790_v21 = vrot.slane %v4149_v2, 4  ;;  %v796_v23 = vrot.slane %v4151_v3, 4  ;;  %v802_v24 = vrot.slane %v4153_v4, 4  ;;  %v814_v27 = vrot.slane %v4155_v5, 4 }
 0x179   :  { %v808_v28 = vrot.slane %v4157_v6, 4  ;;  %v820_v29 = vrot.slane %v4159_v11, 4  ;;  %v826_v30 = vrot.slane %v4161_v18, 4  ;;  %v832_v45 = vrot.slane %v4163_v19, 4 }
 0x17a   :  { %v791_v31 = vmax.f32 %v4149_v2, %v790_v21  ;;  %v797_v32 = vmax.f32 %v4151_v3, %v796_v23  ;;  %v803_v33 = vmax.f32 %v4153_v4, %v802_v24  ;;  %v815_v34 = vmax.f32 %v4155_v5, %v814_v27 }
 0x17b   :  { %v809_v0 = vmax.f32 %v4157_v6, %v808_v28  ;;  %v821_v35 = vmax.f32 %v4159_v11, %v820_v29  ;;  %v827_v36 = vmax.f32 %v4161_v18, %v826_v30  ;;  %v833_v37 = vmax.f32 %v4163_v19, %v832_v45 }
 0x17c   :  { %v792_v38 = vrot.slane %v791_v31, 2  ;;  %v798_v39 = vrot.slane %v797_v32, 2  ;;  %v804_v40 = vrot.slane %v803_v33, 2  ;;  %v816_v41 = vrot.slane %v815_v34, 2 }
 0x17d   :  { %v810_v42 = vrot.slane %v809_v0, 2  ;;  %v822_v43 = vrot.slane %v821_v35, 2  ;;  %v828_v10 = vrot.slane %v827_v36, 2  ;;  %v834_v44 = vrot.slane %v833_v37, 2 }
 0x17e   :  { %v793_v46 = vmax.f32 %v791_v31, %v792_v38  ;;  %v799_v48 = vmax.f32 %v797_v32, %v798_v39  ;;  %v805_v49 = vmax.f32 %v803_v33, %v804_v40  ;;  %v817_v50 = vmax.f32 %v815_v34, %v816_v41 }
 0x17f   :  { %v811_v51 = vmax.f32 %v809_v0, %v810_v42  ;;  %v823_v47 = vmax.f32 %v821_v35, %v822_v43  ;;  %v829_v12 = vmax.f32 %v827_v36, %v828_v10  ;;  %v835_v14 = vmax.f32 %v833_v37, %v834_v44 }
 0x180   :  { %v794_v54 = vrot.slane %v793_v46, 1  ;;  %v800_v17 = vrot.slane %v799_v48, 1  ;;  %v806_v55 = vrot.slane %v805_v49, 1  ;;  %v818_v56 = vrot.slane %v817_v50, 1 }
 0x181   :  { %v812_v57 = vrot.slane %v811_v51, 1  ;;  %v824_v58 = vrot.slane %v823_v47, 1  ;;  %v830_v59 = vrot.slane %v829_v12, 1  ;;  %v836_v15 = vrot.slane %v835_v14, 1 }
 0x182   :  { %v795_v1 = vmax.f32 %v793_v46, %v794_v54  ;;  %v801_v60 = vmax.f32 %v799_v48, %v800_v17  ;;  %v807_v61 = vmax.f32 %v805_v49, %v806_v55  ;;  %v819_v21 = vmax.f32 %v817_v50, %v818_v56 }
 0x183   :  { %v813_v23 = vmax.f32 %v811_v51, %v812_v57  ;;  %v825_v24 = vmax.f32 %v823_v47, %v824_v58  ;;  %v831_v27 = vmax.f32 %v829_v12, %v830_v59  ;;  %v837_v28 = vmax.f32 %v835_v14, %v836_v15 }
 0x184   :  { %v838_v29 = vsub.f32 %v4149_v2, %v795_v1  ;;  %v839_v30 = vsub.f32 %v4151_v3, %v801_v60  ;;  %v840_v45 = vsub.f32 %v4153_v4, %v807_v61  ;;  %v842_v31 = vsub.f32 %v4155_v5, %v819_v21 }
 0x185   :  { %v841_v32 = vsub.f32 %v4157_v6, %v813_v23  ;;  %v843_v33 = vsub.f32 %v4159_v11, %v825_v24  ;;  %v844_v34 = vsub.f32 %v4161_v18, %v831_v27  ;;  %v845_v0 = vsub.f32 %v4163_v19, %v837_v28 }
 0x186   :  { %v846_v35 = vmul.f32 1.442695, %v838_v29  ;;  %v848_v36 = vmul.f32 1.442695, %v839_v30  ;;  %v850_v37 = vmul.f32 1.442695, %v840_v45  ;;  %v1031_v2 = vcombine.high %v4115_v25, %v4115_v25 }
 0x187   :  { %v852_v38 = vmul.f32 1.442695, %v841_v32  ;;  %v854_v3 = vmul.f32 1.442695, %v842_v31  ;;  %v856_v39 = vmul.f32 1.442695, %v843_v33  ;;  %v1038_v4 = vrot.slane %v4102_v7, %v4084_v52 }
 0x188   :  { %3498 = vpow2.f32 %v846_v35  ;;  %v858_v5 = vmul.f32 1.442695, %v844_v34  ;;  %v860_v6 = vmul.f32 1.442695, %v845_v0  ;;  %v1045_v11 = vrot.slane %v4115_v25, %v4084_v52 }
 0x189   :  { %3500 = vpow2.f32 %v848_v36  ;;  %v1052_v18 = vrot.slane %v1030_v26, %v4084_v52  ;;  %v1059_v19 = vrot.slane %v1031_v2, %v4084_v52  ;;  %v1060_v40 = vcombine.high %v1038_v4, %v1038_v4 }
 0x18a   :  { %3502 = vpow2.f32 %v850_v37  ;;  %v1061_v41 = vcombine.high %v1045_v11, %v1045_v11  ;;  %v1067_v42 = vrot.slane %v1038_v4, %v3843_v16  ;;  %v1083_v43 = vrot.slane %v1045_v11, %v3843_v16 }
 0x18b   :  { %3504 = vpow2.f32 %v852_v38  ;;  %v1062_v10 = vcombine.high %v1052_v18, %v1052_v18  ;;  %v1063_v44 = vcombine.high %v1059_v19, %v1059_v19  ;;  %v1071_v25 = vrot.slane %v1052_v18, %v3843_v16 }
 0x18c   :  { %3506 = vpow2.f32 %v854_v3  ;;  %v1075_v7 = vrot.slane %v1060_v40, %v3843_v16  ;;  %v1087_v26 = vrot.slane %v1059_v19, %v3843_v16  ;;  %v1091_v46 = vrot.slane %v1061_v41, %v3843_v16 }
 0x18d   :  { %3508 = vpow2.f32 %v856_v39  ;;  %v1079_v48 = vrot.slane %v1062_v10, %v3843_v16  ;;  %v1095_v49 = vrot.slane %v1063_v44, %v3843_v16  ;;  %v4215_v50 = vmul.f32 %v1067_v42, %v4086_v53 }
 0x18e   :  { %3510 = vpow2.f32 %v858_v5  ;;  %v4220_v51 = vmul.f32 %v1071_v25, %v4086_v53  ;;  %v4223_v47 = vmul.f32 %v1075_v7, %v4086_v53  ;;  %v4226_v12 = vmul.f32 %v1083_v43, %v4086_v53 }
 0x18f   :  { %3512 = vpow2.f32 %v860_v6  ;;  %v4229_v14 = vmul.f32 %v1079_v48, %v4086_v53  ;;  %v4232_v54 = vmul.f32 %v1087_v26, %v4086_v53  ;;  %v4235_v17 = vmul.f32 %v1091_v46, %v4086_v53 }
 0x190   :  { %v4238_v55 = vmul.f32 %v1095_v49, %v4086_v53  ;;  %v1127_v56 = vrot.slane %v1113_v8, %v4084_v52  ;;  %v1128_v57 = vcombine.high %v4108_v13, %v4108_v13  ;;  %v4248_v58 = vrot.slane %v4108_v13, %v4084_v52 }
 0x191   :  { %v1435_v59 = vcombine.high %v4097_v63, %v4097_v63  ;;  %v4254_v15 = vrot.slane %v4097_v63, %v4084_v52  ;;  %v1430_v23 = vstv %s4203_s2  ;;  %v4278_v34 = vstv %s4210_s16  ;;  %s5114_s2 = sld [smem:[#allocation2 + $0x19]]  ;;  %s5160_s16 = sld [smem:[#allocation2 + $0x1b]] }
 0x192   :  { %v3499_v1 = vpop.eup %3498  ;;  %v1129_v60 = vcombine.high %v1127_v56, %v1127_v56  ;;  %v4257_v62 = vrot.slane %v1127_v56, %v4084_v52  ;;  %v4260_v8 = vrot.slane %v1128_v57, %v4084_v52  ;;  %v4282_v2 = vstv %s4217_s17  ;;  %s5162_s17 = sld [smem:[#allocation2 + $0x28]] }
 0x193   :  { %v3501_v61 = vpop.eup %3500  ;;  %v862_v13 = vrot.slane %v3499_v1, 4  ;;  %v4263_v21 = vmul.f32 %v3499_v1, %v4086_v53  ;;  %v4267_v24 = vrot.slane %v1435_v59, %v4084_v52 }
 0x194   :  { %v3503_v63 = vpop.eup %3502  ;;  %v868_v27 = vrot.slane %v3501_v61, 4  ;;  %v911_v28 = vmul.f32 %v3501_v61, %v4086_v53  ;;  %v4271_v29 = vrot.slane %v1129_v60, %v4084_v52 }
 0x195   :  { %v3505_v45 = vpop.eup %3504  ;;  %v863_v31 = vadd.f32 %v3499_v1, %v862_v13  ;;  %v874_v32 = vrot.slane %v3503_v63, 4  ;;  %v4275_v33 = vmul.f32 %v3503_v63, %v4086_v53  ;;  %v918_v57 = vrot.slane %v4263_v21, 4 }
 0x196   :  { %v3507_v0 = vpop.eup %3506  ;;  %v869_v35 = vadd.f32 %v3501_v61, %v868_v27  ;;  %v880_v36 = vrot.slane %v3505_v45, 4  ;;  %v913_v37 = vmul.f32 %v3505_v45, %v4086_v53 }
 0x197   :  { %v3509_v38 = vpop.eup %3508  ;;  %v864_v3 = vrot.slane %v863_v31, 2  ;;  %v875_v39 = vadd.f32 %v3503_v63, %v874_v32  ;;  %v886_v4 = vrot.slane %v3507_v0, 4  ;;  %v914_v5 = vmul.f32 %v3507_v0, %v4086_v53 }
 0x198   :  { %v3511_v6 = vpop.eup %3510  ;;  %v870_v11 = vrot.slane %v869_v35, 2  ;;  %v881_v18 = vadd.f32 %v3505_v45, %v880_v36  ;;  %v892_v19 = vrot.slane %v3509_v38, 4  ;;  %v915_v40 = vmul.f32 %v3509_v38, %v4086_v53 }
 0x199   :  { %v3513_v41 = vpop.eup %3512  ;;  %v865_v42 = vadd.f32 %v864_v3, %v863_v31  ;;  %v876_v43 = vrot.slane %v875_v39, 2  ;;  %v887_v10 = vadd.f32 %v3507_v0, %v886_v4  ;;  %v898_v44 = vrot.slane %v3511_v6, 4 }
 0x19a   :  { %v871_v25 = vadd.f32 %v870_v11, %v869_v35  ;;  %v882_v7 = vrot.slane %v881_v18, 2  ;;  %v893_v26 = vadd.f32 %v3509_v38, %v892_v19  ;;  %v904_v46 = vrot.slane %v3513_v41, 4 }
 0x19b   :  { %v877_v48 = vadd.f32 %v876_v43, %v875_v39  ;;  %v888_v49 = vrot.slane %v887_v10, 2  ;;  %v899_v56 = vadd.f32 %v3511_v6, %v898_v44  ;;  %v866_v59 = vrot.slane %v865_v42, 1 }
 0x19c   :  { %v872_v1 = vrot.slane %v871_v25, 1  ;;  %v894_v60 = vrot.slane %v893_v26, 2  ;;  %v905_v61 = vadd.f32 %v3513_v41, %v904_v46  ;;  %v883_v63 = vadd.f32 %v882_v7, %v881_v18 }
 0x19d   :  { %v878_v13 = vrot.slane %v877_v48, 1  ;;  %v900_v27 = vrot.slane %v899_v56, 2  ;;  %v924_v45 = vrot.slane %v911_v28, 4  ;;  %v889_v31 = vadd.f32 %v888_v49, %v887_v10 }
 0x19e   :  { %v895_v32 = vadd.f32 %v894_v60, %v893_v26  ;;  %v4290_v35 = vmul.f32 %v1430_v23, %v4086_v53  ;;  %v906_v36 = vrot.slane %v905_v61, 2  ;;  %v916_v38 = vmul.f32 %v3511_v6, %v4086_v53 }
 0x19f   :  { %v867_v4 = vadd.f32 %v866_v59, %v865_v42  ;;  %v873_v11 = vadd.f32 %v872_v1, %v871_v25  ;;  %v901_v18 = vadd.f32 %v900_v27, %v899_v56  ;;  %v917_v19 = vmul.f32 %v3513_v41, %v4086_v53 }
 0x1a0   :  { %v879_v43 = vadd.f32 %v878_v13, %v877_v48  ;;  %v884_v10 = vrot.slane %v883_v63, 1  ;;  %v919_v44 = vadd.f32 %v918_v57, %v4263_v21  ;;  %v925_v23 = vadd.f32 %v924_v45, %v911_v28 }
 0x1a1   :  { %v890_v7 = vrot.slane %v889_v31, 1  ;;  %v896_v26 = vrot.slane %v895_v32, 1  ;;  %v930_v6 = vrot.slane %v4275_v33, 4  ;;  %v936_v46 = vrot.slane %v913_v37, 4 }
 0x1a2   :  { %v907_v49 = vadd.f32 %v906_v36, %v905_v61  ;;  %v920_v60 = vrot.slane %v919_v44, 2  ;;  %v926_v30 = vrot.slane %v925_v23, 2  ;;  %v942_v3 = vrot.slane %v914_v5, 4 }
 0x1a3   :  { %v902_v39 = vrot.slane %v901_v18, 1  ;;  %v931_v42 = vadd.f32 %v930_v6, %v4275_v33  ;;  %v937_v25 = vadd.f32 %v936_v46, %v913_v37  ;;  %v948_v56 = vrot.slane %v915_v40, 4 }
 0x1a4   :  { %v921_v41 = vadd.f32 %v920_v60, %v919_v44  ;;  %v927_v48 = vadd.f32 %v926_v30, %v925_v23  ;;  %v943_v59 = vadd.f32 %v942_v3, %v914_v5  ;;  %v954_v1 = vrot.slane %v916_v38, 4 }
 0x1a5   :  { %v932_v21 = vrot.slane %v931_v42, 2  ;;  %v938_v28 = vrot.slane %v937_v25, 2  ;;  %v949_v57 = vadd.f32 %v948_v56, %v915_v40  ;;  %v960_v13 = vrot.slane %v917_v19, 4 }
 0x1a6   :  { %v908_v27 = vrot.slane %v907_v49, 1  ;;  %v922_v45 = vrot.slane %v921_v41, 1  ;;  %v944_v0 = vrot.slane %v943_v59, 2  ;;  %v955_v61 = vadd.f32 %v954_v1, %v916_v38 }
 0x1a7   :  { %v928_v36 = vrot.slane %v927_v48, 1  ;;  %v933_v22 = vadd.f32 %v932_v21, %v931_v42  ;;  %v950_v20 = vrot.slane %v949_v57, 2  ;;  %v961_v9 = vadd.f32 %v960_v13, %v917_v19 }
 0x1a8   :  { %v885_v53 = vadd.f32 %v884_v10, %v883_v63  ;;  %v939_v33 = vadd.f32 %v938_v28, %v937_v25  ;;  %v945_v37 = vadd.f32 %v944_v0, %v943_v59  ;;  %v956_v6 = vrot.slane %v955_v61, 2 }
 0x1a9   :  { %v891_v44 = vadd.f32 %v890_v7, %v889_v31  ;;  %v934_v30 = vrot.slane %v933_v22, 1  ;;  %v951_v5 = vadd.f32 %v950_v20, %v949_v57  ;;  %v962_v3 = vrot.slane %v961_v9, 2 }
 0x1aa   :  { %v897_v23 = vadd.f32 %v896_v26, %v895_v32  ;;  %v903_v46 = vadd.f32 %v902_v39, %v901_v18  ;;  %v957_v40 = vadd.f32 %v956_v6, %v955_v61  ;;  %3514 = vrcp.f32 %v867_v4 }
 0x1ab   :  { %v909_v60 = vadd.f32 %v908_v27, %v907_v49  ;;  %v923_v56 = vadd.f32 %v922_v45, %v921_v41  ;;  %v929_v52 = vadd.f32 %v928_v36, %v927_v48  ;;  %v1160_v38 = vcombine.high %v4260_v8, %v4260_v8 }
 0x1ac   :  { %v940_v42 = vrot.slane %v939_v33, 1  ;;  %v946_v19 = vrot.slane %v945_v37, 1  ;;  %3516 = vrcp.f32 %v873_v11  ;;  %v1161_v63 = vcombine.high %v4271_v29, %v4271_v29 }
 0x1ad   :  { %v935_v31 = vadd.f32 %v934_v30, %v933_v22  ;;  %v952_v0 = vrot.slane %v951_v5, 1  ;;  %v963_v20 = vadd.f32 %v962_v3, %v961_v9  ;;  %3518 = vrcp.f32 %v879_v43 }
 0x1ae   :  { %v958_v32 = vrot.slane %v957_v40, 1  ;;  %3520 = vrcp.f32 %v885_v53  ;;  %v1169_v39 = vrot.slane %v4260_v8, %v3843_v16  ;;  %v5380_v4 = vcombine.high %v4248_v58, %v4248_v58 }
 0x1af   :  { %3522 = vrcp.f32 %v891_v44  ;;  %v1177_v11 = vrot.slane %v1160_v38, %v3843_v16  ;;  %v1181_v10 = vrot.slane %v4257_v62, %v3843_v16  ;;  %v1185_v9 = vrot.slane %v4271_v29, %v3843_v16 }
 0x1b0   :  { %v1173_v18 = vrot.slane %v5380_v4, %v3843_v16  ;;  %3524 = vrcp.f32 %v897_v23  ;;  %v5381_v22 = vcombine.high %v4257_v62, %v4257_v62  ;;  %v1193_v8 = vrot.slane %v1161_v63, %v3843_v16 }
 0x1b1   :  { %v5382_v43 = vrot.slane %v4248_v58, %v3843_v16  ;;  %3526 = vrcp.f32 %v903_v46  ;;  %v4328_v26 = vadd.f32 %v1169_v39, %v4220_v51  ;;  %v4334_v49 = vadd.f32 %v1177_v11, %v4229_v14 }
 0x1b2   :  { %v1189_v53 = vrot.slane %v5381_v22, %v3843_v16  ;;  %v4331_v29 = vadd.f32 %v1173_v18, %v4223_v47  ;;  %3528 = vrcp.f32 %v909_v60  ;;  %v4337_v62 = vadd.f32 %v1181_v10, %v4226_v12 }
 0x1b3   :  { %v4325_v7 = vadd.f32 %v5382_v43, %v4215_v50  ;;  %v4340_v25 = vadd.f32 %v1185_v9, %v4232_v54  ;;  %v4346_v58 = vadd.f32 %v1193_v8, %v4238_v55  ;;  %v1216_v47 = vrot.slane %v4328_v26, 4 }
 0x1b4   :  { %v4343_v50 = vadd.f32 %v1189_v53, %v4235_v17  ;;  %v1222_v14 = vrot.slane %v4331_v29, 4  ;;  %v3515_v41 = vpop.eup %3514  ;;  %v964_v48 = vrot.slane %v963_v20, 1  ;;  %v1228_v12 = vrot.slane %v4334_v49, 4 }
 0x1b5   :  { %v1210_v51 = vrot.slane %v4325_v7, 4  ;;  %v1234_v59 = vrot.slane %v4337_v62, 4  ;;  %v1240_v54 = vrot.slane %v4340_v25, 4  ;;  %v967_v1 = vmul.f32 %v3515_v41, %v923_v56 }
 0x1b6   :  { %v1217_v55 = vmax.f32 %v4328_v26, %v1216_v47  ;;  %v1223_v21 = vmax.f32 %v4331_v29, %v1222_v14  ;;  %v3517_v28 = vpop.eup %3516  ;;  %v941_v57 = vadd.f32 %v940_v42, %v939_v33  ;;  %v947_v13 = vadd.f32 %v946_v19, %v945_v37 }
 0x1b7   :  { %v1211_v17 = vmax.f32 %v4325_v7, %v1210_v51  ;;  %v953_v27 = vadd.f32 %v952_v0, %v951_v5  ;;  %v1229_v45 = vmax.f32 %v4334_v49, %v1228_v12  ;;  %v3519_v61 = vpop.eup %3518  ;;  %v969_v36 = vmul.f32 %v3517_v28, %v929_v52 }
 0x1b8   :  { %v1218_v44 = vrot.slane %v1217_v55, 2  ;;  %v1235_v30 = vmax.f32 %v4337_v62, %v1234_v59  ;;  %v3521_v3 = vpop.eup %3520  ;;  %v959_v23 = vadd.f32 %v958_v32, %v957_v40  ;;  %v971_v46 = vmul.f32 %v3519_v61, %v935_v31 }
 0x1b9   :  { %v1212_v6 = vrot.slane %v1211_v17, 2  ;;  %v1224_v60 = vrot.slane %v1223_v21, 2  ;;  %v1246_v56 = vrot.slane %v4343_v50, 4  ;;  %v3523_v38 = vpop.eup %3522  ;;  %v965_v63 = vadd.f32 %v964_v48, %v963_v20 }
 0x1ba   :  { %v973_v39 = vmul.f32 %v3521_v3, %v941_v57  ;;  %v1241_v37 = vmax.f32 %v4340_v25, %v1240_v54  ;;  %v3525_v5 = vpop.eup %3524  ;;  %v975_v42 = vmul.f32 %v3523_v38, %v947_v13  ;;  %v983_v52 = vmul.f32 %v4278_v34, %v967_v1 }
 0x1bb   :  { %v1213_v33 = vmax.f32 %v1211_v17, %v1212_v6  ;;  %v1219_v19 = vmax.f32 %v1217_v55, %v1218_v44  ;;  %v1225_v0 = vmax.f32 %v1223_v21, %v1224_v60  ;;  %v3527_v40 = vpop.eup %3526  ;;  %v4366_v31 = vmul.f32 %v3525_v5, %v953_v27 }
 0x1bc   :  { %v1230_v4 = vrot.slane %v1229_v45, 2  ;;  %v1236_v18 = vrot.slane %v1235_v30, 2  ;;  %v3529_v20 = vpop.eup %3528  ;;  %v4368_v11 = vmul.f32 %v3527_v40, %v959_v23  ;;  %v984_v10 = vmul.f32 %v4278_v34, %v969_v36 }
 0x1bd   :  { %v1214_v32 = vrot.slane %v1213_v33, 1  ;;  %v1220_v9 = vrot.slane %v1219_v19, 1  ;;  %v1247_v22 = vmax.f32 %v4343_v50, %v1246_v56  ;;  %v4372_v53 = vmul.f32 %v3529_v20, %v965_v63 }
 0x1be   :  { %v4375_v8 = vstv %s4354_s18  ;;  %v4378_v43 = vstv %s4356_s19  ;;  %v5383_v51 = vstv %s4208_s3  ;;  %v4386_v14 = vadd.f32 %v4282_v2, %v983_v52  ;;  %s5116_s3 = sld [smem:[#allocation2 + $0x1a]]  ;;  %s3107_s18 = sld [smem:[#allocation2 + $0x20]] }
 0x1bf   :  { %v4383_v47 = vadd.f32 %v5383_v51, %v4290_v35  ;;  %v1215_v41 = vmax.f32 %v1213_v33, %v1214_v32  ;;  %v1221_v48 = vmax.f32 %v1219_v19, %v1220_v9  ;;  %v1226_v12 = vrot.slane %v1225_v0, 1  ;;  %v5386_v32 = vld [vmem:[#allocation15_spill] sm:$0xff]  ;;  %s3108_s19 = sld [smem:[#allocation2 + $0x21]] }
 0x1c0   :  { %5384 = vst [vmem:[#allocation17_spill] sm:$0xff] %v4386_v14  ;;  %v4389_v59 = vmul.f32 %v4278_v34, %v971_v46  ;;  %v4392_v54 = vmul.f32 %v4278_v34, %v973_v39  ;;  %v1231_v1 = vmax.f32 %v1229_v45, %v1230_v4  ;;  %v1237_v17 = vmax.f32 %v1235_v30, %v1236_v18 }
 0x1c1   :  { %v4395_v55 = vadd.f32 %v4282_v2, %v984_v10  ;;  %v1227_v21 = vmax.f32 %v1225_v0, %v1226_v12  ;;  %v1242_v35 = vrot.slane %v1241_v37, 2  ;;  %v1248_v28 = vrot.slane %v1247_v22, 2 }
 0x1c2   :  { %v4398_v57 = vmul.f32 %v4278_v34, %v975_v42  ;;  %v1232_v13 = vrot.slane %v1231_v1, 1  ;;  %v1238_v27 = vrot.slane %v1237_v17, 1  ;;  %v1252_v61 = vrot.slane %v4346_v58, 4 }
 0x1c3   :  { %5385 = vst [vmem:[#allocation18_spill] sm:$0xff] %v4395_v55  ;;  %v1243_v36 = vmax.f32 %v1241_v37, %v1242_v35  ;;  %v1249_v6 = vmax.f32 %v1247_v22, %v1248_v28  ;;  %v1258_v44 = vsub.f32 %v4325_v7, %v1215_v41  ;;  %v1259_v45 = vsub.f32 %v4328_v26, %v1221_v48 }
 0x1c4   :  { %v1233_v30 = vmax.f32 %v1231_v1, %v1232_v13  ;;  %v1239_v3 = vmax.f32 %v1237_v17, %v1238_v27  ;;  %v1253_v23 = vmax.f32 %v4346_v58, %v1252_v61  ;;  %v1260_v46 = vsub.f32 %v4331_v29, %v1227_v21  ;;  %v5387_v61 = vld [vmem:[#allocation16_spill] sm:$0xff] }
 0x1c5   :  { %v1244_v60 = vrot.slane %v1243_v36, 1  ;;  %v1250_v56 = vrot.slane %v1249_v6, 1  ;;  %v1266_v38 = vmul.f32 1.442695, %v1258_v44  ;;  %v1268_v63 = vmul.f32 1.442695, %v1259_v45 }
 0x1c6   :  { %v1254_v39 = vrot.slane %v1253_v23, 2  ;;  %v1261_v33 = vsub.f32 %v4334_v49, %v1233_v30  ;;  %v1262_v37 = vsub.f32 %v4337_v62, %v1239_v3  ;;  %v1270_v5 = vmul.f32 1.442695, %v1260_v46 }
 0x1c7   :  { %v1245_v42 = vmax.f32 %v1243_v36, %v1244_v60  ;;  %v1251_v7 = vmax.f32 %v1249_v6, %v1250_v56  ;;  %3530 = vpow2.f32 %v1266_v38  ;;  %v1450_v26 = vcombine.high %v4254_v15, %v4254_v15 }
 0x1c8   :  { %v1255_v52 = vmax.f32 %v1253_v23, %v1254_v39  ;;  %3532 = vpow2.f32 %v1268_v63  ;;  %v1272_v19 = vmul.f32 1.442695, %v1261_v33  ;;  %v1274_v29 = vmul.f32 1.442695, %v1262_v37 }
 0x1c9   :  { %v1263_v0 = vsub.f32 %v4340_v25, %v1245_v42  ;;  %v1264_v40 = vsub.f32 %v4343_v50, %v1251_v7  ;;  %3534 = vpow2.f32 %v1270_v5  ;;  %v1451_v49 = vcombine.high %v4267_v24, %v4267_v24 }
 0x1ca   :  { %v1256_v62 = vrot.slane %v1255_v52, 1  ;;  %3536 = vpow2.f32 %v1272_v19  ;;  %v1458_v4 = vrot.slane %v4254_v15, %v5386_v32  ;;  %v1465_v18 = vrot.slane %v4267_v24, %v5386_v32 }
 0x1cb   :  { %3538 = vpow2.f32 %v1274_v29  ;;  %v1276_v20 = vmul.f32 1.442695, %v1263_v0  ;;  %v1278_v10 = vmul.f32 1.442695, %v1264_v40  ;;  %v1472_v9 = vrot.slane %v1450_v26, %v5386_v32 }
 0x1cc   :  { %v1257_v25 = vmax.f32 %v1255_v52, %v1256_v62  ;;  %v1479_v50 = vrot.slane %v1451_v49, %v5386_v32  ;;  %v1480_v22 = vcombine.high %v1458_v4, %v1458_v4  ;;  %v1481_v51 = vcombine.high %v1465_v18, %v1465_v18 }
 0x1cd   :  { %3540 = vpow2.f32 %v1276_v20  ;;  %v1482_v41 = vcombine.high %v1472_v9, %v1472_v9  ;;  %v1487_v48 = vrot.slane %v1458_v4, %v3843_v16  ;;  %v1491_v12 = vrot.slane %v1472_v9, %v3843_v16 }
 0x1ce   :  { %v1265_v15 = vsub.f32 %v4346_v58, %v1257_v25  ;;  %3542 = vpow2.f32 %v1278_v10  ;;  %v1483_v24 = vcombine.high %v1479_v50, %v1479_v50  ;;  %v1495_v1 = vrot.slane %v1480_v22, %v3843_v16 }
 0x1cf   :  { %v1499_v17 = vrot.slane %v1482_v41, %v3843_v16  ;;  %v1503_v21 = vrot.slane %v1465_v18, %v3843_v16  ;;  %v1507_v35 = vrot.slane %v1479_v50, %v3843_v16  ;;  %v1511_v28 = vrot.slane %v1481_v51, %v3843_v16 }
 0x1d0   :  { %v1280_v13 = vmul.f32 1.442695, %v1265_v15  ;;  %v1515_v27 = vrot.slane %v1483_v24, %v3843_v16  ;;  %v4429_v36 = vmul.f32 %v1487_v48, %v5387_v61  ;;  %v4432_v58 = vmul.f32 %v1491_v12, %v5387_v61 }
 0x1d1   :  { %v3531_v6 = vpop.eup %3530  ;;  %v4435_v44 = vmul.f32 %v1495_v1, %v5387_v61  ;;  %v4438_v45 = vmul.f32 %v1499_v17, %v5387_v61  ;;  %v4441_v30 = vmul.f32 %v1503_v21, %v5387_v61  ;;  %v4444_v3 = vmul.f32 %v1507_v35, %v5387_v61 }
 0x1d2   :  { %v3533_v23 = vpop.eup %3532  ;;  %3544 = vpow2.f32 %v1280_v13  ;;  %v1282_v46 = vrot.slane %v3531_v6, 4  ;;  %v1330_v60 = vmul.f32 %v3531_v6, %v5387_v61  ;;  %v4448_v56 = vmul.f32 %v1511_v28, %v5387_v61 }
 0x1d3   :  { %v3535_v38 = vpop.eup %3534  ;;  %v4452_v63 = vadd.f32 %v4282_v2, %v4389_v59  ;;  %v1288_v39 = vrot.slane %v3533_v23, 4  ;;  %v1331_v33 = vmul.f32 %v3533_v23, %v5387_v61  ;;  %v4456_v37 = vmul.f32 %v1515_v27, %v5387_v61 }
 0x1d4   :  { %v3537_v5 = vpop.eup %3536  ;;  %v988_v42 = vmul.f32 %v4278_v34, %v4366_v31  ;;  %v1283_v7 = vadd.f32 %v3531_v6, %v1282_v46  ;;  %v1294_v26 = vrot.slane %v3535_v38, 4  ;;  %v1332_v52 = vmul.f32 %v3535_v38, %v5387_v61 }
 0x1d5   :  { %5388 = vst [vmem:[#allocation15_spill] sm:$0xff] %v4452_v63  ;;  %v3539_v19 = vpop.eup %3538  ;;  %v4463_v29 = vadd.f32 %v4282_v2, %v4392_v54  ;;  %v1289_v59 = vadd.f32 %v3533_v23, %v1288_v39  ;;  %v1300_v0 = vrot.slane %v3537_v5, 4  ;;  %v1333_v40 = vmul.f32 %v3537_v5, %v5387_v61 }
 0x1d6   :  { %v1284_v49 = vrot.slane %v1283_v7, 2  ;;  %v1295_v62 = vadd.f32 %v3535_v38, %v1294_v26  ;;  %v1306_v4 = vrot.slane %v3539_v19, 4  ;;  %v1334_v18 = vmul.f32 %v3539_v19, %v5387_v61 }
 0x1d7   :  { %5389 = vst [vmem:[#allocation16_spill] sm:$0xff] %v4463_v29  ;;  %v3541_v20 = vpop.eup %3540  ;;  %v4469_v31 = vmul.f32 %v4278_v34, %v4368_v11  ;;  %v1290_v10 = vrot.slane %v1289_v59, 2  ;;  %v1301_v9 = vadd.f32 %v3537_v5, %v1300_v0  ;;  %v1338_v25 = vrot.slane %v1330_v60, 4 }
 0x1d8   :  { %v3543_v50 = vpop.eup %3542  ;;  %v1285_v54 = vadd.f32 %v1284_v49, %v1283_v7  ;;  %v1296_v22 = vrot.slane %v1295_v62, 2  ;;  %v1307_v51 = vadd.f32 %v3539_v19, %v1306_v4  ;;  %v1312_v41 = vrot.slane %v3541_v20, 4 }
 0x1d9   :  { %v1291_v48 = vadd.f32 %v1290_v10, %v1289_v59  ;;  %v1302_v12 = vrot.slane %v1301_v9, 2  ;;  %v1318_v15 = vrot.slane %v3543_v50, 4  ;;  %v1335_v24 = vmul.f32 %v3541_v20, %v5387_v61 }
 0x1da   :  { %v4474_v1 = vadd.f32 %v4282_v2, %v4398_v57  ;;  %v1308_v17 = vrot.slane %v1307_v51, 2  ;;  %v1313_v11 = vadd.f32 %v3541_v20, %v1312_v41  ;;  %v1344_v21 = vrot.slane %v1331_v33, 4 }
 0x1db   :  { %v1297_v35 = vadd.f32 %v1296_v22, %v1295_v62  ;;  %v1303_v28 = vadd.f32 %v1302_v12, %v1301_v9  ;;  %v1319_v13 = vadd.f32 %v3543_v50, %v1318_v15  ;;  %v1336_v27 = vmul.f32 %v3543_v50, %v5387_v61 }
 0x1dc   :  { %5390 = vst [vmem:[#allocation19_spill] sm:$0xff] %v4474_v1  ;;  %v3545_v6 = vpop.eup %3544  ;;  %v1286_v23 = vrot.slane %v1285_v54, 1  ;;  %v1292_v46 = vrot.slane %v1291_v48, 1  ;;  %v1309_v38 = vadd.f32 %v1308_v17, %v1307_v51  ;;  %v1314_v39 = vrot.slane %v1313_v11, 2 }
 0x1dd   :  { %v4479_v5 = vmul.f32 %v4278_v34, %v4372_v53  ;;  %v1320_v7 = vrot.slane %v1319_v13, 2  ;;  %v1324_v57 = vrot.slane %v3545_v6, 4  ;;  %v1339_v26 = vadd.f32 %v1338_v25, %v1330_v60 }
 0x1de   :  { %v4482_v19 = vadd.f32 %v4282_v2, %v988_v42  ;;  %v1315_v59 = vadd.f32 %v1314_v39, %v1313_v11  ;;  %v1337_v0 = vmul.f32 %v3545_v6, %v5387_v61  ;;  %v1345_v49 = vadd.f32 %v1344_v21, %v1331_v33 }
 0x1df   :  { %v1298_v62 = vrot.slane %v1297_v35, 1  ;;  %v1304_v4 = vrot.slane %v1303_v28, 1  ;;  %v1325_v20 = vadd.f32 %v3545_v6, %v1324_v57  ;;  %v1533_v10 = vcombine.high %v4383_v47, %v4383_v47 }
 0x1e0   :  { %5391 = vst [vmem:[#allocation20_spill] sm:$0xff] %v4482_v19  ;;  %v1287_v9 = vadd.f32 %v1286_v23, %v1285_v54  ;;  %v1293_v50 = vadd.f32 %v1292_v46, %v1291_v48  ;;  %v1310_v34 = vrot.slane %v1309_v38, 1  ;;  %v1350_v53 = vrot.slane %v1332_v52, 4 }
 0x1e1   :  { %v1321_v22 = vadd.f32 %v1320_v7, %v1319_v13  ;;  %v1326_v51 = vrot.slane %v1325_v20, 2  ;;  %v1340_v60 = vrot.slane %v1339_v26, 2  ;;  %v1356_v25 = vrot.slane %v1333_v40, 4 }
 0x1e2   :  { %v1316_v42 = vrot.slane %v1315_v59, 1  ;;  %v1346_v41 = vrot.slane %v1345_v49, 2  ;;  %v1351_v12 = vadd.f32 %v1350_v53, %v1332_v52  ;;  %v1362_v15 = vrot.slane %v1334_v18, 4 }
 0x1e3   :  { %v1299_v17 = vadd.f32 %v1298_v62, %v1297_v35  ;;  %v1305_v33 = vadd.f32 %v1304_v4, %v1303_v28  ;;  %v1327_v11 = vadd.f32 %v1326_v51, %v1325_v20  ;;  %v1357_v21 = vadd.f32 %v1356_v25, %v1333_v40 }
 0x1e4   :  { %v1311_v6 = vadd.f32 %v1310_v34, %v1309_v38  ;;  %v1352_v39 = vrot.slane %v1351_v12, 2  ;;  %v1363_v57 = vadd.f32 %v1362_v15, %v1334_v18  ;;  %v1368_v19 = vrot.slane %v1335_v24, 4 }
 0x1e5   :  { %v1322_v54 = vrot.slane %v1321_v22, 1  ;;  %v1341_v48 = vadd.f32 %v1340_v60, %v1339_v26  ;;  %v1358_v23 = vrot.slane %v1357_v21, 2  ;;  %v1374_v46 = vrot.slane %v1336_v27, 4 }
 0x1e6   :  { %v1317_v13 = vadd.f32 %v1316_v42, %v1315_v59  ;;  %v1347_v7 = vadd.f32 %v1346_v41, %v1345_v49  ;;  %v1364_v1 = vrot.slane %v1363_v57, 2  ;;  %v1369_v29 = vadd.f32 %v1368_v19, %v1335_v24 }
 0x1e7   :  { %v1328_v63 = vrot.slane %v1327_v11, 1  ;;  %v1353_v55 = vadd.f32 %v1352_v39, %v1351_v12  ;;  %v1375_v52 = vadd.f32 %v1374_v46, %v1336_v27  ;;  %v1380_v53 = vrot.slane %v1337_v0, 4 }
 0x1e8   :  { %v1359_v35 = vadd.f32 %v1358_v23, %v1357_v21  ;;  %v1365_v28 = vadd.f32 %v1364_v1, %v1363_v57  ;;  %v1370_v62 = vrot.slane %v1369_v29, 2  ;;  %3546 = vrcp.f32 %v1287_v9 }
 0x1e9   :  { %v1323_v40 = vadd.f32 %v1322_v54, %v1321_v22  ;;  %v1376_v38 = vrot.slane %v1375_v52, 2  ;;  %v1381_v18 = vadd.f32 %v1380_v53, %v1337_v0  ;;  %3548 = vrcp.f32 %v1293_v50 }
 0x1ea   :  { %v1342_v4 = vrot.slane %v1341_v48, 1  ;;  %v1348_v26 = vrot.slane %v1347_v7, 1  ;;  %v1371_v20 = vadd.f32 %v1370_v62, %v1369_v29  ;;  %3550 = vrcp.f32 %v1299_v17 }
 0x1eb   :  { %v1329_v59 = vadd.f32 %v1328_v63, %v1327_v11  ;;  %v1354_v49 = vrot.slane %v1353_v55, 1  ;;  %v1382_v34 = vrot.slane %v1381_v18, 2  ;;  %3552 = vrcp.f32 %v1305_v33 }
 0x1ec   :  { %v1360_v24 = vrot.slane %v1359_v35, 1  ;;  %v1366_v19 = vrot.slane %v1365_v28, 1  ;;  %3554 = vrcp.f32 %v1311_v6  ;;  %v1540_v1 = vrot.slane %v4383_v47, %v5386_v32 }
 0x1ed   :  { %v1372_v27 = vrot.slane %v1371_v20, 1  ;;  %v1377_v9 = vadd.f32 %v1376_v38, %v1375_v52  ;;  %3556 = vrcp.f32 %v1317_v13  ;;  %v1547_v0 = vrot.slane %v1533_v10, %v5386_v32 }
 0x1ee   :  { %v1383_v50 = vadd.f32 %v1382_v34, %v1381_v18  ;;  %3558 = vrcp.f32 %v1323_v40  ;;  %v1548_v22 = vcombine.high %v1540_v1, %v1540_v1  ;;  %v1556_v29 = vrot.slane %v1540_v1, %v5386_v32 }
 0x1ef   :  { %v1343_v63 = vadd.f32 %v1342_v4, %v1341_v48  ;;  %v1349_v51 = vadd.f32 %v1348_v26, %v1347_v7  ;;  %3560 = vrcp.f32 %v1329_v59  ;;  %v1549_v60 = vcombine.high %v1547_v0, %v1547_v0 }
 0x1f0   :  { %v1355_v25 = vadd.f32 %v1354_v49, %v1353_v55  ;;  %v1563_v42 = vrot.slane %v1547_v0, %v5386_v32  ;;  %v1570_v41 = vrot.slane %v1548_v22, %v5386_v32  ;;  %v1578_v47 = vcombine.high %v1556_v29, %v1556_v29 }
 0x1f1   :  { %v1361_v12 = vadd.f32 %v1360_v24, %v1359_v35  ;;  %v1367_v15 = vadd.f32 %v1366_v19, %v1365_v28  ;;  %v1378_v17 = vrot.slane %v1377_v9, 1  ;;  %v1577_v10 = vrot.slane %v1549_v60, %v5386_v32 }
 0x1f2   :  { %v3547_v33 = vpop.eup %3546  ;;  %v1373_v11 = vadd.f32 %v1372_v27, %v1371_v20  ;;  %v1384_v21 = vrot.slane %v1383_v50, 1  ;;  %v1580_v6 = vcombine.high %v1570_v41, %v1570_v41  ;;  %v1585_v39 = vrot.slane %v1556_v29, %v3843_v16 }
 0x1f3   :  { %v3549_v57 = vpop.eup %3548  ;;  %v1387_v55 = vmul.f32 %v3547_v33, %v1343_v63  ;;  %v1579_v54 = vcombine.high %v1563_v42, %v1563_v42  ;;  %v1589_v48 = vrot.slane %v1570_v41, %v3843_v16  ;;  %v1593_v23 = vrot.slane %v1578_v47, %v3843_v16 }
 0x1f4   :  { %v3551_v46 = vpop.eup %3550  ;;  %v1389_v13 = vmul.f32 %v3549_v57, %v1349_v51  ;;  %v1581_v7 = vcombine.high %v1577_v10, %v1577_v10  ;;  %v1597_v52 = vrot.slane %v1580_v6, %v3843_v16  ;;  %v4503_v53 = vadd.f32 %v1585_v39, %v4429_v36 }
 0x1f5   :  { %v3553_v35 = vpop.eup %3552  ;;  %v1379_v28 = vadd.f32 %v1378_v17, %v1377_v9  ;;  %v1391_v62 = vmul.f32 %v3551_v46, %v1355_v25  ;;  %v1601_v40 = vrot.slane %v1563_v42, %v3843_v16  ;;  %v4507_v38 = vadd.f32 %v1589_v48, %v4432_v58 }
 0x1f6   :  { %v3555_v18 = vpop.eup %3554  ;;  %v1393_v4 = vmul.f32 %v3553_v35, %v1361_v12  ;;  %v1605_v26 = vrot.slane %v1577_v10, %v3843_v16  ;;  %v4511_v20 = vadd.f32 %v1593_v23, %v4435_v44  ;;  %v4514_v59 = vadd.f32 %v1597_v52, %v4438_v45 }
 0x1f7   :  { %v3557_v36 = vpop.eup %3556  ;;  %v1385_v49 = vadd.f32 %v1384_v21, %v1383_v50  ;;  %v1395_v34 = vmul.f32 %v3555_v18, %v1367_v15  ;;  %v1609_v24 = vrot.slane %v1579_v54, %v3843_v16  ;;  %v4518_v19 = vadd.f32 %v1601_v40, %v4441_v30 }
 0x1f8   :  { %v3559_v58 = vpop.eup %3558  ;;  %v4520_v1 = vmul.f32 %v3557_v36, %v1373_v11  ;;  %v1403_v27 = vmul.f32 %v4375_v8, %v1387_v55  ;;  %v1613_v44 = vrot.slane %v1581_v7, %v3843_v16  ;;  %v4525_v45 = vadd.f32 %v1605_v26, %v4444_v3 }
 0x1f9   :  { %v3561_v9 = vpop.eup %3560  ;;  %v4529_v0 = vadd.f32 %v4282_v2, %v4469_v31  ;;  %v4531_v50 = vmul.f32 %v3559_v58, %v1379_v28  ;;  %v1404_v30 = vmul.f32 %v4375_v8, %v1389_v13  ;;  %v4535_v22 = vadd.f32 %v1609_v24, %v4448_v56 }
 0x1fa   :  { %v4539_v29 = vadd.f32 %v4282_v2, %v4479_v5  ;;  %v4541_v63 = vmul.f32 %v3561_v9, %v1385_v49  ;;  %v4544_v3 = vadd.f32 %v1613_v44, %v4456_v37  ;;  %v4547_v51 = vstv %s4494_s20  ;;  %s5198_s20 = sld [smem:[#allocation2 + $0x22]] }
 0x1fb   :  { %v4550_v31 = vmul.f32 %v4375_v8, %v1391_v62  ;;  %v1630_v60 = vrot.slane %v4503_v53, 4  ;;  %v1636_v25 = vrot.slane %v4507_v38, 4  ;;  %v4555_v56 = vstv %s4497_s4  ;;  %s5203_s4 = sld [smem:[#allocation2 + $0x23]] }
 0x1fc   :  { %5392 = vst [vmem:[#allocation21_spill] sm:$0xff] %v4539_v29  ;;  %v4558_v42 = vmul.f32 %v4375_v8, %v1393_v4  ;;  %v4561_v2 = vadd.f32 %v4378_v43, %v1403_v27  ;;  %v1642_v37 = vrot.slane %v4511_v20, 4  ;;  %v1648_v5 = vrot.slane %v4514_v59, 4 }
 0x1fd   :  { %v4566_v41 = vadd.f32 %v4378_v43, %v1404_v30  ;;  %v1631_v47 = vmax.f32 %v4503_v53, %v1630_v60  ;;  %v1637_v12 = vmax.f32 %v4507_v38, %v1636_v25  ;;  %v1654_v15 = vrot.slane %v4518_v19, 4 }
 0x1fe   :  { %v4572_v17 = vmul.f32 %v4375_v8, %v1395_v34  ;;  %v1643_v10 = vmax.f32 %v4511_v20, %v1642_v37  ;;  %v1649_v33 = vmax.f32 %v4514_v59, %v1648_v5  ;;  %v1660_v11 = vrot.slane %v4525_v45, 4 }
 0x1ff   :  { %v1632_v21 = vrot.slane %v1631_v47, 2  ;;  %v1638_v6 = vrot.slane %v1637_v12, 2  ;;  %v1655_v39 = vmax.f32 %v4518_v19, %v1654_v15  ;;  %v1666_v57 = vrot.slane %v4535_v22, 4 }
 0x200   :  { %v1644_v55 = vrot.slane %v1643_v10, 2  ;;  %v1650_v54 = vrot.slane %v1649_v33, 2  ;;  %v1661_v48 = vmax.f32 %v4525_v45, %v1660_v11  ;;  %v1672_v23 = vrot.slane %v4544_v3, 4 }
 0x201   :  { %v1633_v46 = vmax.f32 %v1631_v47, %v1632_v21  ;;  %v1639_v13 = vmax.f32 %v1637_v12, %v1638_v6  ;;  %v1656_v7 = vrot.slane %v1655_v39, 2  ;;  %v1667_v52 = vmax.f32 %v4535_v22, %v1666_v57 }
 0x202   :  { %v1645_v35 = vmax.f32 %v1643_v10, %v1644_v55  ;;  %v1651_v28 = vmax.f32 %v1649_v33, %v1650_v54  ;;  %v1662_v62 = vrot.slane %v1661_v48, 2  ;;  %v1673_v40 = vmax.f32 %v4544_v3, %v1672_v23 }
 0x203   :  { %v1634_v18 = vrot.slane %v1633_v46, 1  ;;  %v1640_v4 = vrot.slane %v1639_v13, 1  ;;  %v1657_v26 = vmax.f32 %v1655_v39, %v1656_v7  ;;  %v1668_v36 = vrot.slane %v1667_v52, 2 }
 0x204   :  { %v1646_v49 = vrot.slane %v1645_v35, 1  ;;  %v1652_v34 = vrot.slane %v1651_v28, 1  ;;  %v1663_v24 = vmax.f32 %v1661_v48, %v1662_v62  ;;  %v1674_v58 = vrot.slane %v1673_v40, 2 }
 0x205   :  { %v1635_v27 = vmax.f32 %v1633_v46, %v1634_v18  ;;  %v1641_v44 = vmax.f32 %v1639_v13, %v1640_v4  ;;  %v1658_v9 = vrot.slane %v1657_v26, 1  ;;  %v1669_v30 = vmax.f32 %v1667_v52, %v1668_v36 }
 0x206   :  { %v1647_v60 = vmax.f32 %v1645_v35, %v1646_v49  ;;  %v1653_v25 = vmax.f32 %v1651_v28, %v1652_v34  ;;  %v1664_v37 = vrot.slane %v1663_v24, 1  ;;  %v1675_v5 = vmax.f32 %v1673_v40, %v1674_v58 }
 0x207   :  { %v1659_v47 = vmax.f32 %v1657_v26, %v1658_v9  ;;  %v1670_v12 = vrot.slane %v1669_v30, 1  ;;  %v1678_v15 = vsub.f32 %v4503_v53, %v1635_v27  ;;  %v1679_v10 = vsub.f32 %v4507_v38, %v1641_v44 }
 0x208   :  { %v1665_v33 = vmax.f32 %v1663_v24, %v1664_v37  ;;  %v1676_v11 = vrot.slane %v1675_v5, 1  ;;  %v1680_v21 = vsub.f32 %v4511_v20, %v1647_v60  ;;  %v1681_v6 = vsub.f32 %v4514_v59, %v1653_v25 }
 0x209   :  { %v1671_v39 = vmax.f32 %v1669_v30, %v1670_v12  ;;  %v1682_v57 = vsub.f32 %v4518_v19, %v1659_v47  ;;  %v1686_v55 = vmul.f32 1.442695, %v1678_v15  ;;  %v1688_v54 = vmul.f32 1.442695, %v1679_v10 }
 0x20a   :  { %v1677_v48 = vmax.f32 %v1675_v5, %v1676_v11  ;;  %v1683_v53 = vsub.f32 %v4525_v45, %v1665_v33  ;;  %v1690_v38 = vmul.f32 1.442695, %v1680_v21  ;;  %v1692_v23 = vmul.f32 1.442695, %v1681_v6 }
 0x20b   :  { %v1684_v46 = vsub.f32 %v4535_v22, %v1671_v39  ;;  %3562 = vpow2.f32 %v1686_v55  ;;  %v1694_v13 = vmul.f32 1.442695, %v1682_v57  ;;  %v1846_v7 = vstv %s4583_s21 }
 0x20c   :  { %v1685_v20 = vsub.f32 %v4544_v3, %v1677_v48  ;;  %3564 = vpow2.f32 %v1688_v54  ;;  %v1696_v59 = vmul.f32 1.442695, %v1683_v53  ;;  %v1847_v19 = vmul.f32 %v1846_v7, %v5387_v61 }
 0x20d   :  { %3566 = vpow2.f32 %v1690_v38  ;;  %v1698_v52 = vmul.f32 1.442695, %v1684_v46  ;;  %v1848_v35 = vstv %s4587_s23  ;;  %v1850_v45 = vstv %s4585_s22 }
 0x20e   :  { %3568 = vpow2.f32 %v1692_v23  ;;  %v1700_v28 = vmul.f32 1.442695, %v1685_v20  ;;  %v1849_v62 = vadd.f32 %v1848_v35, %v1847_v19  ;;  %v1851_v22 = vmul.f32 %v1850_v45, %v5387_v61 }
 0x20f   :  { %v1408_v3 = vmul.f32 %v4375_v8, %v4520_v1  ;;  %v1409_v40 = vmul.f32 %v4375_v8, %v4531_v50  ;;  %3570 = vpow2.f32 %v1694_v13  ;;  %v1852_v18 = vstv %s4591_s24 }
 0x210   :  { %3572 = vpow2.f32 %v1696_v59  ;;  %v1853_v4 = vadd.f32 %v1852_v18, %v1851_v22  ;;  %v1855_v26 = vcombine.high %v1849_v62, %v1849_v62  ;;  %v1862_v36 = vrot.slane %v1849_v62, %v5386_v32 }
 0x211   :  { %v1410_v49 = vmul.f32 %v4375_v8, %v4541_v63  ;;  %v4624_v1 = vadd.f32 %v4378_v43, %v4550_v31  ;;  %v4628_v50 = vadd.f32 %v4378_v43, %v4558_v42  ;;  %3574 = vpow2.f32 %v1698_v52 }
 0x212   :  { %3576 = vpow2.f32 %v1700_v28  ;;  %v1869_v34 = vrot.slane %v1855_v26, %v5386_v32  ;;  %v1870_v24 = vcombine.high %v1862_v36, %v1862_v36  ;;  %v4632_v58 = vrot.slane %v1862_v36, %v5386_v32 }
 0x213   :  { %5393 = vst [vmem:[#allocation22_spill] sm:$0xff] %v4624_v1  ;;  %5394 = vst [vmem:[#allocation23_spill] sm:$0xff] %v4628_v50  ;;  %v4636_v8 = vadd.f32 %v4378_v43, %v4572_v17  ;;  %v4639_v63 = vadd.f32 %v4378_v43, %v1408_v3  ;;  %v1953_v31 = vcombine.high %v1853_v4, %v1853_v4  ;;  %v4664_v5 = vstv %s4601_s25 }
 0x214   :  { %v4642_v42 = vrot.slane %v1853_v4, %v5386_v32  ;;  %v4645_v27 = vadd.f32 %v4378_v43, %v1409_v40  ;;  %v1871_v44 = vcombine.high %v1869_v34, %v1869_v34  ;;  %v4648_v9 = vrot.slane %v1869_v34, %v5386_v32  ;;  %5399 = vst [vmem:[#allocation28_spill] sm:$0xff] %v4664_v5 }
 0x215   :  { %5395 = vst [vmem:[#allocation24_spill] sm:$0xff] %v4636_v8  ;;  %5396 = vst [vmem:[#allocation25_spill] sm:$0xff] %v4639_v63  ;;  %v4651_v17 = vrot.slane %v1870_v24, %v5386_v32  ;;  %v3563_v30 = vpop.eup %3562  ;;  %v4654_v60 = vadd.f32 %v4378_v43, %v1410_v49  ;;  %v4657_v25 = vrot.slane %v1953_v31, %v5386_v32  ;;  %v4673_v43 = vstv %s4606_s26 }
 0x216   :  { %5397 = vst [vmem:[#allocation26_spill] sm:$0xff] %v4645_v27  ;;  %v4661_v37 = vrot.slane %v4642_v42, %v5386_v32  ;;  %v3565_v47 = vpop.eup %3564  ;;  %v1702_v12 = vrot.slane %v3563_v30, 4  ;;  %v4667_v15 = vmul.f32 %v3563_v30, %v5387_v61  ;;  %v4670_v10 = vrot.slane %v1871_v44, %v5386_v32 }
 0x217   :  { %5398 = vst [vmem:[#allocation27_spill] sm:$0xff] %v4654_v60  ;;  %v3567_v33 = vpop.eup %3566  ;;  %v1708_v11 = vrot.slane %v3565_v47, 4  ;;  %v1751_v21 = vmul.f32 %v3565_v47, %v5387_v61  ;;  %v4677_v6 = vstv %s4612_s27  ;;  %v4680_v39 = vstv %s4615_s8 }
 0x218   :  { %5400 = vst [vmem:[#allocation29_spill] sm:$0xff] %v4677_v6  ;;  %v3569_v57 = vpop.eup %3568  ;;  %v1703_v55 = vadd.f32 %v3563_v30, %v1702_v12  ;;  %v1714_v54 = vrot.slane %v3567_v33, 4  ;;  %v4683_v48 = vmul.f32 %v3567_v33, %v5387_v61  ;;  %v4686_v53 = vstv %s4618_s28 }
 0x219   :  { %5401 = vst [vmem:[#allocation30_spill] sm:$0xff] %v4686_v53  ;;  %v3571_v38 = vpop.eup %3570  ;;  %v1709_v23 = vadd.f32 %v3565_v47, %v1708_v11  ;;  %v1720_v46 = vrot.slane %v3569_v57, 4  ;;  %v1753_v13 = vmul.f32 %v3569_v57, %v5387_v61  ;;  %v4691_v7 = vmul.f32 %v4673_v43, %v4386_v14 }
 0x21a   :  { %v3573_v20 = vpop.eup %3572  ;;  %v1704_v59 = vrot.slane %v1703_v55, 2  ;;  %v1715_v19 = vadd.f32 %v3567_v33, %v1714_v54  ;;  %v1726_v52 = vrot.slane %v3571_v38, 4  ;;  %v1754_v35 = vmul.f32 %v3571_v38, %v5387_v61 }
 0x21b   :  { %5402 = vst [vmem:[#allocation31_spill] sm:$0xff] %v4691_v7  ;;  %v3575_v45 = vpop.eup %3574  ;;  %v1710_v28 = vrot.slane %v1709_v23, 2  ;;  %v1721_v62 = vadd.f32 %v3569_v57, %v1720_v46  ;;  %v1732_v22 = vrot.slane %v3573_v20, 4  ;;  %v1755_v3 = vmul.f32 %v3573_v20, %v5387_v61 }
 0x21c   :  { %v3577_v40 = vpop.eup %3576  ;;  %v1705_v18 = vadd.f32 %v1704_v59, %v1703_v55  ;;  %v1716_v4 = vrot.slane %v1715_v19, 2  ;;  %v1727_v26 = vadd.f32 %v3571_v38, %v1726_v52  ;;  %v1738_v36 = vrot.slane %v3575_v45, 4 }
 0x21d   :  { %v1711_v49 = vadd.f32 %v1710_v28, %v1709_v23  ;;  %v1722_v34 = vrot.slane %v1721_v62, 2  ;;  %v1733_v24 = vadd.f32 %v3573_v20, %v1732_v22  ;;  %v1744_v31 = vrot.slane %v3577_v40, 4 }
 0x21e   :  { %v1717_v44 = vadd.f32 %v1716_v4, %v1715_v19  ;;  %v1728_v30 = vrot.slane %v1727_v26, 2  ;;  %v1739_v47 = vadd.f32 %v3575_v45, %v1738_v36  ;;  %v1706_v33 = vrot.slane %v1705_v18, 1 }
 0x21f   :  { %v1712_v11 = vrot.slane %v1711_v49, 1  ;;  %v1745_v57 = vadd.f32 %v3577_v40, %v1744_v31  ;;  %v1723_v55 = vadd.f32 %v1722_v34, %v1721_v62  ;;  %v1734_v46 = vrot.slane %v1733_v24, 2 }
 0x220   :  { %v1758_v38 = vrot.slane %v4667_v15, 4  ;;  %v1764_v23 = vrot.slane %v1751_v21, 4  ;;  %v1718_v59 = vrot.slane %v1717_v44, 1  ;;  %v1729_v20 = vadd.f32 %v1728_v30, %v1727_v26 }
 0x221   :  { %v1740_v28 = vrot.slane %v1739_v47, 2  ;;  %v1746_v22 = vrot.slane %v1745_v57, 2  ;;  %v1756_v4 = vmul.f32 %v3575_v45, %v5387_v61  ;;  %v1902_v36 = vcombine.high %v4651_v17, %v4651_v17 }
 0x222   :  { %v1707_v62 = vadd.f32 %v1706_v33, %v1705_v18  ;;  %v1713_v34 = vadd.f32 %v1712_v11, %v1711_v49  ;;  %v1757_v31 = vmul.f32 %v3577_v40, %v5387_v61  ;;  %v1724_v30 = vrot.slane %v1723_v55, 1 }
 0x223   :  { %v1735_v54 = vadd.f32 %v1734_v46, %v1733_v24  ;;  %v1759_v19 = vadd.f32 %v1758_v38, %v4667_v15  ;;  %v1765_v12 = vadd.f32 %v1764_v23, %v1751_v21  ;;  %v1719_v52 = vadd.f32 %v1718_v59, %v1717_v44 }
 0x224   :  { %v1730_v6 = vrot.slane %v1729_v20, 1  ;;  %v1770_v5 = vrot.slane %v4683_v48, 4  ;;  %v1776_v45 = vrot.slane %v1753_v13, 4  ;;  %v1741_v14 = vadd.f32 %v1740_v28, %v1739_v47 }
 0x225   :  { %v1747_v53 = vadd.f32 %v1746_v22, %v1745_v57  ;;  %v1760_v7 = vrot.slane %v1759_v19, 2  ;;  %v1782_v18 = vrot.slane %v1754_v35, 4  ;;  %v1766_v49 = vrot.slane %v1765_v12, 2 }
 0x226   :  { %v1771_v40 = vadd.f32 %v1770_v5, %v4683_v48  ;;  %v1777_v33 = vadd.f32 %v1776_v45, %v1753_v13  ;;  %v1788_v11 = vrot.slane %v1755_v3, 4  ;;  %v1736_v26 = vrot.slane %v1735_v54, 1 }
 0x227   :  { %v1761_v60 = vadd.f32 %v1760_v7, %v1759_v19  ;;  %v1783_v24 = vadd.f32 %v1782_v18, %v1754_v35  ;;  %v1794_v46 = vrot.slane %v1756_v4, 4  ;;  %v1800_v38 = vrot.slane %v1757_v31, 4 }
 0x228   :  { %v1772_v15 = vrot.slane %v1771_v40, 2  ;;  %v1778_v21 = vrot.slane %v1777_v33, 2  ;;  %v1789_v44 = vadd.f32 %v1788_v11, %v1755_v3  ;;  %v1742_v23 = vrot.slane %v1741_v14, 1 }
 0x229   :  { %v1748_v59 = vrot.slane %v1747_v53, 1  ;;  %v1784_v27 = vrot.slane %v1783_v24, 2  ;;  %v1795_v47 = vadd.f32 %v1794_v46, %v1756_v4  ;;  %v1762_v57 = vrot.slane %v1761_v60, 1 }
 0x22a   :  { %v1767_v28 = vadd.f32 %v1766_v49, %v1765_v12  ;;  %v1790_v22 = vrot.slane %v1789_v44, 2  ;;  %v1801_v29 = vadd.f32 %v1800_v38, %v1757_v31  ;;  %v1725_v63 = vadd.f32 %v1724_v30, %v1723_v55 }
 0x22b   :  { %v1773_v5 = vadd.f32 %v1772_v15, %v1771_v40  ;;  %v1779_v48 = vadd.f32 %v1778_v21, %v1777_v33  ;;  %v1796_v13 = vrot.slane %v1795_v47, 2  ;;  %v1731_v45 = vadd.f32 %v1730_v6, %v1729_v20 }
 0x22c   :  { %v1737_v7 = vadd.f32 %v1736_v26, %v1735_v54  ;;  %v1785_v35 = vadd.f32 %v1784_v27, %v1783_v24  ;;  %v1791_v19 = vadd.f32 %v1790_v22, %v1789_v44  ;;  %v1743_v18 = vadd.f32 %v1742_v23, %v1741_v14 }
 0x22d   :  { %v1749_v8 = vadd.f32 %v1748_v59, %v1747_v53  ;;  %v1802_v3 = vrot.slane %v1801_v29, 2  ;;  %3578 = vrcp.f32 %v1707_v62  ;;  %v1763_v11 = vadd.f32 %v1762_v57, %v1761_v60 }
 0x22e   :  { %v1768_v50 = vrot.slane %v1767_v28, 1  ;;  %v1797_v1 = vadd.f32 %v1796_v13, %v1795_v47  ;;  %v1903_v12 = vcombine.high %v4670_v10, %v4670_v10  ;;  %v1774_v4 = vrot.slane %v1773_v5, 1 }
 0x22f   :  { %v1780_v31 = vrot.slane %v1779_v48, 1  ;;  %3580 = vrcp.f32 %v1713_v34  ;;  %v5403_v6 = vcombine.high %v4632_v58, %v4632_v58  ;;  %v1786_v27 = vrot.slane %v1785_v35, 1 }
 0x230   :  { %v1792_v55 = vrot.slane %v1791_v19, 1  ;;  %3582 = vrcp.f32 %v1719_v52  ;;  %v1919_v14 = vrot.slane %v1902_v36, %v3843_v16  ;;  %v1803_v53 = vadd.f32 %v1802_v3, %v1801_v29 }
 0x231   :  { %v1915_v54 = vrot.slane %v5403_v6, %v3843_v16  ;;  %3584 = vrcp.f32 %v1725_v63  ;;  %v1923_v60 = vrot.slane %v4648_v9, %v3843_v16  ;;  %v1927_v20 = vrot.slane %v4670_v10, %v3843_v16 }
 0x232   :  { %v1798_v62 = vrot.slane %v1797_v1, 1  ;;  %3586 = vrcp.f32 %v1731_v45  ;;  %v5404_v34 = vcombine.high %v4648_v9, %v4648_v9  ;;  %v1935_v30 = vrot.slane %v1903_v12, %v3843_v16 }
 0x233   :  { %3588 = vrcp.f32 %v1737_v7  ;;  %v5405_v29 = vrot.slane %v4632_v58, %v3843_v16  ;;  %v5406_v52 = vrot.slane %v4651_v17, %v3843_v16  ;;  %v1946_v36 = vmul.f32 %v1915_v54, %v5387_v61 }
 0x234   :  { %v1931_v26 = vrot.slane %v5404_v34, %v3843_v16  ;;  %3590 = vrcp.f32 %v1743_v18  ;;  %v1947_v49 = vmul.f32 %v1919_v14, %v5387_v61  ;;  %v1948_v9 = vmul.f32 %v1923_v60, %v5387_v61 }
 0x235   :  { %v1944_v63 = vmul.f32 %v5405_v29, %v5387_v61  ;;  %v1945_v10 = vmul.f32 %v5406_v52, %v5387_v61  ;;  %v1949_v40 = vmul.f32 %v1927_v20, %v5387_v61  ;;  %3592 = vrcp.f32 %v1749_v8 }
 0x236   :  { %v1950_v33 = vmul.f32 %v1931_v26, %v5387_v61  ;;  %v1951_v58 = vmul.f32 %v1935_v30, %v5387_v61  ;;  %v1969_v24 = vcombine.high %v4657_v25, %v4657_v25  ;;  %v1769_v46 = vadd.f32 %v1768_v50, %v1767_v28 }
 0x237   :  { %v1983_v17 = vrot.slane %v4657_v25, %v5386_v32  ;;  %v5407_v15 = vcombine.high %v4642_v42, %v4642_v42  ;;  %v1998_v44 = vcombine.high %v4661_v37, %v4661_v37  ;;  %v3579_v8 = vpop.eup %3578  ;;  %v1775_v38 = vadd.f32 %v1774_v4, %v1773_v5 }
 0x238   :  { %v1781_v23 = vadd.f32 %v1780_v31, %v1779_v48  ;;  %v1787_v59 = vadd.f32 %v1786_v27, %v1785_v35  ;;  %v1997_v47 = vrot.slane %v1969_v24, %v5386_v32  ;;  %v1793_v57 = vadd.f32 %v1792_v55, %v1791_v19  ;;  %v5408_v24 = vld [vmem:[#allocation18_spill] sm:$0xff] }
 0x239   :  { %v1990_v21 = vrot.slane %v5407_v15, %v5386_v32  ;;  %v1804_v22 = vrot.slane %v1803_v53, 1  ;;  %v1807_v50 = vmul.f32 %v3579_v8, %v1763_v11  ;;  %v3581_v13 = vpop.eup %3580  ;;  %v1799_v25 = vadd.f32 %v1798_v62, %v1797_v1  ;;  %v5412_v8 = vld [vmem:[#allocation19_spill] sm:$0xff] }
 0x23a   :  { %v1999_v45 = vcombine.high %v1983_v17, %v1983_v17  ;;  %v2005_v42 = vrot.slane %v4661_v37, %v3843_v16  ;;  %v3583_v18 = vpop.eup %3582  ;;  %v1809_v3 = vmul.f32 %v3581_v13, %v1769_v46  ;;  %v2001_v12 = vcombine.high %v1997_v47, %v1997_v47  ;;  %v5409_v46 = vld [vmem:[#allocation15_spill] sm:$0xff] }
 0x23b   :  { %v2000_v28 = vcombine.high %v1990_v21, %v1990_v21  ;;  %v2009_v7 = vrot.slane %v1990_v21, %v3843_v16  ;;  %v2013_v5 = vrot.slane %v1998_v44, %v3843_v16  ;;  %v2021_v48 = vrot.slane %v1983_v17, %v3843_v16  ;;  %v3585_v32 = vpop.eup %3584 }
 0x23c   :  { %v1811_v35 = vmul.f32 %v3583_v18, %v1775_v38  ;;  %v4760_v11 = vadd.f32 %v2005_v42, %v1944_v63  ;;  %v3587_v4 = vpop.eup %3586  ;;  %v1813_v31 = vmul.f32 %v3585_v32, %v1781_v23  ;;  %v1823_v37 = vmul.f32 %v4547_v51, %v1807_v50 }
 0x23d   :  { %v2017_v19 = vrot.slane %v2000_v28, %v3843_v16  ;;  %v4762_v1 = vadd.f32 %v2009_v7, %v1945_v10  ;;  %v2025_v6 = vrot.slane %v1997_v47, %v3843_v16  ;;  %v4766_v54 = vadd.f32 %v2013_v5, %v1946_v36  ;;  %v3589_v27 = vpop.eup %3588 }
 0x23e   :  { %v1815_v55 = vmul.f32 %v3587_v4, %v1787_v59  ;;  %v2029_v14 = vrot.slane %v1999_v45, %v3843_v16  ;;  %v4771_v20 = vadd.f32 %v2021_v48, %v1948_v9  ;;  %v3591_v62 = vpop.eup %3590  ;;  %v1805_v34 = vadd.f32 %v1804_v22, %v1803_v53 }
 0x23f   :  { %v4769_v60 = vadd.f32 %v2017_v19, %v1947_v49  ;;  %v4773_v26 = vmul.f32 %v3589_v27, %v1793_v57  ;;  %v2033_v30 = vrot.slane %v2001_v12, %v3843_v16  ;;  %v4776_v29 = vadd.f32 %v2025_v6, %v1949_v40  ;;  %v3593_v63 = vpop.eup %3592  ;;  %v5410_v40 = vld [vmem:[#allocation16_spill] sm:$0xff] }
 0x240   :  { %v4778_v52 = vmul.f32 %v3591_v62, %v1799_v25  ;;  %v1824_v10 = vmul.f32 %v4547_v51, %v1809_v3  ;;  %v4781_v36 = vadd.f32 %v2029_v14, %v1950_v33  ;;  %v4785_v49 = vmul.f32 %v4673_v43, %v5408_v24 }
 0x241   :  { %v4787_v9 = vmul.f32 %v3593_v63, %v1805_v34  ;;  %v4789_v53 = vadd.f32 %v2033_v30, %v1951_v58  ;;  %v4793_v17 = vmul.f32 %v4673_v43, %v5409_v46  ;;  %v4797_v15 = vmul.f32 %v4673_v43, %v5410_v40 }
 0x242   :  { %v4800_v21 = vadd.f32 %v4555_v56, %v1823_v37  ;;  %v2050_v33 = vrot.slane %v4760_v11, 4  ;;  %v2056_v44 = vrot.slane %v4762_v1, 4  ;;  %v4806_v38 = vmul.f32 %v4673_v43, %v5412_v8 }
 0x243   :  { %v1825_v58 = vmul.f32 %v4547_v51, %v1811_v35  ;;  %v4810_v23 = vmul.f32 %v4547_v51, %v1813_v31  ;;  %v2062_v59 = vrot.slane %v4766_v54, 4  ;;  %v2068_v47 = vrot.slane %v4769_v60, 4 }
 0x244   :  { %5411 = vst [vmem:[#allocation18_spill] sm:$0xff] %v4800_v21  ;;  %v4815_v57 = vadd.f32 %v4555_v56, %v1824_v10  ;;  %v2051_v22 = vmax.f32 %v4760_v11, %v2050_v33  ;;  %v2057_v50 = vmax.f32 %v4762_v1, %v2056_v44  ;;  %v2074_v28 = vrot.slane %v4771_v20, 4 }
 0x245   :  { %v4821_v13 = vmul.f32 %v4547_v51, %v1815_v55  ;;  %v2063_v25 = vmax.f32 %v4766_v54, %v2062_v59  ;;  %v2069_v45 = vmax.f32 %v4769_v60, %v2068_v47  ;;  %v2080_v42 = vrot.slane %v4776_v29, 4 }
 0x246   :  { %5413 = vst [vmem:[#allocation15_spill] sm:$0xff] %v4815_v57  ;;  %v2052_v7 = vrot.slane %v2051_v22, 2  ;;  %v2058_v18 = vrot.slane %v2057_v50, 2  ;;  %v2075_v3 = vmax.f32 %v4771_v20, %v2074_v28  ;;  %v2086_v12 = vrot.slane %v4781_v36, 4 }
 0x247   :  { %v2064_v5 = vrot.slane %v2063_v25, 2  ;;  %v2070_v48 = vrot.slane %v2069_v45, 2  ;;  %v2081_v32 = vmax.f32 %v4776_v29, %v2080_v42  ;;  %v2092_v35 = vrot.slane %v4789_v53, 4 }
 0x248   :  { %v2053_v19 = vmax.f32 %v2051_v22, %v2052_v7  ;;  %v2059_v4 = vmax.f32 %v2057_v50, %v2058_v18  ;;  %v2076_v31 = vrot.slane %v2075_v3, 2  ;;  %v2087_v37 = vmax.f32 %v4781_v36, %v2086_v12 }
 0x249   :  { %v2065_v6 = vmax.f32 %v2063_v25, %v2064_v5  ;;  %v2071_v27 = vmax.f32 %v2069_v45, %v2070_v48  ;;  %v2082_v55 = vrot.slane %v2081_v32, 2  ;;  %v2093_v14 = vmax.f32 %v4789_v53, %v2092_v35 }
 0x24a   :  { %v2054_v62 = vrot.slane %v2053_v19, 1  ;;  %v2060_v34 = vrot.slane %v2059_v4, 1  ;;  %v2077_v30 = vmax.f32 %v2075_v3, %v2076_v31  ;;  %v2088_v63 = vrot.slane %v2087_v37, 2 }
 0x24b   :  { %v2066_v10 = vrot.slane %v2065_v6, 1  ;;  %v2072_v33 = vrot.slane %v2071_v27, 1  ;;  %v2083_v44 = vmax.f32 %v2081_v32, %v2082_v55  ;;  %v2094_v59 = vrot.slane %v2093_v14, 2 }
 0x24c   :  { %v2055_v47 = vmax.f32 %v2053_v19, %v2054_v62  ;;  %v2061_v28 = vmax.f32 %v2059_v4, %v2060_v34  ;;  %v2078_v22 = vrot.slane %v2077_v30, 1  ;;  %v2089_v50 = vmax.f32 %v2087_v37, %v2088_v63 }
 0x24d   :  { %v2067_v42 = vmax.f32 %v2065_v6, %v2066_v10  ;;  %v2073_v7 = vmax.f32 %v2071_v27, %v2072_v33  ;;  %v2084_v18 = vrot.slane %v2083_v44, 1  ;;  %v2095_v25 = vmax.f32 %v2093_v14, %v2094_v59  ;;  %v5416_v33 = vld [vmem:[#allocation22_spill] sm:$0xff]  ;;  %v5418_v59 = vld [vmem:[#allocation24_spill] sm:$0xff] }
 0x24e   :  { %v2079_v45 = vmax.f32 %v2077_v30, %v2078_v22  ;;  %v2090_v12 = vrot.slane %v2089_v50, 1  ;;  %v2098_v5 = vsub.f32 %v4760_v11, %v2055_v47  ;;  %v2099_v48 = vsub.f32 %v4762_v1, %v2061_v28  ;;  %v5419_v28 = vld [vmem:[#allocation25_spill] sm:$0xff] }
 0x24f   :  { %v2085_v3 = vmax.f32 %v2083_v44, %v2084_v18  ;;  %v2096_v35 = vrot.slane %v2095_v25, 1  ;;  %v2100_v31 = vsub.f32 %v4766_v54, %v2067_v42  ;;  %v2101_v32 = vsub.f32 %v4769_v60, %v2073_v7  ;;  %v5421_v7 = vld [vmem:[#allocation26_spill] sm:$0xff] }
 0x250   :  { %v2091_v19 = vmax.f32 %v2089_v50, %v2090_v12  ;;  %v2102_v4 = vsub.f32 %v4771_v20, %v2079_v45  ;;  %v2106_v37 = vmul.f32 1.442695, %v2098_v5  ;;  %v2108_v6 = vmul.f32 1.442695, %v2099_v48  ;;  %v5420_v50 = vld [vmem:[#allocation21_spill] sm:$0xff] }
 0x251   :  { %v2097_v27 = vmax.f32 %v2095_v25, %v2096_v35  ;;  %v2103_v55 = vsub.f32 %v4776_v29, %v2085_v3  ;;  %v2110_v14 = vmul.f32 1.442695, %v2100_v31  ;;  %v2112_v62 = vmul.f32 1.442695, %v2101_v32  ;;  %v5422_v25 = vld [vmem:[#allocation27_spill] sm:$0xff] }
 0x252   :  { %v4839_v11 = vadd.f32 %v4555_v56, %v1825_v58  ;;  %v2104_v1 = vsub.f32 %v4781_v36, %v2091_v19  ;;  %3594 = vpow2.f32 %v2106_v37  ;;  %v2114_v34 = vmul.f32 1.442695, %v2102_v4  ;;  %v5415_v36 = vld [vmem:[#allocation20_spill] sm:$0xff]  ;;  %v5428_v35 = vld [vmem:[#allocation31_spill] sm:$0xff] }
 0x253   :  { %v1828_v54 = vmul.f32 %v4547_v51, %v4773_v26  ;;  %v2105_v60 = vsub.f32 %v4789_v53, %v2097_v27  ;;  %3596 = vpow2.f32 %v2108_v6  ;;  %v2116_v20 = vmul.f32 1.442695, %v2103_v55  ;;  %v5429_v27 = vld [vmem:[#allocation30_spill] sm:$0xff] }
 0x254   :  { %5414 = vst [vmem:[#allocation16_spill] sm:$0xff] %v4839_v11  ;;  %v1829_v30 = vmul.f32 %v4547_v51, %v4778_v52  ;;  %v1830_v29 = vmul.f32 %v4547_v51, %v4787_v9  ;;  %3598 = vpow2.f32 %v2110_v14  ;;  %v2118_v58 = vmul.f32 1.442695, %v2104_v1  ;;  %v5417_v9 = vld [vmem:[#allocation23_spill] sm:$0xff] }
 0x255   :  { %3600 = vpow2.f32 %v2112_v62  ;;  %v2120_v63 = vmul.f32 1.442695, %v2105_v60  ;;  %v2341_v10 = vmul.f32 %v4673_v43, %v5415_v36  ;;  %v2342_v26 = vmul.f32 %v4673_v43, %v4529_v0 }
 0x256   :  { %3602 = vpow2.f32 %v2114_v34  ;;  %v2346_v53 = vmul.f32 %v4680_v39, %v4561_v2  ;;  %v2347_v52 = vmul.f32 %v4680_v39, %v4566_v41  ;;  %v2348_v51 = vmul.f32 %v4680_v39, %v5416_v33 }
 0x257   :  { %3604 = vpow2.f32 %v2116_v20  ;;  %v2349_v44 = vmul.f32 %v4680_v39, %v5417_v9  ;;  %v2350_v47 = vmul.f32 %v4680_v39, %v5418_v59  ;;  %v2351_v22 = vmul.f32 %v4680_v39, %v5419_v28 }
 0x258   :  { %3606 = vpow2.f32 %v2118_v58  ;;  %v2343_v42 = vmul.f32 %v4673_v43, %v5420_v50  ;;  %v2352_v18 = vmul.f32 %v4680_v39, %v5421_v7  ;;  %v2353_v45 = vmul.f32 %v4680_v39, %v5422_v25 }
 0x259   :  { %v4873_v12 = vadd.f32 %v4555_v56, %v4810_v23  ;;  %v4877_v5 = vadd.f32 %v4555_v56, %v4821_v13  ;;  %v4880_v48 = vadd.f32 %v4555_v56, %v1828_v54  ;;  %3608 = vpow2.f32 %v2120_v63 }
 0x25a   :  { %v4883_v43 = vadd.f32 %v4555_v56, %v1829_v30  ;;  %v4886_v3 = vadd.f32 %v4555_v56, %v1830_v29  ;;  %v2354_v39 = vadd.f32 %v2346_v53, %v5428_v35  ;;  %v2355_v31 = vadd.f32 %v2347_v52, %v4785_v49 }
 0x25b   :  { %5423 = vst [vmem:[#allocation19_spill] sm:$0xff] %v4873_v12  ;;  %5424 = vst [vmem:[#allocation20_spill] sm:$0xff] %v4877_v5  ;;  %v2356_v23 = vadd.f32 %v2348_v51, %v4793_v17  ;;  %v2357_v32 = vadd.f32 %v2349_v44, %v4797_v15  ;;  %v2358_v13 = vadd.f32 %v2350_v47, %v4806_v38 }
 0x25c   :  { %5425 = vst [vmem:[#allocation22_spill] sm:$0xff] %v4880_v48  ;;  %5426 = vst [vmem:[#allocation23_spill] sm:$0xff] %v4883_v43  ;;  %v4893_v19 = vadd.f32 %v2351_v22, %v2341_v10  ;;  %v3595_v4 = vpop.eup %3594  ;;  %v2360_v37 = vadd.f32 %v2352_v18, %v2342_v26  ;;  %v4895_v6 = vadd.f32 %v2353_v45, %v2343_v42 }
 0x25d   :  { %5427 = vst [vmem:[#allocation24_spill] sm:$0xff] %v4886_v3  ;;  %v2364_v56 = vmul.f32 %v5429_v27, %v4800_v21  ;;  %v2365_v55 = vmul.f32 %v5429_v27, %v4815_v57  ;;  %v3597_v14 = vpop.eup %3596  ;;  %v2122_v49 = vrot.slane %v3595_v4, 4  ;;  %v4902_v17 = vmul.f32 %v3595_v4, %v5387_v61 }
 0x25e   :  { %v2366_v15 = vmul.f32 %v5429_v27, %v4839_v11  ;;  %v2367_v38 = vmul.f32 %v5429_v27, %v4873_v12  ;;  %v3599_v62 = vpop.eup %3598  ;;  %v2128_v1 = vrot.slane %v3597_v14, 4  ;;  %v2171_v34 = vmul.f32 %v3597_v14, %v5387_v61 }
 0x25f   :  { %v2368_v54 = vmul.f32 %v5429_v27, %v4877_v5  ;;  %v2369_v60 = vmul.f32 %v5429_v27, %v4880_v48  ;;  %v3601_v20 = vpop.eup %3600  ;;  %v2123_v30 = vadd.f32 %v3595_v4, %v2122_v49  ;;  %v2134_v29 = vrot.slane %v3599_v62, 4 }
 0x260   :  { %v4914_v58 = vmul.f32 %v3599_v62, %v5387_v61  ;;  %v2370_v63 = vmul.f32 %v5429_v27, %v4883_v43  ;;  %v3603_v10 = vpop.eup %3602  ;;  %v2129_v26 = vadd.f32 %v3597_v14, %v2128_v1  ;;  %v2140_v53 = vrot.slane %v3601_v20, 4 }
 0x261   :  { %v2173_v52 = vmul.f32 %v3601_v20, %v5387_v61  ;;  %v4921_v51 = vmul.f32 %v5429_v27, %v4886_v3  ;;  %v3605_v44 = vpop.eup %3604  ;;  %v2124_v47 = vrot.slane %v2123_v30, 2  ;;  %v2135_v22 = vadd.f32 %v3599_v62, %v2134_v29 }
 0x262   :  { %v2146_v42 = vrot.slane %v3603_v10, 4  ;;  %v2174_v18 = vmul.f32 %v3603_v10, %v5387_v61  ;;  %v3607_v45 = vpop.eup %3606  ;;  %v2130_v35 = vrot.slane %v2129_v26, 2  ;;  %v2141_v4 = vadd.f32 %v3601_v20, %v2140_v53 }
 0x263   :  { %v2152_v49 = vrot.slane %v3605_v44, 4  ;;  %v2175_v16 = vmul.f32 %v3605_v44, %v5387_v61  ;;  %v3609_v14 = vpop.eup %3608  ;;  %v2125_v1 = vadd.f32 %v2124_v47, %v2123_v30  ;;  %v2136_v43 = vrot.slane %v2135_v22, 2 }
 0x264   :  { %v2147_v48 = vadd.f32 %v3603_v10, %v2146_v42  ;;  %v2158_v5 = vrot.slane %v3607_v45, 4  ;;  %v2131_v12 = vadd.f32 %v2130_v35, %v2129_v26  ;;  %v2142_v27 = vrot.slane %v2141_v4, 2 }
 0x265   :  { %v2153_v3 = vadd.f32 %v3605_v44, %v2152_v49  ;;  %v2164_v11 = vrot.slane %v3609_v14, 4  ;;  %v2137_v57 = vadd.f32 %v2136_v43, %v2135_v22  ;;  %v4925_v29 = vadd.f32 %v2364_v56, %v2354_v39 }
 0x266   :  { %v2148_v62 = vrot.slane %v2147_v48, 2  ;;  %v4927_v21 = vadd.f32 %v2365_v55, %v2355_v31  ;;  %v2126_v25 = vrot.slane %v2125_v1, 1  ;;  %v2132_v20 = vrot.slane %v2131_v12, 1 }
 0x267   :  { %v2159_v53 = vadd.f32 %v3607_v45, %v2158_v5  ;;  %v4929_v7 = vadd.f32 %v2366_v15, %v2356_v23  ;;  %v2143_v28 = vadd.f32 %v2142_v27, %v2141_v4  ;;  %v2165_v30 = vadd.f32 %v3609_v14, %v2164_v11 }
 0x268   :  { %v2178_v10 = vrot.slane %v4902_v17, 4  ;;  %v2184_v47 = vrot.slane %v2171_v34, 4  ;;  %v2138_v26 = vrot.slane %v2137_v57, 1  ;;  %v2154_v42 = vrot.slane %v2153_v3, 2 }
 0x269   :  { %v4932_v44 = vadd.f32 %v2367_v38, %v2357_v32  ;;  %v4934_v43 = vadd.f32 %v2368_v54, %v2358_v13  ;;  %v2149_v39 = vadd.f32 %v2148_v62, %v2147_v48  ;;  %v2176_v31 = vmul.f32 %v3607_v45, %v5387_v61 }
 0x26a   :  { %v4938_v56 = vadd.f32 %v2369_v60, %v4893_v19  ;;  %v4940_v5 = vadd.f32 %v2370_v63, %v2360_v37  ;;  %v2127_v23 = vadd.f32 %v2126_v25, %v2125_v1  ;;  %v2133_v55 = vadd.f32 %v2132_v20, %v2131_v12 }
 0x26b   :  { %v2160_v11 = vrot.slane %v2159_v53, 2  ;;  %v2177_v15 = vmul.f32 %v3609_v14, %v5387_v61  ;;  %v2144_v22 = vrot.slane %v2143_v28, 1  ;;  %v2166_v35 = vrot.slane %v2165_v30, 2 }
 0x26c   :  { %5430 = vst [vmem:[#allocation21_spill] sm:$0xff] %v4940_v5  ;;  %v2179_v32 = vadd.f32 %v2178_v10, %v4902_v17  ;;  %v2185_v38 = vadd.f32 %v2184_v47, %v2171_v34  ;;  %v2139_v13 = vadd.f32 %v2138_v26, %v2137_v57  ;;  %v2155_v54 = vadd.f32 %v2154_v42, %v2153_v3 }
 0x26d   :  { %v2190_v48 = vrot.slane %v4914_v58, 4  ;;  %v2196_v45 = vrot.slane %v2173_v52, 4  ;;  %v2150_v4 = vrot.slane %v2149_v39, 1  ;;  %v2202_v37 = vrot.slane %v2174_v18, 4 }
 0x26e   :  { %v2180_v19 = vrot.slane %v2179_v32, 2  ;;  %v2186_v60 = vrot.slane %v2185_v38, 2  ;;  %v2161_v63 = vadd.f32 %v2160_v11, %v2159_v53  ;;  %v2208_v49 = vrot.slane %v2175_v16, 4 }
 0x26f   :  { %v2191_v25 = vadd.f32 %v2190_v48, %v4914_v58  ;;  %v2197_v12 = vadd.f32 %v2196_v45, %v2173_v52  ;;  %v2145_v61 = vadd.f32 %v2144_v22, %v2143_v28  ;;  %v2167_v14 = vadd.f32 %v2166_v35, %v2165_v30 }
 0x270   :  { %v2203_v1 = vadd.f32 %v2202_v37, %v2174_v18  ;;  %v2214_v27 = vrot.slane %v2176_v31, 4  ;;  %v2209_v57 = vadd.f32 %v2208_v49, %v2175_v16  ;;  %v2220_v3 = vrot.slane %v2177_v15, 4 }
 0x271   :  { %v2192_v17 = vrot.slane %v2191_v25, 2  ;;  %v2198_v34 = vrot.slane %v2197_v12, 2  ;;  %v2181_v62 = vadd.f32 %v2180_v19, %v2179_v32  ;;  %v2187_v20 = vadd.f32 %v2186_v60, %v2185_v38 }
 0x272   :  { %v2204_v10 = vrot.slane %v2203_v1, 2  ;;  %v2215_v47 = vadd.f32 %v2214_v27, %v2176_v31  ;;  %v2210_v5 = vrot.slane %v2209_v57, 2  ;;  %v2221_v53 = vadd.f32 %v2220_v3, %v2177_v15 }
 0x273   :  { %v2193_v26 = vadd.f32 %v2192_v17, %v2191_v25  ;;  %v2199_v42 = vadd.f32 %v2198_v34, %v2197_v12  ;;  %v2156_v58 = vrot.slane %v2155_v54, 1  ;;  %v2162_v52 = vrot.slane %v2161_v63, 1 }
 0x274   :  { %v2205_v28 = vadd.f32 %v2204_v10, %v2203_v1  ;;  %v2216_v30 = vrot.slane %v2215_v47, 2  ;;  %v2151_v18 = vadd.f32 %v2150_v4, %v2149_v39  ;;  %v2168_v11 = vrot.slane %v2167_v14, 1 }
 0x275   :  { %v2211_v16 = vadd.f32 %v2210_v5, %v2209_v57  ;;  %v2222_v22 = vrot.slane %v2221_v53, 2  ;;  %v2182_v35 = vrot.slane %v2181_v62, 1  ;;  %v2188_v31 = vrot.slane %v2187_v20, 1 }
 0x276   :  { %v2217_v32 = vadd.f32 %v2216_v30, %v2215_v47  ;;  %3610 = vrcp.f32 %v2127_v23  ;;  %v2194_v38 = vrot.slane %v2193_v26, 1  ;;  %v2200_v15 = vrot.slane %v2199_v42, 1 }
 0x277   :  { %v2206_v48 = vrot.slane %v2205_v28, 1  ;;  %v2223_v45 = vadd.f32 %v2222_v22, %v2221_v53  ;;  %v2157_v19 = vadd.f32 %v2156_v58, %v2155_v54  ;;  %v2163_v60 = vadd.f32 %v2162_v52, %v2161_v63  ;;  %v5432_v22 = vld [vmem:[#allocation25_spill] sm:$0xff] }
 0x278   :  { %v2212_v37 = vrot.slane %v2211_v16, 1  ;;  %3612 = vrcp.f32 %v2133_v55  ;;  %v2169_v39 = vadd.f32 %v2168_v11, %v2167_v14  ;;  %v2218_v5 = vrot.slane %v2217_v32, 1 }
 0x279   :  { %v2224_v4 = vrot.slane %v2223_v45, 1  ;;  %3614 = vrcp.f32 %v2139_v13  ;;  %v2183_v23 = vadd.f32 %v2182_v35, %v2181_v62  ;;  %v2189_v25 = vadd.f32 %v2188_v31, %v2187_v20  ;;  %v5433_v31 = vld [vmem:[#allocation26_spill] sm:$0xff] }
 0x27a   :  { %3616 = vrcp.f32 %v2145_v61  ;;  %v4960_v54 = vadd.f32 %v4921_v51, %v4895_v6  ;;  %v2195_v63 = vadd.f32 %v2194_v38, %v2193_v26  ;;  %v2201_v55 = vadd.f32 %v2200_v15, %v2199_v42  ;;  %v5431_v6 = vld [vmem:[#allocation17_spill] sm:$0xff] }
 0x27b   :  { %v2207_v12 = vadd.f32 %v2206_v48, %v2205_v28  ;;  %3618 = vrcp.f32 %v2151_v18  ;;  %v2213_v49 = vadd.f32 %v2212_v37, %v2211_v16  ;;  %v4963_v1 = vstv %s4946_s29  ;;  %v5434_v48 = vld [vmem:[#allocation28_spill] sm:$0xff] }
 0x27c   :  { %3620 = vrcp.f32 %v2157_v19  ;;  %v4966_v14 = vstv %s4948_s30  ;;  %v2219_v13 = vadd.f32 %v2218_v5, %v2217_v32  ;;  %v2225_v27 = vadd.f32 %v2224_v4, %v2223_v45  ;;  %v5435_v19 = vld [vmem:[#allocation27_spill] sm:$0xff] }
 0x27d   :  { %3622 = vrcp.f32 %v2163_v60  ;;  %v2483_v61 = vstv %s4950_s13  ;;  %v2493_v26 = vstv %s4952_s1  ;;  %v4979_v42 = vstv %s4954_s14 }
 0x27e   :  { %3624 = vrcp.f32 %v2169_v39  ;;  %v2484_v51 = vmul.f32 %v2483_v61, %v5431_v6  ;;  %v2485_v17 = vmul.f32 %v2483_v61, %v5408_v24  ;;  %v2486_v34 = vmul.f32 %v2483_v61, %v5409_v46 }
 0x27f   :  { %v2487_v57 = vmul.f32 %v2483_v61, %v5410_v40  ;;  %v2488_v3 = vmul.f32 %v2483_v61, %v5412_v8  ;;  %v2489_v62 = vmul.f32 %v2483_v61, %v5415_v36  ;;  %v2490_v20 = vmul.f32 %v2483_v61, %v4529_v0 }
 0x280   :  { %v3611_v10 = vpop.eup %3610  ;;  %v2491_v47 = vmul.f32 %v2483_v61, %v5420_v50  ;;  %v4982_v53 = vstv %s4956_s5  ;;  %v2494_v52 = vmul.f32 %v2493_v26, %v4561_v2  ;;  %v2495_v28 = vmul.f32 %v2493_v26, %v4566_v41  ;;  %s3704_s5 = smov [#allocation7]  }
 0x281   :  { %v2227_v58 = vmul.f32 %v3611_v10, %v2183_v23  ;;  %v2496_v30 = vmul.f32 %v2493_v26, %v5416_v33  ;;  %v2497_v11 = vmul.f32 %v2493_v26, %v5417_v9  ;;  %v2498_v16 = vmul.f32 %v2493_v26, %v5418_v59 }
 0x282   :  { %v3613_v18 = vpop.eup %3612  ;;  %v2499_v35 = vmul.f32 %v2493_v26, %v5432_v22  ;;  %v2500_v32 = vmul.f32 %v2493_v26, %v5433_v31  ;;  %v2501_v60 = vmul.f32 %v2493_v26, %v5435_v19  ;;  %v4993_v37 = vadd.f32 %v2494_v52, %v2484_v51 }
 0x283   :  { %v3615_v38 = vpop.eup %3614  ;;  %v2229_v15 = vmul.f32 %v3613_v18, %v2189_v25  ;;  %v2243_v45 = vmul.f32 %v5434_v48, %v2227_v58  ;;  %v4995_v4 = vadd.f32 %v2495_v28, %v2485_v17  ;;  %v4997_v23 = vadd.f32 %v2496_v30, %v2486_v34  ;;  %v5436_v25 = vld [vmem:[#allocation29_spill] sm:$0xff] }
 0x284   :  { %v3617_v39 = vpop.eup %3616  ;;  %v2231_v5 = vmul.f32 %v3615_v38, %v2195_v63  ;;  %v4999_v61 = vadd.f32 %v2497_v11, %v2487_v57  ;;  %v5005_v26 = vadd.f32 %v2498_v16, %v2488_v3  ;;  %v5008_v17 = vadd.f32 %v2499_v35, %v2489_v62 }
 0x285   :  { %v3619_v10 = vpop.eup %3618  ;;  %v2233_v22 = vmul.f32 %v3617_v39, %v2201_v55  ;;  %v2244_v31 = vmul.f32 %v5434_v48, %v2229_v15  ;;  %v5003_v18 = vadd.f32 %v5436_v25, %v2243_v45  ;;  %v5010_v34 = vadd.f32 %v2500_v32, %v2490_v20 }
 0x286   :  { %v3621_v51 = vpop.eup %3620  ;;  %v2235_v58 = vmul.f32 %v3619_v10, %v2207_v12  ;;  %v2245_v63 = vmul.f32 %v5434_v48, %v2231_v5  ;;  %v2509_v20 = vadd.f32 %v2501_v60, %v2491_v47 }
 0x287   :  { %v3623_v57 = vpop.eup %3622  ;;  %v2237_v52 = vmul.f32 %v3621_v51, %v2213_v49  ;;  %v2246_v55 = vmul.f32 %v5434_v48, %v2233_v22  ;;  %v5014_v28 = vadd.f32 %v5436_v25, %v2244_v31  ;;  %v2382_v3 = vmul.f32 %v4963_v1, %v5003_v18 }
 0x288   :  { %v3625_v30 = vpop.eup %3624  ;;  %v2239_v12 = vmul.f32 %v3623_v57, %v2219_v13  ;;  %v2247_v11 = vmul.f32 %v5434_v48, %v2235_v58  ;;  %v5020_v62 = vadd.f32 %v5436_v25, %v2245_v63 }
 0x289   :  { %v2241_v16 = vmul.f32 %v3625_v30, %v2225_v27  ;;  %v2248_v49 = vmul.f32 %v5434_v48, %v2237_v52  ;;  %v5024_v22 = vadd.f32 %v5436_v25, %v2246_v55  ;;  %v2383_v35 = vmul.f32 %v4963_v1, %v5014_v28  ;;  %v5438_v30 = vld [vmem:[#allocation21_spill] sm:$0xff] }
 0x28a   :  { %v2249_v31 = vmul.f32 %v5434_v48, %v2239_v12  ;;  %v5030_v13 = vadd.f32 %v5436_v25, %v2247_v11  ;;  %v2384_v32 = vmul.f32 %v4963_v1, %v5020_v62  ;;  %v2390_v47 = vadd.f32 %v2382_v3, %v4925_v29 }
 0x28b   :  { %v2250_v27 = vmul.f32 %v5434_v48, %v2241_v16  ;;  %v5037_v38 = vadd.f32 %v5436_v25, %v2248_v49  ;;  %v2385_v15 = vmul.f32 %v4963_v1, %v5024_v22  ;;  %v2391_v45 = vadd.f32 %v2383_v35, %v4927_v21  ;;  %v5439_v16 = vld [vmem:[#allocation15_spill] sm:$0xff] }
 0x28c   :  { %v5043_v60 = vadd.f32 %v5436_v25, %v2249_v31  ;;  %v2386_v39 = vmul.f32 %v4963_v1, %v5030_v13  ;;  %v2392_v5 = vadd.f32 %v2384_v32, %v4929_v7  ;;  %v2400_v29 = vadd.f32 %v4966_v14, %v2390_v47  ;;  %v5437_v7 = vld [vmem:[#allocation18_spill] sm:$0xff] }
 0x28d   :  { %v5050_v48 = vadd.f32 %v5436_v25, %v2250_v27  ;;  %v2387_v10 = vmul.f32 %v4963_v1, %v5037_v38  ;;  %v2393_v51 = vadd.f32 %v2385_v15, %v4932_v44  ;;  %v2401_v21 = vadd.f32 %v4966_v14, %v2391_v45  ;;  %v5441_v15 = vld [vmem:[#allocation19_spill] sm:$0xff] }
 0x28e   :  { %v2388_v58 = vmul.f32 %v4963_v1, %v5043_v60  ;;  %v2394_v63 = vadd.f32 %v2386_v39, %v4934_v43  ;;  %v2402_v57 = vadd.f32 %v4966_v14, %v2392_v5  ;;  %v2512_v52 = vmul.f32 %v4979_v42, %v5437_v7  ;;  %v5442_v39 = vld [vmem:[#allocation20_spill] sm:$0xff] }
 0x28f   :  { %v2389_v25 = vmul.f32 %v4963_v1, %v5050_v48  ;;  %v2395_v55 = vadd.f32 %v2387_v10, %v4938_v56  ;;  %v2403_v3 = vadd.f32 %v4966_v14, %v2393_v51  ;;  %v2587_v44 = vsel %vm2564_vm0, %v2401_v21, %v2400_v29  ;;  %v5440_v56 = vld [vmem:[#allocation16_spill] sm:$0xff]  ;;  %v5443_v10 = vld [vmem:[#allocation22_spill] sm:$0xff]  ;;  %v5444_v21 = vld [vmem:[#allocation23_spill] sm:$0xff] }
 0x290   :  { %v2396_v12 = vadd.f32 %v2388_v58, %v5438_v30  ;;  %v2404_v11 = vadd.f32 %v4966_v14, %v2394_v63  ;;  %v2588_v43 = vsel %vm2566_vm1, %v2402_v57, %v2587_v44  ;;  %v2513_v49 = vmul.f32 %v4979_v42, %v5439_v16  ;;  %v5445_v57 = vld [vmem:[#allocation24_spill] sm:$0xff] }
 0x291   :  { %v2397_v35 = vadd.f32 %v2389_v25, %v4960_v54  ;;  %v2405_v31 = vadd.f32 %v4966_v14, %v2395_v55  ;;  %v2589_v1 = vsel %vm2568_vm2, %v2403_v3, %v2588_v43  ;;  %v2514_v32 = vmul.f32 %v4979_v42, %v5440_v56 }
 0x292   :  { %v2406_v47 = vadd.f32 %v4966_v14, %v2396_v12  ;;  %v2590_v27 = vsel %vm2570_vm3, %v2404_v11, %v2589_v1  ;;  %v2515_v45 = vmul.f32 %v4979_v42, %v5441_v15  ;;  %v2516_v5 = vmul.f32 %v4979_v42, %v5442_v39 }
 0x293   :  { %v2407_v29 = vadd.f32 %v4966_v14, %v2397_v35  ;;  %v2591_v54 = vsel %vm2572_vm4, %v2405_v31, %v2590_v27  ;;  %v2517_v51 = vmul.f32 %v4979_v42, %v5443_v10  ;;  %v2518_v58 = vmul.f32 %v4979_v42, %v5444_v21 }
 0x294   :  { %v2592_v63 = vsel %vm2574_vm5, %v2406_v47, %v2591_v54  ;;  %v2519_v25 = vmul.f32 %v4979_v42, %v5445_v57  ;;  %v2520_v55 = vadd.f32 %v2512_v52, %v4993_v37  ;;  %v2521_v3 = vadd.f32 %v2513_v49, %v4995_v4 }
 0x295   :  { %v2593_v14 = vsel %vm2576_vm6, %v2407_v29, %v2592_v63  ;;  %v2522_v44 = vadd.f32 %v2514_v32, %v4997_v23  ;;  %v2523_v30 = vadd.f32 %v2515_v45, %v4999_v61  ;;  %v2524_v12 = vadd.f32 %v2516_v5, %v5005_v26 }
 0x296   :  { %v5100_v11 = vmax.f32 %v2593_v14, 0.0  ;;  %v2525_v43 = vadd.f32 %v2517_v51, %v5008_v17  ;;  %v2526_v35 = vadd.f32 %v2518_v58, %v5010_v34  ;;  %v2527_v31 = vadd.f32 %v2519_v25, %v2509_v20 }
 0x297   :  { %v2530_v42 = vmul.f32 %v4982_v53, %v5003_v18  ;;  %v2531_v37 = vmul.f32 %v4982_v53, %v5014_v28  ;;  %v2532_v4 = vmul.f32 %v4982_v53, %v5020_v62  ;;  %v2533_v23 = vmul.f32 %v4982_v53, %v5024_v22 }
 0x298   :  { %v2637_v61 = vrot.slane %v5100_v11, 4  ;;  %v2534_v26 = vmul.f32 %v4982_v53, %v5030_v13  ;;  %v2535_v17 = vmul.f32 %v4982_v53, %v5037_v38  ;;  %v2536_v34 = vmul.f32 %v4982_v53, %v5043_v60 }
 0x299   :  { %v2537_v20 = vmul.f32 %v4982_v53, %v5050_v48  ;;  %v2538_v52 = vadd.f32 %v2530_v42, %v2520_v55  ;;  %v2539_v49 = vadd.f32 %v2531_v37, %v2521_v3  ;;  %v2540_v1 = vadd.f32 %v2532_v4, %v2522_v44 }
 0x29a   :  { %v2638_v32 = vadd.f32 %v2637_v61, %v5100_v11  ;;  %v2541_v47 = vadd.f32 %v2533_v23, %v2523_v30  ;;  %v2542_v27 = vadd.f32 %v2534_v26, %v2524_v12  ;;  %v2543_v45 = vadd.f32 %v2535_v17, %v2525_v43 }
 0x29b   :  { %v2544_v5 = vadd.f32 %v2536_v34, %v2526_v35  ;;  %v2545_v29 = vadd.f32 %v2537_v20, %v2527_v31  ;;  %v2547_v54 = vstv %s5089_s0  ;;  %v2261_v43 = vstv %s5104_s15  ;;  %s3063_s0 = sshll.u32 %s3704_s5, 4  ;;  %s3064_s0 = int_to_ptr.vmem [resolvable:$true] %s3063_s0 }
 0x29c   :  { %v2639_v51 = vrot.slane %v2638_v32, 2  ;;  %v2548_v58 = vadd.f32 %v2547_v54, %v2538_v52  ;;  %v2549_v63 = vadd.f32 %v2547_v54, %v2539_v49  ;;  %v2550_v25 = vadd.f32 %v2547_v54, %v2540_v1  ;;  %p3673_p0 = scmp.lt.s32.totalorder %s3064_s0, %s3064_s0 }
 0x29d   :  { %v2551_v14 = vadd.f32 %v2547_v54, %v2541_v47  ;;  %v2552_v53 = vadd.f32 %v2547_v54, %v2542_v27  ;;  %v2553_v55 = vadd.f32 %v2547_v54, %v2543_v45  ;;  %v2554_v44 = vadd.f32 %v2547_v54, %v2544_v5 }
 0x29e   :  { %v2640_v3 = vadd.f32 %v2639_v51, %v2638_v32  ;;  %v2555_v42 = vadd.f32 %v2547_v54, %v2545_v29  ;;  %v2619_v30 = vsel %vm2564_vm0, %v2549_v63, %v2548_v58  ;;  %v2271_v35 = vstv %s5114_s2 }
 0x29f   :  { %v2620_v12 = vsel %vm2566_vm1, %v2550_v25, %v2619_v30  ;;  %v2289_v37 = vstv %s5116_s3  ;;  %v2262_v23 = vmul.f32 %v2261_v43, %v5431_v6  ;;  %v2263_v61 = vmul.f32 %v2261_v43, %v5408_v24 }
 0x2a0   :  { %v2641_v31 = vrot.slane %v2640_v3, 1  ;;  %v2621_v4 = vsel %vm2568_vm2, %v2551_v14, %v2620_v12  ;;  %v2264_v17 = vmul.f32 %v2261_v43, %v5409_v46  ;;  %v2265_v34 = vmul.f32 %v2261_v43, %v5410_v40  ;;  %v5446_v14 = vld [vmem:[#allocation25_spill] sm:$0xff] }
 0x2a1   :  { %v2622_v26 = vsel %vm2570_vm3, %v2552_v53, %v2621_v4  ;;  %v2266_v20 = vmul.f32 %v2261_v43, %v5412_v8  ;;  %v2267_v1 = vmul.f32 %v2261_v43, %v5415_v36  ;;  %v2268_v32 = vmul.f32 %v2261_v43, %v4529_v0 }
 0x2a2   :  { %v2642_v52 = vadd.f32 %v2641_v31, %v2640_v3  ;;  %v2623_v49 = vsel %vm2572_vm4, %v2553_v55, %v2622_v26  ;;  %v2269_v27 = vmul.f32 %v2261_v43, %v5420_v50  ;;  %v2272_v45 = vmul.f32 %v2271_v35, %v4561_v2  ;;  %v5447_v55 = vld [vmem:[#allocation26_spill] sm:$0xff] }
 0x2a3   :  { %v2624_v47 = vsel %vm2574_vm5, %v2554_v44, %v2623_v49  ;;  %v2273_v5 = vmul.f32 %v2271_v35, %v4566_v41  ;;  %v2274_v51 = vmul.f32 %v2271_v35, %v5416_v33  ;;  %v2275_v58 = vmul.f32 %v2271_v35, %v5417_v9 }
 0x2a4   :  { %v2656_v29 = vmul.f32 0.125, %v2642_v52  ;;  %v2625_v54 = vsel %vm2576_vm6, %v2555_v42, %v2624_v47  ;;  %v2276_v25 = vmul.f32 %v2271_v35, %v5418_v59  ;;  %v2277_v53 = vmul.f32 %v2271_v35, %v5446_v14 }
 0x2a5   :  { %v5151_v63 = vmax.f32 %v2625_v54, 0.0  ;;  %v2278_v3 = vmul.f32 %v2271_v35, %v5447_v55  ;;  %v2279_v30 = vmul.f32 %v2271_v35, %v5435_v19  ;;  %v2280_v12 = vadd.f32 %v2272_v45, %v2262_v23 }
 0x2a6   :  { %v5157_v44 = vsub.f32 %v5100_v11, %v2656_v29  ;;  %v2281_v43 = vadd.f32 %v2273_v5, %v2263_v61  ;;  %v2282_v31 = vadd.f32 %v2274_v51, %v2264_v17  ;;  %v2283_v4 = vadd.f32 %v2275_v58, %v2265_v34 }
 0x2a7   :  { %v2649_v42 = vrot.slane %v5151_v63, 4  ;;  %v2284_v26 = vadd.f32 %v2276_v25, %v2266_v20  ;;  %v2285_v49 = vadd.f32 %v2277_v53, %v2267_v1  ;;  %v2286_v47 = vadd.f32 %v2278_v3, %v2268_v32 }
 0x2a8   :  { %5448 = vst [vmem:[#allocation31_spill] sm:$0xff] %v5157_v44  ;;  %v2664_v52 = vmul.f32 %v5157_v44, %v5157_v44  ;;  %v2287_v11 = vadd.f32 %v2279_v30, %v2269_v27  ;;  %v2290_v35 = vmul.f32 %v2289_v37, %v5437_v7  ;;  %v2291_v23 = vmul.f32 %v2289_v37, %v5439_v16 }
 0x2a9   :  { %v2650_v29 = vadd.f32 %v2649_v42, %v5151_v63  ;;  %v2292_v61 = vmul.f32 %v2289_v37, %v5440_v56  ;;  %v2293_v5 = vmul.f32 %v2289_v37, %v5441_v15  ;;  %v2294_v17 = vmul.f32 %v2289_v37, %v5442_v39 }
 0x2aa   :  { %v2673_v45 = vrot.slane %v2664_v52, 4  ;;  %v2295_v34 = vmul.f32 %v2289_v37, %v5443_v10  ;;  %v2296_v1 = vmul.f32 %v2289_v37, %v5444_v21  ;;  %v2297_v32 = vmul.f32 %v2289_v37, %v5445_v57 }
 0x2ab   :  { %v2651_v20 = vrot.slane %v2650_v29, 2  ;;  %v2298_v27 = vadd.f32 %v2290_v35, %v2280_v12  ;;  %v2299_v51 = vadd.f32 %v2291_v23, %v2281_v43  ;;  %v2300_v58 = vadd.f32 %v2292_v61, %v2282_v31 }
 0x2ac   :  { %v2674_v54 = vadd.f32 %v2673_v45, %v2664_v52  ;;  %v2301_v25 = vadd.f32 %v2293_v5, %v2283_v4  ;;  %v2302_v3 = vadd.f32 %v2294_v17, %v2284_v26  ;;  %v2303_v30 = vadd.f32 %v2295_v34, %v2285_v49 }
 0x2ad   :  { %v2652_v53 = vadd.f32 %v2651_v20, %v2650_v29  ;;  %v2304_v42 = vadd.f32 %v2296_v1, %v2286_v47  ;;  %v2305_v39 = vadd.f32 %v2297_v32, %v2287_v11  ;;  %v2307_v44 = vstv %s5160_s16 }
 0x2ae   :  { %v2675_v15 = vrot.slane %v2674_v54, 2  ;;  %v2325_v56 = vstv %s5162_s17  ;;  %v2308_v16 = vmul.f32 %v2307_v44, %v5003_v18  ;;  %v2309_v21 = vmul.f32 %v2307_v44, %v5014_v28 }
 0x2af   :  { %v2653_v10 = vrot.slane %v2652_v53, 1  ;;  %v2310_v37 = vmul.f32 %v2307_v44, %v5020_v62  ;;  %v2311_v43 = vmul.f32 %v2307_v44, %v5024_v22  ;;  %v2312_v31 = vmul.f32 %v2307_v44, %v5030_v13 }
 0x2b0   :  { %v2676_v12 = vadd.f32 %v2675_v15, %v2674_v54  ;;  %v2313_v4 = vmul.f32 %v2307_v44, %v5037_v38  ;;  %v2314_v52 = vmul.f32 %v2307_v44, %v5043_v60  ;;  %v2315_v49 = vmul.f32 %v2307_v44, %v5050_v48 }
 0x2b1   :  { %v2654_v26 = vadd.f32 %v2653_v10, %v2652_v53  ;;  %v2316_v47 = vadd.f32 %v2308_v16, %v2298_v27  ;;  %v2317_v29 = vadd.f32 %v2309_v21, %v2299_v51  ;;  %v2318_v35 = vadd.f32 %v2310_v37, %v2300_v58 }
 0x2b2   :  { %v2677_v11 = vrot.slane %v2676_v12, 1  ;;  %v2319_v23 = vadd.f32 %v2311_v43, %v2301_v25  ;;  %v2320_v15 = vadd.f32 %v2312_v31, %v2302_v3  ;;  %v2321_v45 = vadd.f32 %v2313_v4, %v2303_v30 }
 0x2b3   :  { %v2658_v61 = vmul.f32 0.125, %v2654_v26  ;;  %v2322_v5 = vadd.f32 %v2314_v52, %v2304_v42  ;;  %v2323_v34 = vadd.f32 %v2315_v49, %v2305_v39  ;;  %v2327_v20 = vadd.f32 %v2325_v56, %v2317_v29 }
 0x2b4   :  { %v2678_v17 = vadd.f32 %v2677_v11, %v2676_v12  ;;  %v2326_v10 = vadd.f32 %v2325_v56, %v2316_v47  ;;  %v2328_v32 = vadd.f32 %v2325_v56, %v2318_v35  ;;  %v2329_v54 = vadd.f32 %v2325_v56, %v2319_v23 }
 0x2b5   :  { %v5187_v1 = vsub.f32 %v5151_v63, %v2658_v61  ;;  %v2330_v16 = vadd.f32 %v2325_v56, %v2320_v15  ;;  %v2331_v27 = vadd.f32 %v2325_v56, %v2321_v45  ;;  %v2332_v51 = vadd.f32 %v2325_v56, %v2322_v5 }
 0x2b6   :  { %v2692_v44 = vmul.f32 0.125, %v2678_v17  ;;  %v2565_v58 = vsel %vm2564_vm0, %v2327_v20, %v2326_v10  ;;  %v2333_v53 = vadd.f32 %v2325_v56, %v2323_v34  ;;  %v2409_v3 = vstv %s3107_s18  ;;  %v5449_v17 = vld [vmem:[#allocation11_spill] sm:$0xff] }
 0x2b7   :  { %v2666_v21 = vmul.f32 %v5187_v1, %v5187_v1  ;;  %v2567_v39 = vsel %vm2566_vm1, %v2328_v32, %v2565_v58  ;;  %v2410_v42 = vmul.f32 %v2409_v3, %v5431_v6  ;;  %v2419_v37 = vstv %s3108_s19 }
 0x2b8   :  { %v2696_v25 = vadd.f32 1e-05, %v2692_v44  ;;  %v2569_v63 = vsel %vm2568_vm2, %v2329_v54, %v2567_v39  ;;  %v2411_v43 = vmul.f32 %v2409_v3, %v5408_v24  ;;  %v2412_v31 = vmul.f32 %v2409_v3, %v5409_v46  ;;  %v5212_v46 = vld [vmem:[%s5315_s6] sm:$0xf]  ;;  %v5451_v39 = vld [vmem:[#allocation16_spill] sm:$0xff]  ;;  %s5247_s6 = sld [smem:[#allocation2 + $0x2a]] }
 0x2b9   :  { %v2685_v30 = vrot.slane %v2666_v21, 4  ;;  %v2571_v12 = vsel %vm2570_vm3, %v2330_v16, %v2569_v63  ;;  %v2413_v26 = vmul.f32 %v2409_v3, %v5410_v40  ;;  %v2414_v52 = vmul.f32 %v2409_v3, %v5412_v8  ;;  %v5217_v40 = vld [vmem:[%s5316_s7] sm:$0xf] }
 0x2ba   :  { %3626 = vrsqrt.f32 %v2696_v25  ;;  %v2573_v56 = vsel %vm2572_vm4, %v2331_v27, %v2571_v12  ;;  %v2415_v49 = vmul.f32 %v2409_v3, %v5415_v36  ;;  %v2416_v47 = vmul.f32 %v2409_v3, %v4529_v0  ;;  %v5450_v25 = vld [vmem:[#allocation15_spill] sm:$0xff] }
 0x2bb   :  { %v2686_v4 = vadd.f32 %v2685_v30, %v2666_v21  ;;  %v2575_v6 = vsel %vm2574_vm5, %v2332_v51, %v2573_v56  ;;  %v2420_v24 = vmul.f32 %v2419_v37, %v4561_v2  ;;  %v2421_v29 = vmul.f32 %v2419_v37, %v4566_v41  ;;  %v5452_v30 = vld [vmem:[#allocation31_spill] sm:$0xff]  ;;  %v5455_v56 = vld [vmem:[#allocation22_spill] sm:$0xff] }
 0x2bc   :  { %v2577_v11 = vsel %vm2576_vm6, %v2333_v53, %v2575_v6  ;;  %v2422_v36 = vmul.f32 %v2419_v37, %v5416_v33  ;;  %v2423_v2 = vmul.f32 %v2419_v37, %v5417_v9  ;;  %v2424_v35 = vmul.f32 %v2419_v37, %v5418_v59 }
 0x2bd   :  { %v2687_v8 = vrot.slane %v2686_v4, 2  ;;  %v5222_v0 = vmax.f32 %v2577_v11, 0.0  ;;  %v2425_v23 = vmul.f32 %v2419_v37, %v5446_v14  ;;  %v2417_v15 = vmul.f32 %v2409_v3, %v5420_v50 }
 0x2be   :  { %v2426_v45 = vmul.f32 %v2419_v37, %v5447_v55  ;;  %v2427_v5 = vmul.f32 %v2419_v37, %v5435_v19  ;;  %v2716_v41 = vrot.slane %v5212_v46, %v5449_v17  ;;  %v2742_v33 = vrot.slane %v5217_v40, %v5449_v17  ;;  %v5453_v37 = vld [vmem:[#allocation19_spill] sm:$0xff] }
 0x2bf   :  { %v2688_v61 = vadd.f32 %v2687_v8, %v2686_v4  ;;  %v2631_v9 = vrot.slane %v5222_v0, 4  ;;  %v2428_v59 = vadd.f32 %v2420_v24, %v2410_v42  ;;  %v2429_v14 = vadd.f32 %v2421_v29, %v2411_v43  ;;  %v5454_v43 = vld [vmem:[#allocation20_spill] sm:$0xff] }
 0x2c0   :  { %v2430_v20 = vadd.f32 %v2422_v36, %v2412_v31  ;;  %v2431_v10 = vadd.f32 %v2423_v2, %v2413_v26  ;;  %v2432_v32 = vadd.f32 %v2424_v35, %v2414_v52  ;;  %v2433_v55 = vadd.f32 %v2425_v23, %v2415_v49  ;;  %v5456_v52 = vld [vmem:[#allocation23_spill] sm:$0xff] }
 0x2c1   :  { %v2689_v34 = vrot.slane %v2688_v61, 1  ;;  %v2632_v50 = vadd.f32 %v2631_v9, %v5222_v0  ;;  %v2437_v54 = vstv %s5198_s20  ;;  %v2434_v44 = vadd.f32 %v2426_v45, %v2416_v47 }
 0x2c2   :  { %v2435_v16 = vadd.f32 %v2427_v5, %v2417_v15  ;;  %v2455_v21 = vstv %s5203_s4  ;;  %v2438_v58 = vmul.f32 %v2437_v54, %v5437_v7  ;;  %v2439_v53 = vmul.f32 %v2437_v54, %v5450_v25 }
 0x2c3   :  { %v2690_v19 = vadd.f32 %v2689_v34, %v2688_v61  ;;  %v2633_v51 = vrot.slane %v2632_v50, 2  ;;  %v2440_v3 = vmul.f32 %v2437_v54, %v5451_v39  ;;  %v2441_v12 = vmul.f32 %v2437_v54, %v5453_v37 }
 0x2c4   :  { %v3627_v27 = vpop.eup %3626  ;;  %v2442_v31 = vmul.f32 %v2437_v54, %v5454_v43  ;;  %v2443_v26 = vmul.f32 %v2437_v54, %v5455_v56  ;;  %v2444_v6 = vmul.f32 %v2437_v54, %v5456_v52  ;;  %v2445_v49 = vmul.f32 %v2437_v54, %v5445_v57 }
 0x2c5   :  { %v2704_v63 = vmul.f32 %v3627_v27, %v5452_v30  ;;  %v2694_v42 = vmul.f32 0.125, %v2690_v19  ;;  %v2634_v4 = vadd.f32 %v2633_v51, %v2632_v50  ;;  %v2446_v24 = vadd.f32 %v2438_v58, %v2428_v59  ;;  %v5457_v58 = vld [vmem:[#allocation13_spill] sm:$0xff] }
 0x2c6   :  { %v2447_v8 = vadd.f32 %v2439_v53, %v2429_v14  ;;  %v2448_v29 = vadd.f32 %v2440_v3, %v2430_v20  ;;  %v2449_v36 = vadd.f32 %v2441_v12, %v2431_v10  ;;  %v2450_v2 = vadd.f32 %v2442_v31, %v2432_v32 }
 0x2c7   :  { %v2730_v7 = vmul.f32 %v2716_v41, %v2704_v63  ;;  %v2698_v47 = vadd.f32 1e-05, %v2694_v42  ;;  %v2635_v11 = vrot.slane %v2634_v4, 1  ;;  %v2451_v23 = vadd.f32 %v2443_v26, %v2433_v55 }
 0x2c8   :  { %v2456_v61 = vmul.f32 %v2455_v21, %v5003_v18  ;;  %v2457_v45 = vmul.f32 %v2455_v21, %v5014_v28  ;;  %v2458_v57 = vmul.f32 %v2455_v21, %v5020_v62  ;;  %v2459_v5 = vmul.f32 %v2455_v21, %v5024_v22 }
 0x2c9   :  { %v2756_v35 = vadd.f32 %v2742_v33, %v2730_v7  ;;  %3628 = vrsqrt.f32 %v2698_v47  ;;  %v2636_v15 = vadd.f32 %v2635_v11, %v2634_v4  ;;  %v2452_v17 = vadd.f32 %v2444_v6, %v2434_v44 }
 0x2ca   :  { %v2460_v41 = vmul.f32 %v2455_v21, %v5030_v13  ;;  %v2461_v9 = vmul.f32 %v2455_v21, %v5037_v38  ;;  %v2464_v59 = vadd.f32 %v2456_v61, %v2446_v24  ;;  %v2465_v34 = vadd.f32 %v2457_v45, %v2447_v8 }
 0x2cb   :  { %2894 = vmatprep.mubr.f32.mxu1 %v2756_v35  ;;  %v2655_v33 = vmul.f32 0.125, %v2636_v15  ;;  %v2466_v14 = vadd.f32 %v2458_v57, %v2448_v29  ;;  %v2467_v20 = vadd.f32 %v2459_v5, %v2449_v36  ;;  %v2453_v18 = vadd.f32 %v2445_v49, %v2435_v16  ;;  %v5458_v15 = vld [vmem:[#allocation12_spill] sm:$0xff] }
 0x2cc   :  { %v2462_v10 = vmul.f32 %v2455_v21, %v5043_v60  ;;  %v2463_v28 = vmul.f32 %v2455_v21, %v5050_v48  ;;  %v2468_v22 = vadd.f32 %v2460_v41, %v2450_v2  ;;  %v2469_v50 = vadd.f32 %v2461_v9, %v2451_v23 }
 0x2cd   :  { %v2659_v62 = vsub.f32 %v5222_v0, %v2655_v33  ;;  %v2473_v32 = vstv %s5247_s6  ;;  %v2724_v16 = vrot.slane %v5212_v46, %v5457_v58  ;;  %v2750_v21 = vrot.slane %v5217_v40, %v5457_v58 }
 0x2ce   :  { %v2474_v55 = vadd.f32 %v2473_v32, %v2464_v59  ;;  %v2475_v54 = vadd.f32 %v2473_v32, %v2465_v34  ;;  %v2476_v13 = vadd.f32 %v2473_v32, %v2466_v14  ;;  %v2477_v19 = vadd.f32 %v2473_v32, %v2467_v20 }
 0x2cf   :  { %v2663_v38 = vmul.f32 %v2659_v62, %v2659_v62  ;;  %v2470_v44 = vadd.f32 %v2462_v10, %v2452_v17  ;;  %v2471_v27 = vadd.f32 %v2463_v28, %v2453_v18  ;;  %v2478_v25 = vadd.f32 %v2473_v32, %v2468_v22  ;;  %v5459_v22 = vld [vmem:[#allocation14_spill] sm:$0xff] }
 0x2d0   :  { %v2603_v51 = vsel %vm2564_vm0, %v2475_v54, %v2474_v55  ;;  %v2479_v53 = vadd.f32 %v2473_v32, %v2469_v50  ;;  %v2712_v45 = vrot.slane %v5212_v46, %v5458_v15  ;;  %v2738_v41 = vrot.slane %v5217_v40, %v5458_v15 }
 0x2d1   :  { %v2667_v60 = vrot.slane %v2663_v38, 4  ;;  %v2604_v48 = vsel %vm2566_vm1, %v2476_v13, %v2603_v51  ;;  %v2480_v63 = vadd.f32 %v2473_v32, %v2470_v44  ;;  %v2481_v37 = vadd.f32 %v2473_v32, %v2471_v27 }
 0x2d2   :  { %v2605_v39 = vsel %vm2568_vm2, %v2477_v19, %v2604_v48  ;;  %v2720_v50 = vrot.slane %v5212_v46, %v5459_v22  ;;  %v2971_v19 = vld [vmem:[%s5319_s10] sm:$0xff]  ;;  %v2973_v46 = vld [vmem:[%s5319_s10 + $0x10] sm:$0xff]  ;;  %v3701_v27 = vmov 0.0|0.0   ;;  %v3703_v51 = vmov 0.0  }
 0x2d3   :  { %v3629_v0 = vpop.eup %3628  ;;  %v2668_v30 = vadd.f32 %v2667_v60, %v2663_v38  ;;  %v2606_v42 = vsel %vm2570_vm3, %v2478_v25, %v2605_v39  ;;  %v2972_v38 = vld [vmem:[%s5319_s10 + $0x8] sm:$0xff]  ;;  %3471 = vmatprep.subr.bf16.mxu1 %v3701_v27  ;;  %v3117_v48 = vld [vmem:[%s5318_s9] ss:$0 sm:$0xff]  ;;  %s3668_s9 = scalar_lea.vmem %s3064_s0, 128 }
 0x2d4   :  { %v2706_v3 = vmul.f32 %v3629_v0, %v5187_v1  ;;  %v2607_v12 = vsel %vm2572_vm4, %v2479_v53, %v2606_v42  ;;  %v3472_v44 = vpack.c.bf16 %v2972_v38, %v2971_v19  ;;  %p3669_p13 = scmp.ne.s32.totalorder %s3064_s0, %s3668_s9  ;;  %p3674_p1 = scmp.lt.s32.totalorder %s3668_s9, %s3668_s9 }
 0x2d5   :  { %v2669_v31 = vrot.slane %v2668_v30, 2  ;;  %v2608_v4 = vsel %vm2574_vm5, %v2480_v63, %v2607_v12  ;;  %v3118_v63 = vld [vmem:[%s5320_s11] ss:$0 sm:$0xff] }
 0x2d6   :  { %v2732_v43 = vmul.f32 %v2724_v16, %v2706_v3  ;;  %v2609_v56 = vsel %vm2576_vm6, %v2481_v37, %v2608_v4  ;;  %p3675_p2 = por %p3674_p1, %p3673_p0 }
 0x2d7   :  { %v2670_v52 = vadd.f32 %v2669_v31, %v2668_v30  ;;  %v2629_v6 = vmax.f32 %v2609_v56, 0.0 }
 0x2d8   :  { %v2758_v26 = vadd.f32 %v2750_v21, %v2732_v43  ;;  %p3676_p3 = pnand %p3675_p2, %p3669_p13 }
 0x2d9   :  { %v2671_v49 = vrot.slane %v2670_v52, 1  ;;  %v2643_v7 = vrot.slane %v2629_v6, 4 }
 0x2da   :  { %2964 = vmatprep.mubr.f32.mxu0 %v2758_v26 }
 0x2db   :  { %v2672_v1 = vadd.f32 %v2671_v49, %v2670_v52  ;;  %v2644_v47 = vadd.f32 %v2643_v7, %v2629_v6 }
 0x2dd   :  { %v2691_v24 = vmul.f32 0.125, %v2672_v1  ;;  %v2645_v8 = vrot.slane %v2644_v47, 2 }
 0x2df   :  { %v2695_v11 = vadd.f32 1e-05, %v2691_v24  ;;  %v2646_v29 = vadd.f32 %v2645_v8, %v2644_v47 }
 0x2e1   :  { %3630 = vrsqrt.f32 %v2695_v11  ;;  %v2647_v36 = vrot.slane %v2646_v29, 1 }
 0x2e3   :  { %v2648_v2 = vadd.f32 %v2647_v36, %v2646_v29 }
 0x2e5   :  { %v2657_v35 = vmul.f32 0.125, %v2648_v2 }
 0x2e7   :  { %v2661_v23 = vsub.f32 %v2629_v6, %v2657_v35 }
 0x2e9   :  { %v2665_v61 = vmul.f32 %v2661_v23, %v2661_v23 }
 0x2eb   :  { %v3631_v57 = vpop.eup %3630  ;;  %v2679_v5 = vrot.slane %v2665_v61, 4 }
 0x2ec   :  { %v2703_v17 = vmul.f32 %v3631_v57, %v2659_v62  ;;  %v2746_v62 = vrot.slane %v5217_v40, %v5459_v22  ;;  %v2974_v40 = vld [vmem:[%s5319_s10 + $0x18] sm:$0xff] }
 0x2ed   :  { %v2680_v9 = vadd.f32 %v2679_v5, %v2665_v61  ;;  %v3475_v58 = vpack.c.bf16 %v2974_v40, %v2973_v46 }
 0x2ee   :  { %v2729_v59 = vmul.f32 %v2712_v45, %v2703_v17 }
 0x2ef   :  { %v2681_v33 = vrot.slane %v2680_v9, 2 }
 0x2f0   :  { %v2755_v34 = vadd.f32 %v2738_v41, %v2729_v59 }
 0x2f1   :  { %v2682_v14 = vadd.f32 %v2681_v33, %v2680_v9 }
 0x2f2   :  { %2895 = vmatmul.mubr.f32.vlgmr.msra.gmra.mrb[2].mxu1 %v2755_v34 }
 0x2f3   :  { %v2683_v20 = vrot.slane %v2682_v14, 1  ;;  %3308 = vmatprep.mubr.msk.f32.mxu1 %vm3702_vm7, %v3703_v51  ;;  %3473 = vmatpush3.bf16.msra.mxu1 %v3472_v44 }
 0x2f4   :  { %3474 = vmatprep.subr.bf16.mxu1 %v3701_v27 }
 0x2f5   :  { %v2684_v18 = vadd.f32 %v2683_v20, %v2682_v14 }
 0x2f7   :  { %v2693_v10 = vmul.f32 0.125, %v2684_v18  ;;  %3476 = vmatpush3.bf16.msra.mxu1 %v3475_v58 }
 0x2f9   :  { %v2697_v28 = vadd.f32 1e-05, %v2693_v10 }
 0x2fb   :  { %3632 = vrsqrt.f32 %v2697_v28 }
 0x305   :  { %v3633_v32 = vpop.eup %3632 }
 0x306   :  { %v2705_v55 = vmul.f32 %v3633_v32, %v2661_v23 }
 0x308   :  { %v2731_v54 = vmul.f32 %v2720_v50, %v2705_v55 }
 0x30a   :  { %v2757_v13 = vadd.f32 %v2746_v62, %v2731_v54 }
 0x30c   :  { %2965 = vmatmul.mubr.f32.vlgmr.msra.gmra.mrb[4].mxu0 %v2757_v13 }
 0x3c5   :  { %v3257_v16 = vpop.f32.mrb[2].mxu1 }
 0x3c6   :  { %v3258_v60 = vpop.f32.mrb[3].mxu1 }
 0x3c7   :  { %v3259_v25 = vadd.f32 %v3258_v60, %v3257_v16 }
 0x3c9   :  { %v2897_v21 = vadd.f32 %v3259_v25, %v3117_v48 }
 0x3df   :  { %v3292_v0 = vpop.f32.mrb[4].mxu0 }
 0x3e0   :  { %v3293_v53 = vpop.f32.mrb[5].mxu0 }
 0x3e1   :  { %v3294_v39 = vadd.f32 %v3293_v53, %v3292_v0 }
 0x3e3   :  { %v2967_v3 = vadd.f32 %v3294_v39, %v2897_v21 }
 0x3e5   :  { %v2970_v30 = vmax.f32 %v2967_v3, 0.0 }
 0x3e7   :  { %3309 = vmatmul.mubr.msk.f32.vlgmr.msra.gmra.mrb[4].mxu1 %vm2982_vm8, %v2970_v30 }
 0x4ba   :  { %v3052_v42 = vpop.f32.mrb[4].mxu1 }
 0x4bb   :  { %v3053_v37 = vadd.f32 %v3118_v63, %v3052_v42  ;;  %v3310_v12 = vpop.f32.mrb[5].mxu1 }
 0x4bd   :  { %3056 = vst [vmem:[#allocation7] sm:$0xff] %v3053_v37 }
 0x4be   :  { %3679 = shalt.err (!%p3676_p3)
}
 0x4bf   :  { %s3680_s3 = scalar_lea.hbm %s5321_s12, 128 }
 0x4c0   :  { %p3681_p4 = scmp.ne.s32.totalorder %s5321_s12, %s3680_s3  ;;  %p3684_p5 = scmp.lt.u32.totalorder %s3680_s3, %s5321_s12 }
 0x4c2   :  { %p3686_p6 = pnand %p3684_p5, %p3681_p4 }
 0x4c4   :  { %3689 = shalt.err (!%p3686_p6)
}
 0x4c5   :  { %3066 = dma.vmem_to_hbm [thread:$0]  %s3064_s0, 128, %s5321_s12, [#allocation4]  }
 0x4c6   :  { %3694 = dma.done.wait [#allocation4], 128  }
 0x4c7   :  { %3695 = vsyncadd [#allocation4], 4294967168 }
 0x4c8   :  { %3070 = vsyncpa [#allocation3], 1 }
 0x4c9   :  { %3071 = vsyncpa [#allocation4], 1 }
 0x4ca   :  { %3072 = vsyncpa [#allocation5], 1 }

</bundles_post_ra>
